<compile_context>
chip_gen: v6e
topology: v6e:2x2x1
jax: 0.10.0
libtpu: 0.0.40
codegen_flags: <defaults>
</compile_context>

<pallas_src>
import jax
import jax.numpy as jnp
import numpy as np
from jax.experimental import pallas as pl
from jax.experimental.pallas import tpu as pltpu

# ----------------------------- model dimensions ----------------------------
X_DIM = 32     # x_dim  (flattened input feature size)
Z_DIM = 8      # args.z_dim
H1 = 50        # h1_dim
H11 = 100      # h11_dim
H12 = 100      # h12_dim

BATCH = 512    # demo batch (exercises the 2-tile "parallel" batch grid)

_SELU_ALPHA = 1.6732632423543772
_SELU_SCALE = 1.0507009873554805

LANES = 128                 # lane-dense width for inputs / activations / output
NUM_LAYERS = 8              # fused layer count (paired heads fused)

# streamed-input lane layout: [0:8)=unused, [8:16)=eps, [16:48)=x, rest zero
EPS_LANE = Z_DIM            # eps shares logvar's lanes -> no roll in reparam
X_LANE = 2 * Z_DIM

# output lane layout: [0:32)=dec_mu, [32:64)=dec_logvar, [64:72)=mu, [72:80)=logvar
OUT_ENC_OFF = 2 * X_DIM     # 64 == LANES // 2  (roll by 64 is direction-agnostic)


def _ceil_to(a, m):
    return ((a + m - 1) // m) * m


# ------------------------------ activations --------------------------------
def _selu(v):
    return _SELU_SCALE * jnp.where(v > 0, v, _SELU_ALPHA * (jnp.exp(v) - 1.0))


def _logsigmoid(v):
    # numerically stable log(sigmoid(v)) = min(v, 0) - log1p(exp(-|v|))
    return jnp.minimum(v, 0.0) - jnp.log1p(jnp.exp(-jnp.abs(v)))


# --------------------------------- kernel ----------------------------------
def _vae_kernel(xin_ref, w_ref, b_ref, out_ref):
    def lin(h, i):
        # uniform unmasked [tb,128] @ [128,128] bf16 MXU matmul, f32 acc,
        # f32 bias add; padded rows/cols of the slab are exact zeros.
        return jnp.dot(h.astype(jnp.bfloat16), w_ref[i],
                       preferred_element_type=jnp.float32) + b_ref[i:i + 1, :]

    xin = xin_ref[...]                                        # (tb, 128) f32
    lane = jax.lax.broadcasted_iota(jnp.int32, xin.shape, 1)
    mask_mu = lane < Z_DIM                                    # lanes 0:8
    mask_lv = jnp.logical_and(lane >= Z_DIM, lane < 2 * Z_DIM)  # lanes 8:16

    # ----- encoder -----
    h = _selu(lin(xin, 0))          # fc10 (weight rows 16:48 <- x lanes)
    h = _selu(lin(h, 1))            # fc11
    h = _logsigmoid(lin(h, 2))      # fc12 (padded lanes hold -log2; weight rows there are 0)
    enc = lin(h, 3)                 # fused fc21|fc22: lanes 0:8 = mu, 8:16 = logvar

    # ----- reparameterize (training mode; eps supplied from host) -----
    # eps lives in lanes 8:16 of xin (same lanes as logvar); dec_fc30's weight
    # rows are duplicated at rows 0:8 and 8:16, so by linearity
    # (mu @ W30) + (eps*std @ W30) == (mu + eps*std) @ W30 — no lane shuffle.
    # TODO(synk): eps could be generated in-kernel with pltpu.prng_seed /
    # prng_random_bits; kept host-supplied for deterministic comparison.
    z = jnp.where(mask_mu, enc, 0.0) \
        + jnp.where(mask_lv, xin * jnp.exp(0.5 * enc), 0.0)

    # ----- decoder -----
    h = jnp.tanh(lin(z, 4))         # fc30 (duplicated rows 0:8 / 8:16)
    h = jnp.tanh(lin(h, 5))         # fc31
    h = jnp.tanh(lin(h, 6))         # fc32
    dec = lin(h, 7)                 # fused fc4|fc5: lanes 0:32 = dec_mu, 32:64 = dec_logvar

    # Single unmasked 128-lane store: [dec_mu|dec_logvar|mu|logvar|zeros].
    # enc lanes 16:128 and dec lanes 64:128 are exact zeros, so roll+add is exact.
    out_ref[...] = dec + pltpu.roll(enc, shift=OUT_ENC_OFF, axis=1)


# ------------------------------ parameters ---------------------------------
def _init_linear(key, fan_in, fan_out):
    """torch.nn.Linear default init (uniform +-1/sqrt(fan_in)); W pre-transposed."""
    kw, kb = jax.random.split(key)
    bound = 1.0 / jnp.sqrt(float(fan_in))
    w = jax.random.uniform(kw, (fan_in, fan_out), jnp.float32, -bound, bound)
    b = jax.random.uniform(kb, (1, fan_out), jnp.float32, -bound, bound)
    return w, b


def make_params(key):
    dims = [
        ("enc_fc10", X_DIM, H12),
        ("enc_fc11", H12, H11),
        ("enc_fc12", H11, H1),
        ("enc_fc21", H1, Z_DIM),
        ("enc_fc22", H1, Z_DIM),
        ("dec_fc30", Z_DIM, H1),
        ("dec_fc31", H1, H11),
        ("dec_fc32", H11, H12),
        ("dec_fc4", H12, X_DIM),
        ("dec_fc5", H12, X_DIM),   # bfixlogvar=False -> fc5 exists
    ]
    keys = jax.random.split(key, len(dims))
    raw = {name: _init_linear(k, fi, fo) for k, (name, fi, fo) in zip(keys, dims)}

    params = {n: raw[n] for n in
              ("enc_fc10", "enc_fc11", "enc_fc12", "dec_fc30", "dec_fc31", "dec_fc32")}
    # fuse the paired heads into single matmuls
    params["enc_head"] = (jnp.concatenate([raw["enc_fc21"][0], raw["enc_fc22"][0]], axis=1),
                          jnp.concatenate([raw["enc_fc21"][1], raw["enc_fc22"][1]], axis=1))
    params["dec_head"] = (jnp.concatenate([raw["dec_fc4"][0], raw["dec_fc5"][0]], axis=1),
                          jnp.concatenate([raw["dec_fc4"][1], raw["dec_fc5"][1]], axis=1))
    return params


def pack_slabs(params):
    """Pack weights into one bf16 [8,128,128] slab + biases into f32 [8,128]."""
    w = np.zeros((NUM_LAYERS, LANES, LANES), np.float32)
    b = np.zeros((NUM_LAYERS, LANES), np.float32)

    def put(i, name, row0=0):
        wt, bt = params[name]
        wt = np.asarray(wt)
        fi, fo = wt.shape
        w[i, row0:row0 + fi, :fo] = wt
        b[i, :fo] = np.asarray(bt).reshape(-1)

    put(0, "enc_fc10", row0=X_LANE)      # x lives at lanes 16:48 of the input
    put(1, "enc_fc11")
    put(2, "enc_fc12")
    put(3, "enc_head")
    put(4, "dec_fc30")
    # duplicate dec_fc30 weight at rows 8:16 so the eps*std term (lanes 8:16
    # of z) multiplies the same weights as mu (lanes 0:8)
    w[4, Z_DIM:2 * Z_DIM, :H1] = np.asarray(params["dec_fc30"][0])
    put(5, "dec_fc31")
    put(6, "dec_fc32")
    put(7, "dec_head")

    return jnp.asarray(w, jnp.bfloat16), jnp.asarray(b, jnp.float32)


# -------------------------------- wrapper -----------------------------------
def _pick_tile(batch_r):
    # one tile for small batches; otherwise >= 2 tiles (keeps both v7x
    # TensorCores busy via the "parallel" batch axis), each up to 512 rows to
    # amortize per-step overhead and fill the 256-row MXU on v6e/v7x.
    if batch_r <= 128:
        return batch_r
    return min(512, _ceil_to((batch_r + 1) // 2, 8))


@jax.jit
def vae_forward(x, eps, w_slab, b_slab):
    """Returns ((dec_mu, dec_logvar), mu, logvar), matching VAEmod.forward."""
    x2d = x.reshape(-1, X_DIM)           # x.view(-1, x_dim)
    batch = x2d.shape[0]

    batch_r = _ceil_to(batch, 8)
    tile_b = _pick_tile(batch_r)
    batch_p = _ceil_to(batch_r, tile_b)

    # one lane-dense streamed input: lanes 8:16 = eps, lanes 16:48 = x, rest 0
    xin = jnp.zeros((batch_p, LANES), jnp.float32)
    xin = xin.at[:batch, EPS_LANE:EPS_LANE + Z_DIM].set(eps)
    xin = xin.at[:batch, X_LANE:X_LANE + X_DIM].set(x2d)

    grid = (batch_p // tile_b,)

    out = pl.pallas_call(
        _vae_kernel,
        out_shape=jax.ShapeDtypeStruct((batch_p, LANES), jnp.float32),
        grid_spec=pltpu.PrefetchScalarGridSpec(
            num_scalar_prefetch=0,
            grid=grid,
            in_specs=[
                pl.BlockSpec((tile_b, LANES), lambda i: (i, 0)),            # x|eps streams
                pl.BlockSpec((NUM_LAYERS, LANES, LANES), lambda i: (0, 0, 0)),  # bf16 weights, resident
                pl.BlockSpec((NUM_LAYERS, LANES), lambda i: (0, 0)),        # f32 biases, resident
            ],
            out_specs=pl.BlockSpec((tile_b, LANES), lambda i: (i, 0)),
        ),
        compiler_params=pltpu.CompilerParams(
            dimension_semantics=("parallel",),   # batch tiles over v7x's 2 TCs
        ),
    )(xin, w_slab, b_slab)

    dec_mu = out[:batch, 0:X_DIM]
    dec_logvar = out[:batch, X_DIM:2 * X_DIM]
    mu = out[:batch, OUT_ENC_OFF:OUT_ENC_OFF + Z_DIM]
    logvar = out[:batch, OUT_ENC_OFF + Z_DIM:OUT_ENC_OFF + 2 * Z_DIM]
    return (dec_mu, dec_logvar), mu, logvar


# ----------------------- pure-JAX reference (f32) ---------------------------
def vae_forward_ref(x, eps, params):
    def lin(h, name):
        w, b = params[name]
        return h @ w + b

    x2d = x.reshape(-1, X_DIM)
    h10 = _selu(lin(x2d, "enc_fc10"))
    h11 = _selu(lin(h10, "enc_fc11"))
    h1 = _logsigmoid(lin(h11, "enc_fc12"))
    enc = lin(h1, "enc_head")
    mu, logvar = enc[:, :Z_DIM], enc[:, Z_DIM:]
    z = eps * jnp.exp(0.5 * logvar) + mu
    h30 = jnp.tanh(lin(z, "dec_fc30"))
    h31 = jnp.tanh(lin(h30, "dec_fc31"))
    h32 = jnp.tanh(lin(h31, "dec_fc32"))
    dec = lin(h32, "dec_head")
    return (dec[:, :X_DIM], dec[:, X_DIM:]), mu, logvar


if __name__ == "__main__":
    key = jax.random.PRNGKey(0)
    k_params, k_x, k_eps = jax.random.split(key, 3)

    params = make_params(k_params)
    w_slab, b_slab = pack_slabs(params)

    x = jax.random.normal(k_x, (BATCH, X_DIM), jnp.float32)
    eps = jax.random.normal(k_eps, (BATCH, Z_DIM), jnp.float32)  # reparam noise

    (dec_mu, dec_logvar), mu, logvar = vae_forward(x, eps, w_slab, b_slab)
    jax.block_until_ready((dec_mu, dec_logvar, mu, logvar))

    assert dec_mu.shape == (BATCH, X_DIM)
    assert dec_logvar.shape == (BATCH, X_DIM)
    assert mu.shape == (BATCH, Z_DIM)
    assert logvar.shape == (BATCH, Z_DIM)

    # sanity vs f32 reference (kernel uses bf16 MXU operands -> loose tolerance)
    (rdm, rdl), rmu, rlv = vae_forward_ref(x, eps, params)
    np.testing.assert_allclose(np.asarray(mu), np.asarray(rmu), rtol=5e-2, atol=5e-2)
    np.testing.assert_allclose(np.asarray(logvar), np.asarray(rlv), rtol=5e-2, atol=5e-2)
    np.testing.assert_allclose(np.asarray(dec_mu), np.asarray(rdm), rtol=5e-2, atol=5e-2)
    np.testing.assert_allclose(np.asarray(dec_logvar), np.asarray(rdl), rtol=5e-2, atol=5e-2)

    print("KERNEL_OK")
</pallas_src>

<mosaic_0001>
module attributes {stable_mosaic.version = 11 : i64} {
  func.func @_vae_kernel(%arg0: i32, %arg1: memref<256x128xf32, #tpu.memory_space<vmem>>, %arg2: memref<8x128x128xbf16, #tpu.memory_space<vmem>>, %arg3: memref<8x128xf32, #tpu.memory_space<vmem>>, %arg4: memref<256x128xf32, #tpu.memory_space<vmem>>) attributes {dimension_semantics = [#tpu.dimension_semantics<parallel>], iteration_bounds = array<i64: 2>, scalar_prefetch = 0 : i64, scratch_operands = 0 : i64, tpu.core_type = #tpu.core_type<tc>, window_params = [{transform_indices = @transform_0, window_bounds = array<i64: 256, 128>}, {pipeline_mode = #tpu.pipeline_mode<synchronous>, transform_indices = @transform_1, window_bounds = array<i64: 8, 128, 128>}, {pipeline_mode = #tpu.pipeline_mode<synchronous>, transform_indices = @transform_2, window_bounds = array<i64: 8, 128>}, {transform_indices = @transform_3, window_bounds = array<i64: 256, 128>}]} {
    %c0 = arith.constant 0 : index
    %c0_0 = arith.constant 0 : index
    %0 = vector.load %arg1[%c0, %c0_0] : memref<256x128xf32, #tpu.memory_space<vmem>>, vector<256x128xf32>
    %1 = tpu.iota {dimensions = array<i32: 1>} : vector<256x128xi32>
    %c8_i32 = arith.constant 8 : i32
    %2 = vector.broadcast %c8_i32 : i32 to vector<256x128xi32>
    %3 = arith.cmpi slt, %1, %2 : vector<256x128xi32>
    %c8_i32_1 = arith.constant 8 : i32
    %4 = vector.broadcast %c8_i32_1 : i32 to vector<256x128xi32>
    %5 = arith.cmpi sge, %1, %4 : vector<256x128xi32>
    %c16_i32 = arith.constant 16 : i32
    %6 = vector.broadcast %c16_i32 : i32 to vector<256x128xi32>
    %7 = arith.cmpi slt, %1, %6 : vector<256x128xi32>
    %8 = arith.andi %5, %7 : vector<256x128xi1>
    %9 = arith.truncf %0 : vector<256x128xf32> to vector<256x128xbf16>
    %c0_2 = arith.constant 0 : index
    %c0_3 = arith.constant 0 : index
    %c0_4 = arith.constant 0 : index
    %10 = vector.load %arg2[%c0_2, %c0_3, %c0_4] : memref<8x128x128xbf16, #tpu.memory_space<vmem>>, vector<1x128x128xbf16>
    %11 = vector.shape_cast %10 : vector<1x128x128xbf16> to vector<128x128xbf16>
    %cst = arith.constant dense<0.000000e+00> : vector<256x128xf32>
    %12 = tpu.matmul %9, %11, %cst {dimension_numbers = #tpu.dot_dimension_numbers<[1], [0], [0], [1], [0, 0, 1, 1], [], []>} : vector<256x128xbf16>, vector<128x128xbf16>, vector<256x128xf32> -> vector<256x128xf32>
    %c0_5 = arith.constant 0 : index
    %c0_6 = arith.constant 0 : index
    %13 = vector.load %arg3[%c0_5, %c0_6] : memref<8x128xf32, #tpu.memory_space<vmem>>, vector<1x128xf32>
    %14 = vector.broadcast %13 : vector<1x128xf32> to vector<256x128xf32>
    %15 = arith.addf %12, %14 : vector<256x128xf32>
    %cst_7 = arith.constant 0.000000e+00 : f32
    %16 = vector.broadcast %cst_7 : f32 to vector<256x128xf32>
    %17 = arith.cmpf ogt, %15, %16 : vector<256x128xf32>
    %18 = math.exp %15 : vector<256x128xf32>
    %cst_8 = arith.constant 1.000000e+00 : f32
    %19 = vector.broadcast %cst_8 : f32 to vector<256x128xf32>
    %20 = arith.subf %18, %19 : vector<256x128xf32>
    %cst_9 = arith.constant 1.67326319 : f32
    %21 = vector.broadcast %cst_9 : f32 to vector<256x128xf32>
    %22 = arith.mulf %21, %20 : vector<256x128xf32>
    %23 = arith.select %17, %15, %22 : vector<256x128xi1>, vector<256x128xf32>
    %cst_10 = arith.constant 1.05070102 : f32
    %24 = vector.broadcast %cst_10 : f32 to vector<256x128xf32>
    %25 = arith.mulf %24, %23 : vector<256x128xf32>
    %26 = arith.truncf %25 : vector<256x128xf32> to vector<256x128xbf16>
    %c1 = arith.constant 1 : index
    %c0_11 = arith.constant 0 : index
    %c0_12 = arith.constant 0 : index
    %27 = vector.load %arg2[%c1, %c0_11, %c0_12] : memref<8x128x128xbf16, #tpu.memory_space<vmem>>, vector<1x128x128xbf16>
    %28 = vector.shape_cast %27 : vector<1x128x128xbf16> to vector<128x128xbf16>
    %cst_13 = arith.constant dense<0.000000e+00> : vector<256x128xf32>
    %29 = tpu.matmul %26, %28, %cst_13 {dimension_numbers = #tpu.dot_dimension_numbers<[1], [0], [0], [1], [0, 0, 1, 1], [], []>} : vector<256x128xbf16>, vector<128x128xbf16>, vector<256x128xf32> -> vector<256x128xf32>
    %c1_14 = arith.constant 1 : index
    %c0_15 = arith.constant 0 : index
    %30 = vector.load %arg3[%c1_14, %c0_15] : memref<8x128xf32, #tpu.memory_space<vmem>>, vector<1x128xf32>
    %31 = vector.broadcast %30 : vector<1x128xf32> to vector<256x128xf32>
    %32 = arith.addf %29, %31 : vector<256x128xf32>
    %cst_16 = arith.constant 0.000000e+00 : f32
    %33 = vector.broadcast %cst_16 : f32 to vector<256x128xf32>
    %34 = arith.cmpf ogt, %32, %33 : vector<256x128xf32>
    %35 = math.exp %32 : vector<256x128xf32>
    %cst_17 = arith.constant 1.000000e+00 : f32
    %36 = vector.broadcast %cst_17 : f32 to vector<256x128xf32>
    %37 = arith.subf %35, %36 : vector<256x128xf32>
    %cst_18 = arith.constant 1.67326319 : f32
    %38 = vector.broadcast %cst_18 : f32 to vector<256x128xf32>
    %39 = arith.mulf %38, %37 : vector<256x128xf32>
    %40 = arith.select %34, %32, %39 : vector<256x128xi1>, vector<256x128xf32>
    %cst_19 = arith.constant 1.05070102 : f32
    %41 = vector.broadcast %cst_19 : f32 to vector<256x128xf32>
    %42 = arith.mulf %41, %40 : vector<256x128xf32>
    %43 = arith.truncf %42 : vector<256x128xf32> to vector<256x128xbf16>
    %c2 = arith.constant 2 : index
    %c0_20 = arith.constant 0 : index
    %c0_21 = arith.constant 0 : index
    %44 = vector.load %arg2[%c2, %c0_20, %c0_21] : memref<8x128x128xbf16, #tpu.memory_space<vmem>>, vector<1x128x128xbf16>
    %45 = vector.shape_cast %44 : vector<1x128x128xbf16> to vector<128x128xbf16>
    %cst_22 = arith.constant dense<0.000000e+00> : vector<256x128xf32>
    %46 = tpu.matmul %43, %45, %cst_22 {dimension_numbers = #tpu.dot_dimension_numbers<[1], [0], [0], [1], [0, 0, 1, 1], [], []>} : vector<256x128xbf16>, vector<128x128xbf16>, vector<256x128xf32> -> vector<256x128xf32>
    %c2_23 = arith.constant 2 : index
    %c0_24 = arith.constant 0 : index
    %47 = vector.load %arg3[%c2_23, %c0_24] : memref<8x128xf32, #tpu.memory_space<vmem>>, vector<1x128xf32>
    %48 = vector.broadcast %47 : vector<1x128xf32> to vector<256x128xf32>
    %49 = arith.addf %46, %48 : vector<256x128xf32>
    %cst_25 = arith.constant 0.000000e+00 : f32
    %50 = vector.broadcast %cst_25 : f32 to vector<256x128xf32>
    %51 = arith.minimumf %49, %50 : vector<256x128xf32>
    %52 = math.absf %49 : vector<256x128xf32>
    %cst_26 = arith.constant 0.000000e+00 : f32
    %53 = vector.broadcast %cst_26 : f32 to vector<256x128xf32>
    %54 = arith.subf %53, %52 : vector<256x128xf32>
    %55 = math.exp %54 : vector<256x128xf32>
    %56 = math.log1p %55 : vector<256x128xf32>
    %57 = arith.subf %51, %56 : vector<256x128xf32>
    %58 = arith.truncf %57 : vector<256x128xf32> to vector<256x128xbf16>
    %c3 = arith.constant 3 : index
    %c0_27 = arith.constant 0 : index
    %c0_28 = arith.constant 0 : index
    %59 = vector.load %arg2[%c3, %c0_27, %c0_28] : memref<8x128x128xbf16, #tpu.memory_space<vmem>>, vector<1x128x128xbf16>
    %60 = vector.shape_cast %59 : vector<1x128x128xbf16> to vector<128x128xbf16>
    %cst_29 = arith.constant dense<0.000000e+00> : vector<256x128xf32>
    %61 = tpu.matmul %58, %60, %cst_29 {dimension_numbers = #tpu.dot_dimension_numbers<[1], [0], [0], [1], [0, 0, 1, 1], [], []>} : vector<256x128xbf16>, vector<128x128xbf16>, vector<256x128xf32> -> vector<256x128xf32>
    %c3_30 = arith.constant 3 : index
    %c0_31 = arith.constant 0 : index
    %62 = vector.load %arg3[%c3_30, %c0_31] : memref<8x128xf32, #tpu.memory_space<vmem>>, vector<1x128xf32>
    %63 = vector.broadcast %62 : vector<1x128xf32> to vector<256x128xf32>
    %64 = arith.addf %61, %63 : vector<256x128xf32>
    %cst_32 = arith.constant 0.000000e+00 : f32
    %65 = vector.broadcast %cst_32 : f32 to vector<256x128xf32>
    %66 = arith.select %3, %64, %65 : vector<256x128xi1>, vector<256x128xf32>
    %cst_33 = arith.constant 5.000000e-01 : f32
    %67 = vector.broadcast %cst_33 : f32 to vector<256x128xf32>
    %68 = arith.mulf %67, %64 : vector<256x128xf32>
    %69 = math.exp %68 : vector<256x128xf32>
    %70 = arith.mulf %0, %69 : vector<256x128xf32>
    %cst_34 = arith.constant 0.000000e+00 : f32
    %71 = vector.broadcast %cst_34 : f32 to vector<256x128xf32>
    %72 = arith.select %8, %70, %71 : vector<256x128xi1>, vector<256x128xf32>
    %73 = arith.addf %66, %72 : vector<256x128xf32>
    %74 = arith.truncf %73 : vector<256x128xf32> to vector<256x128xbf16>
    %c4 = arith.constant 4 : index
    %c0_35 = arith.constant 0 : index
    %c0_36 = arith.constant 0 : index
    %75 = vector.load %arg2[%c4, %c0_35, %c0_36] : memref<8x128x128xbf16, #tpu.memory_space<vmem>>, vector<1x128x128xbf16>
    %76 = vector.shape_cast %75 : vector<1x128x128xbf16> to vector<128x128xbf16>
    %cst_37 = arith.constant dense<0.000000e+00> : vector<256x128xf32>
    %77 = tpu.matmul %74, %76, %cst_37 {dimension_numbers = #tpu.dot_dimension_numbers<[1], [0], [0], [1], [0, 0, 1, 1], [], []>} : vector<256x128xbf16>, vector<128x128xbf16>, vector<256x128xf32> -> vector<256x128xf32>
    %c4_38 = arith.constant 4 : index
    %c0_39 = arith.constant 0 : index
    %78 = vector.load %arg3[%c4_38, %c0_39] : memref<8x128xf32, #tpu.memory_space<vmem>>, vector<1x128xf32>
    %79 = vector.broadcast %78 : vector<1x128xf32> to vector<256x128xf32>
    %80 = arith.addf %77, %79 : vector<256x128xf32>
    %81 = math.tanh %80 : vector<256x128xf32>
    %82 = arith.truncf %81 : vector<256x128xf32> to vector<256x128xbf16>
    %c5 = arith.constant 5 : index
    %c0_40 = arith.constant 0 : index
    %c0_41 = arith.constant 0 : index
    %83 = vector.load %arg2[%c5, %c0_40, %c0_41] : memref<8x128x128xbf16, #tpu.memory_space<vmem>>, vector<1x128x128xbf16>
    %84 = vector.shape_cast %83 : vector<1x128x128xbf16> to vector<128x128xbf16>
    %cst_42 = arith.constant dense<0.000000e+00> : vector<256x128xf32>
    %85 = tpu.matmul %82, %84, %cst_42 {dimension_numbers = #tpu.dot_dimension_numbers<[1], [0], [0], [1], [0, 0, 1, 1], [], []>} : vector<256x128xbf16>, vector<128x128xbf16>, vector<256x128xf32> -> vector<256x128xf32>
    %c5_43 = arith.constant 5 : index
    %c0_44 = arith.constant 0 : index
    %86 = vector.load %arg3[%c5_43, %c0_44] : memref<8x128xf32, #tpu.memory_space<vmem>>, vector<1x128xf32>
    %87 = vector.broadcast %86 : vector<1x128xf32> to vector<256x128xf32>
    %88 = arith.addf %85, %87 : vector<256x128xf32>
    %89 = math.tanh %88 : vector<256x128xf32>
    %90 = arith.truncf %89 : vector<256x128xf32> to vector<256x128xbf16>
    %c6 = arith.constant 6 : index
    %c0_45 = arith.constant 0 : index
    %c0_46 = arith.constant 0 : index
    %91 = vector.load %arg2[%c6, %c0_45, %c0_46] : memref<8x128x128xbf16, #tpu.memory_space<vmem>>, vector<1x128x128xbf16>
    %92 = vector.shape_cast %91 : vector<1x128x128xbf16> to vector<128x128xbf16>
    %cst_47 = arith.constant dense<0.000000e+00> : vector<256x128xf32>
    %93 = tpu.matmul %90, %92, %cst_47 {dimension_numbers = #tpu.dot_dimension_numbers<[1], [0], [0], [1], [0, 0, 1, 1], [], []>} : vector<256x128xbf16>, vector<128x128xbf16>, vector<256x128xf32> -> vector<256x128xf32>
    %c6_48 = arith.constant 6 : index
    %c0_49 = arith.constant 0 : index
    %94 = vector.load %arg3[%c6_48, %c0_49] : memref<8x128xf32, #tpu.memory_space<vmem>>, vector<1x128xf32>
    %95 = vector.broadcast %94 : vector<1x128xf32> to vector<256x128xf32>
    %96 = arith.addf %93, %95 : vector<256x128xf32>
    %97 = math.tanh %96 : vector<256x128xf32>
    %98 = arith.truncf %97 : vector<256x128xf32> to vector<256x128xbf16>
    %c7 = arith.constant 7 : index
    %c0_50 = arith.constant 0 : index
    %c0_51 = arith.constant 0 : index
    %99 = vector.load %arg2[%c7, %c0_50, %c0_51] : memref<8x128x128xbf16, #tpu.memory_space<vmem>>, vector<1x128x128xbf16>
    %100 = vector.shape_cast %99 : vector<1x128x128xbf16> to vector<128x128xbf16>
    %cst_52 = arith.constant dense<0.000000e+00> : vector<256x128xf32>
    %101 = tpu.matmul %98, %100, %cst_52 {dimension_numbers = #tpu.dot_dimension_numbers<[1], [0], [0], [1], [0, 0, 1, 1], [], []>} : vector<256x128xbf16>, vector<128x128xbf16>, vector<256x128xf32> -> vector<256x128xf32>
    %c7_53 = arith.constant 7 : index
    %c0_54 = arith.constant 0 : index
    %102 = vector.load %arg3[%c7_53, %c0_54] : memref<8x128xf32, #tpu.memory_space<vmem>>, vector<1x128xf32>
    %103 = vector.broadcast %102 : vector<1x128xf32> to vector<256x128xf32>
    %104 = arith.addf %101, %103 : vector<256x128xf32>
    %c64_i32 = arith.constant 64 : i32
    %105 = tpu.dynamic_rotate %64 by %c64_i32 dim 1 : vector<256x128xf32>, i32 -> vector<256x128xf32>
    %106 = arith.addf %104, %105 : vector<256x128xf32>
    %c0_55 = arith.constant 0 : index
    %c0_56 = arith.constant 0 : index
    %107 = vector.load %arg4[%c0_55, %c0_56] : memref<256x128xf32, #tpu.memory_space<vmem>>, vector<256x128xf32>
    tpu.vector_store %arg4[%c0_55, %c0_56], %106 {strides = array<i32>} : memref<256x128xf32, #tpu.memory_space<vmem>>, vector<256x128xf32>,
    return
  }
  func.func @transform_0(%arg0: i32) -> (i32, i32) {
    %c0_i32 = arith.constant 0 : i32
    %c0_i32_0 = arith.constant 0 : i32
    return %arg0, %c0_i32 : i32, i32
  }
  func.func @transform_1(%arg0: i32) -> (i32, i32, i32) {
    %c0_i32 = arith.constant 0 : i32
    %c0_i32_0 = arith.constant 0 : i32
    %c0_i32_1 = arith.constant 0 : i32
    %c0_i32_2 = arith.constant 0 : i32
    return %c0_i32, %c0_i32_0, %c0_i32_1 : i32, i32, i32
  }
  func.func @transform_2(%arg0: i32) -> (i32, i32) {
    %c0_i32 = arith.constant 0 : i32
    %c0_i32_0 = arith.constant 0 : i32
    %c0_i32_1 = arith.constant 0 : i32
    return %c0_i32, %c0_i32_0 : i32, i32
  }
  func.func @transform_3(%arg0: i32) -> (i32, i32) {
    %c0_i32 = arith.constant 0 : i32
    %c0_i32_0 = arith.constant 0 : i32
    return %arg0, %c0_i32 : i32, i32
  }
}

</mosaic_0001>

<bundles_post_ra>
// kernel: vae_forward.1
= control target key start
LH: loop header
LB: loop body
LE: loop exit
PB: predicated region body
PF: predicated region fallthrough
CT: control target
= control target key end

     0   :  { %s5101_s12 = smov 0   ;;  %s7027_s0 = inlined_call_operand.vmem [shape: f32[512,128], index: 0, kind: input, shape index: {}]   ;;  %s7028_s1 = inlined_call_operand.vmem [shape: bf16[8,128,128], index: 1, kind: input, shape index: {}]   ;;  %s7029_s2 = inlined_call_operand.vmem [shape: f32[8,128], index: 2, kind: input, shape index: {}]   ;;  %s7030_s3 = inlined_call_operand.vmem [shape: f32[512,128], index: 3, kind: output, shape index: {}]  }
   0x1 LB: > { %s3620_s13 = sadd.s32 4294967295, %s5078_s12   ;;  %p3624_p0 = scmp.ge.s32.totalorder %s5078_s12, 1  ;;  %s5078_s12 = sphi %s5101_s12, %s13_s12  }
   0x2   : > { %p138_p1 = scmp.lt.s32.totalorder %s5078_s12, 3 }
   0x4   : > { %p139_p2 = pnand %p3624_p0, %p138_p1 }
   0x6   : > { %142 = sbr.rel (%p139_p2) target bundleno = 1930 (0x78a), region = 32 }
   0xb   : > { %v4464_v0 = vld [vmem:[%s7028_s1 + $0x38] sm:$0xff]   ;;  %s3625_s16 = sshll.u32 %s3620_s13, 5  ;;  %v4465_v1 = vld [vmem:[%s7028_s1 + $0x30] sm:$0xff]   ;;  %v4466_v2 = vld [vmem:[%s7028_s1 + $0x28] sm:$0xff]   ;;  %s5080_s11 = smov 64  }
   0xc   : > { %p163_p3 = scmp.lt.s32.totalorder %s3625_s16, 63  ;;  %4071 = vmatprep.subr.bf16.mxu0 %v4464_v0  ;;  %v4467_v3 = vld [vmem:[%s7028_s1 + $0x20] sm:$0xff]   ;;  %v4468_v7 = vld [vmem:[%s7028_s1 + $0x18] sm:$0xff]   ;;  %v4469_v8 = vld [vmem:[%s7028_s1 + $0x10] sm:$0xff]  }
   0xd   : > { %4072 = vmatpush3.bf16.msra.mxu0 %v4464_v0  ;;  %v4470_v9 = vld [vmem:[%s7028_s1 + $0x8] sm:$0xff]   ;;  %v4471_v10 = vld [vmem:[%s7028_s1] sm:$0xff]   ;;  %v4472_v56 = vld [vmem:[%s7028_s1 + $0x78] sm:$0xff]  }
   0xe   : > { %s7104_s16 = smov (!%p163_p3, %s3625_s16), 63  ;;  %4073 = vmatprep.subr.bf16.mxu0 %v4465_v1  ;;  %4119 = vmatprep.subr.bf16.mxu1 %v4472_v56  ;;  %v4473_v57 = vld [vmem:[%s7028_s1 + $0x70] sm:$0xff]   ;;  %v4474_v58 = vld [vmem:[%s7028_s1 + $0x68] sm:$0xff]   ;;  %v4475_v59 = vld [vmem:[%s7028_s1 + $0x60] sm:$0xff]  }
   0xf   : > { %s3626_s21 = sshll.u32 %s7104_s16, 3  ;;  %4120 = vmatpush3.bf16.msra.mxu1 %v4472_v56  ;;  %v4476_v60 = vld [vmem:[%s7028_s1 + $0x58] sm:$0xff]   ;;  %v4477_v61 = vld [vmem:[%s7028_s1 + $0x50] sm:$0xff]   ;;  %v4478_v62 = vld [vmem:[%s7028_s1 + $0x48] sm:$0xff]  }
  0x10   : > { %s5126_s24 = scalar_lea.vmem %s7027_s0, %s3626_s21  ;;  %4121 = vmatprep.subr.bf16.mxu1 %v4473_v57  ;;  %v4479_v63 = vld [vmem:[%s7028_s1 + $0x40] sm:$0xff]   ;;  %v4480_v0 = vld [vmem:[%s7028_s1 + $0xb8] sm:$0xff]  }
  0x11   : > { %4074 = vmatpush3.bf16.msra.mxu0 %v4465_v1  ;;  %v175_v4 = vld [vmem:[%s5126_s24] sm:$0xff]  ;;  %v176_v5 = vld [vmem:[%s5126_s24 + $0x8] sm:$0xff]  ;;  %v177_v11 = vld [vmem:[%s5126_s24 + $0x10] sm:$0xff] }
  0x12   : > { %4075 = vmatprep.subr.bf16.mxu0 %v4466_v2  ;;  %v213_v6 = vpack.c.bf16 %v176_v5, %v175_v4  ;;  %v178_v12 = vld [vmem:[%s5126_s24 + $0x18] sm:$0xff]  ;;  %v179_v13 = vld [vmem:[%s5126_s24 + $0x20] sm:$0xff]  ;;  %v180_v14 = vld [vmem:[%s5126_s24 + $0x28] sm:$0xff] }
  0x13   : > { %v214_v15 = vpack.c.bf16 %v178_v12, %v177_v11  ;;  %v215_v16 = vpack.c.bf16 %v180_v14, %v179_v13  ;;  %v181_v17 = vld [vmem:[%s5126_s24 + $0x30] sm:$0xff]  ;;  %v182_v18 = vld [vmem:[%s5126_s24 + $0x38] sm:$0xff]  ;;  %v183_v19 = vld [vmem:[%s5126_s24 + $0x40] sm:$0xff]  ;;  %4122 = vmatpush3.bf16.msra.mxu1 %v4473_v57 }
  0x14   : > { %4087 = vmatprep.mubr.bf16.mxu0 %v213_v6  ;;  %v184_v20 = vld [vmem:[%s5126_s24 + $0x48] sm:$0xff]  ;;  %v216_v21 = vpack.c.bf16 %v182_v18, %v181_v17  ;;  %v185_v23 = vld [vmem:[%s5126_s24 + $0x50] sm:$0xff]  ;;  %v186_v24 = vld [vmem:[%s5126_s24 + $0x58] sm:$0xff]  ;;  %4123 = vmatprep.subr.bf16.mxu1 %v4474_v58 }
  0x15   : > { %4076 = vmatpush3.bf16.msra.mxu0 %v4466_v2  ;;  %v217_v22 = vpack.c.bf16 %v184_v20, %v183_v19  ;;  %v187_v25 = vld [vmem:[%s5126_s24 + $0x60] sm:$0xff]  ;;  %v188_v26 = vld [vmem:[%s5126_s24 + $0x68] sm:$0xff]  ;;  %v218_v27 = vpack.c.bf16 %v186_v24, %v185_v23  ;;  %v189_v29 = vld [vmem:[%s5126_s24 + $0x70] sm:$0xff] }
  0x16   : > { %4077 = vmatprep.subr.bf16.mxu0 %v4467_v3  ;;  %v219_v28 = vpack.c.bf16 %v188_v26, %v187_v25  ;;  %v190_v30 = vld [vmem:[%s5126_s24 + $0x78] sm:$0xff]  ;;  %v191_v31 = vld [vmem:[%s5126_s24 + $0x80] sm:$0xff]  ;;  %v192_v32 = vld [vmem:[%s5126_s24 + $0x88] sm:$0xff] }
  0x17   : > { %v220_v33 = vpack.c.bf16 %v190_v30, %v189_v29  ;;  %v221_v34 = vpack.c.bf16 %v192_v32, %v191_v31  ;;  %v193_v35 = vld [vmem:[%s5126_s24 + $0x90] sm:$0xff]  ;;  %v194_v36 = vld [vmem:[%s5126_s24 + $0x98] sm:$0xff]  ;;  %v195_v37 = vld [vmem:[%s5126_s24 + $0xa0] sm:$0xff]  ;;  %4124 = vmatpush3.bf16.msra.mxu1 %v4474_v58 }
  0x18   : > { %v196_v38 = vld [vmem:[%s5126_s24 + $0xa8] sm:$0xff]  ;;  %v222_v39 = vpack.c.bf16 %v194_v36, %v193_v35  ;;  %v197_v41 = vld [vmem:[%s5126_s24 + $0xb0] sm:$0xff]  ;;  %v198_v42 = vld [vmem:[%s5126_s24 + $0xb8] sm:$0xff]  ;;  %4125 = vmatprep.subr.bf16.mxu1 %v4475_v59 }
  0x19   : > { %4078 = vmatpush3.bf16.msra.mxu0 %v4467_v3  ;;  %v223_v40 = vpack.c.bf16 %v196_v38, %v195_v37  ;;  %v199_v43 = vld [vmem:[%s5126_s24 + $0xc0] sm:$0xff]  ;;  %v200_v44 = vld [vmem:[%s5126_s24 + $0xc8] sm:$0xff]  ;;  %v224_v45 = vpack.c.bf16 %v198_v42, %v197_v41  ;;  %v201_v47 = vld [vmem:[%s5126_s24 + $0xd0] sm:$0xff] }
  0x1a   : > { %4079 = vmatprep.subr.bf16.mxu0 %v4468_v7  ;;  %v225_v46 = vpack.c.bf16 %v200_v44, %v199_v43  ;;  %v202_v48 = vld [vmem:[%s5126_s24 + $0xd8] sm:$0xff]  ;;  %v203_v49 = vld [vmem:[%s5126_s24 + $0xe0] sm:$0xff]  ;;  %v204_v50 = vld [vmem:[%s5126_s24 + $0xe8] sm:$0xff] }
  0x1b   : > { %v226_v51 = vpack.c.bf16 %v202_v48, %v201_v47  ;;  %v227_v52 = vpack.c.bf16 %v204_v50, %v203_v49  ;;  %v205_v53 = vld [vmem:[%s5126_s24 + $0xf0] sm:$0xff]  ;;  %v206_v54 = vld [vmem:[%s5126_s24 + $0xf8] sm:$0xff]  ;;  %4126 = vmatpush3.bf16.msra.mxu1 %v4475_v59  ;;  %v4482_v2 = vld [vmem:[%s7028_s1 + $0xa8] sm:$0xff]  }
  0x1c   : > { %v228_v55 = vpack.c.bf16 %v206_v54, %v205_v53  ;;  %4127 = vmatprep.subr.bf16.mxu1 %v4476_v60  ;;  %v4481_v1 = vld [vmem:[%s7028_s1 + $0xb0] sm:$0xff]   ;;  %v4483_v3 = vld [vmem:[%s7028_s1 + $0xa0] sm:$0xff]  }
  0x1d   : > { %4080 = vmatpush3.bf16.msra.mxu0 %v4468_v7  ;;  %v5214_v4 = vld [vmem:[%s7029_s2] ss:$0 sm:$0xff] }
  0x1e   : > { %4081 = vmatprep.subr.bf16.mxu0 %v4469_v8 }
  0x1f   : > { %4128 = vmatpush3.bf16.msra.mxu1 %v4476_v60 }
  0x20   : > { %4129 = vmatprep.subr.bf16.mxu1 %v4477_v61 }
  0x21   : > { %4082 = vmatpush3.bf16.msra.mxu0 %v4469_v8 }
  0x22   : > { %4083 = vmatprep.subr.bf16.mxu0 %v4470_v9 }
  0x23   : > { %4130 = vmatpush3.bf16.msra.mxu1 %v4477_v61 }
  0x24   : > { %4131 = vmatprep.subr.bf16.mxu1 %v4478_v62 }
  0x25   : > { %4084 = vmatpush3.bf16.msra.mxu0 %v4470_v9 }
  0x26   : > { %4085 = vmatprep.subr.bf16.mxu0 %v4471_v10 }
  0x27   : > { %4132 = vmatpush3.bf16.msra.mxu1 %v4478_v62 }
  0x28   : > { %4133 = vmatprep.subr.bf16.mxu1 %v4479_v63 }
  0x29   : > { %4086 = vmatpush3.bf16.msra.mxu0 %v4471_v10 }
  0x2a   : > { %4167 = vmatprep.subr.bf16.mxu0 %v4480_v0 }
  0x2b   : > { %4134 = vmatpush3.bf16.msra.mxu1 %v4479_v63 }
  0x2c   : > { %4088 = vmatmul.mubr.bf16.vlgmr.msra.gmra.mxu0 %v214_v15 }
  0x2d   : > { %4091 = vmatprep.mubr.bf16.mxu0 %v215_v16  ;;  %4168 = vmatpush3.bf16.msra.mxu0 %v4480_v0 }
  0x2e   : > { %4169 = vmatprep.subr.bf16.mxu0 %v4481_v1 }
  0x31   : > { %4170 = vmatpush3.bf16.msra.mxu0 %v4481_v1 }
  0x32   : > { %4171 = vmatprep.subr.bf16.mxu0 %v4482_v2 }
  0x34   : > { %4092 = vmatmul.mubr.bf16.gmra.mxu0 %v216_v21 }
  0x35   : > { %4095 = vmatprep.mubr.bf16.mxu0 %v217_v22  ;;  %4172 = vmatpush3.bf16.msra.mxu0 %v4482_v2 }
  0x36   : > { %4173 = vmatprep.subr.bf16.mxu0 %v4483_v3 }
  0x39   : > { %4174 = vmatpush3.bf16.msra.mxu0 %v4483_v3 }
  0x3c   : > { %4096 = vmatmul.mubr.bf16.gmra.mxu0 %v218_v27 }
  0x3d   : > { %4099 = vmatprep.mubr.bf16.mxu0 %v219_v28 }
  0x44   : > { %4100 = vmatmul.mubr.bf16.gmra.mxu0 %v220_v33 }
  0x45   : > { %4103 = vmatprep.mubr.bf16.mxu0 %v221_v34 }
  0x4c   : > { %4104 = vmatmul.mubr.bf16.gmra.mxu0 %v222_v39 }
  0x4d   : > { %4107 = vmatprep.mubr.bf16.mxu0 %v223_v40 }
  0x54   : > { %4108 = vmatmul.mubr.bf16.gmra.mxu0 %v224_v45 }
  0x55   : > { %4111 = vmatprep.mubr.bf16.mxu0 %v225_v46 }
  0x5c   : > { %4112 = vmatmul.mubr.bf16.gmra.mxu0 %v226_v51 }
  0x5d   : > { %4115 = vmatprep.mubr.bf16.mxu0 %v227_v52 }
  0x64   : > { %4116 = vmatmul.mubr.bf16.gmra.mxu0 %v228_v55 }
  0xec   : > { %v4089_v5 = vpop.f32.mrf.mxu0 }
  0xed   : > { %v5217_v6 = vadd.f32 %v4089_v5, %v5214_v4 }
  0xee   : > { %v332_v7 = vpop.f32.mrf.mxu0 }
  0xef   : > { %v5220_v8 = vadd.f32 %v5214_v4, %v332_v7  ;;  %v495_v12 = vmul.f32 1.442695, %v5217_v6  ;;  %vm461_vm3 = vcmp.gt.f32.partialorder %v5217_v6, 0.0 }
  0xf0   : > { %v4090_v9 = vpop.f32.mrf.mxu0 }
  0xf1   : > { %v491_v10 = vmul.f32 1.442695, %v5220_v8  ;;  %v5224_v11 = vadd.f32 %v4090_v9, %v5214_v4  ;;  %vm459_vm1 = vcmp.gt.f32.partialorder %v5220_v8, 0.0 }
  0xf2   : > { %v335_v13 = vpop.f32.mrf.mxu0 }
  0xf3   : > { %v497_v14 = vmul.f32 1.442695, %v5224_v11  ;;  %v5229_v15 = vadd.f32 %v5214_v4, %v335_v13  ;;  %4528 = vpow2.f32 %v491_v10  ;;  %vm462_vm0 = vcmp.gt.f32.partialorder %v5224_v11, 0.0 }
  0xf4   : > { %v4093_v16 = vpop.f32.mrf.mxu0 }
  0xf5   : > { %4530 = vpow2.f32 %v497_v14  ;;  %v493_v17 = vmul.f32 1.442695, %v5229_v15  ;;  %v5233_v19 = vadd.f32 %v4093_v16, %v5214_v4  ;;  %vm460_vm2 = vcmp.gt.f32.partialorder %v5229_v15, 0.0 }
  0xf6   : > { %4532 = vpow2.f32 %v495_v12  ;;  %v348_v18 = vpop.f32.mrf.mxu0 }
  0xf7   : > { %4534 = vpow2.f32 %v493_v17  ;;  %v5236_v20 = vadd.f32 %v5214_v4, %v348_v18  ;;  %v503_v24 = vmul.f32 1.442695, %v5233_v19  ;;  %vm465_vm4 = vcmp.gt.f32.partialorder %v5233_v19, 0.0 }
  0xf8   : > { %v4094_v21 = vpop.f32.mrf.mxu0 }
  0xf9   : > { %v5239_v22 = vadd.f32 %v4094_v21, %v5214_v4  ;;  %v499_v27 = vmul.f32 1.442695, %v5236_v20  ;;  %vm463_vm5 = vcmp.gt.f32.partialorder %v5236_v20, 0.0 }
  0xfa   : > { %v351_v23 = vpop.f32.mrf.mxu0 }
  0xfb   : > { %v505_v25 = vmul.f32 1.442695, %v5239_v22  ;;  %v5244_v26 = vadd.f32 %v5214_v4, %v351_v23  ;;  %vm466_vm6 = vcmp.gt.f32.partialorder %v5239_v22, 0.0 }
  0xfc   : > { %v4097_v28 = vpop.f32.mrf.mxu0 }
  0xfd   : > { %v501_v29 = vmul.f32 1.442695, %v5244_v26  ;;  %4536 = vpow2.f32 %v505_v25  ;;  %v5249_v31 = vadd.f32 %v4097_v28, %v5214_v4  ;;  %vm464_vm7 = vcmp.gt.f32.partialorder %v5244_v26, 0.0 }
  0xfe   : > { %v364_v30 = vpop.f32.mrf.mxu0  ;;  %4538 = vpow2.f32 %v503_v24 }
  0xff   : > { %4540 = vpow2.f32 %v499_v27  ;;  %v5252_v32 = vadd.f32 %v5214_v4, %v364_v30  ;;  %v511_v43 = vmul.f32 1.442695, %v5249_v31  ;;  %vm469_vm10 = vcmp.gt.f32.partialorder %v5249_v31, 0.0 }
 0x100   : > { %v4098_v33 = vpop.f32.mrf.mxu0  ;;  %v4529_v34 = vpop.eup %4528  ;;  %4542 = vpow2.f32 %v501_v29 }
 0x101   : > { %v5255_v35 = vadd.f32 %v4098_v33, %v5214_v4  ;;  %v507_v37 = vmul.f32 1.442695, %v5252_v32  ;;  %v3638_v47 = vadd.f32 -1.0, %v4529_v34  ;;  %vm467_vm8 = vcmp.gt.f32.partialorder %v5252_v32, 0.0 }
 0x102   : > { %v4531_v36 = vpop.eup %4530  ;;  %v367_v38 = vpop.f32.mrf.mxu0 }
 0x103   : > { %v4533_v39 = vpop.eup %4532  ;;  %v513_v40 = vmul.f32 1.442695, %v5255_v35  ;;  %v3641_v42 = vadd.f32 -1.0, %v4531_v36  ;;  %v5261_v44 = vadd.f32 %v5214_v4, %v367_v38  ;;  %4544 = vpow2.f32 %v507_v37 }
 0x104   : > { %v4535_v41 = vpop.eup %4534  ;;  %v4101_v45 = vpop.f32.mrf.mxu0  ;;  %v3640_v49 = vadd.f32 -1.0, %v4533_v39  ;;  %v587_v57 = vmul.f32 1.6732632, %v3638_v47  ;;  %vm470_vm9 = vcmp.gt.f32.partialorder %v5255_v35, 0.0 }
 0x105   : > { %v5264_v46 = vadd.f32 %v4101_v45, %v5214_v4  ;;  %v3639_v48 = vadd.f32 -1.0, %v4535_v41  ;;  %v509_v50 = vmul.f32 1.442695, %v5261_v44  ;;  %4546 = vpow2.f32 %v513_v40 }
 0x106   : > { %v380_v51 = vpop.f32.mrf.mxu0  ;;  %v590_v52 = vmul.f32 1.6732632, %v3641_v42  ;;  %4548 = vpow2.f32 %v511_v43  ;;  %v589_v59 = vmul.f32 1.6732632, %v3640_v49  ;;  %v619_v5 = vsel %vm459_vm1, %v5220_v8, %v587_v57 }
 0x107   : > { %v5268_v53 = vadd.f32 %v5214_v4, %v380_v51  ;;  %v519_v55 = vmul.f32 1.442695, %v5264_v46  ;;  %v588_v58 = vmul.f32 1.6732632, %v3639_v48  ;;  %4550 = vpow2.f32 %v509_v50 }
 0x108   : > { %v4102_v54 = vpop.f32.mrf.mxu0  ;;  %v622_v0 = vsel %vm462_vm0, %v5224_v11, %v590_v52  ;;  %v621_v10 = vsel %vm461_vm3, %v5217_v6, %v589_v59  ;;  %v651_v21 = vmul.f32 1.050701, %v619_v5  ;;  %vm468_vm11 = vcmp.gt.f32.partialorder %v5261_v44, 0.0 }
 0x109   : > { %v5272_v56 = vadd.f32 %v4102_v54, %v5214_v4  ;;  %v515_v60 = vmul.f32 1.442695, %v5268_v53  ;;  %4552 = vpow2.f32 %v519_v55  ;;  %v620_v7 = vsel %vm460_vm2, %v5229_v15, %v588_v58 }
 0x10a   : > { %v383_v61 = vpop.f32.mrf.mxu0  ;;  %v4537_v62 = vpop.eup %4536  ;;  %v654_v14 = vmul.f32 1.050701, %v622_v0  ;;  %v652_v8 = vmul.f32 1.050701, %v620_v7  ;;  %v653_v15 = vmul.f32 1.050701, %v621_v10 }
 0x10b   : > { %v4539_v63 = vpop.eup %4538  ;;  %v521_v1 = vmul.f32 1.442695, %v5272_v56  ;;  %v3645_v12 = vadd.f32 -1.0, %v4537_v62  ;;  %4554 = vpow2.f32 %v515_v60  ;;  %v5285_v11 = vadd.f32 %v5214_v4, %v383_v61 }
 0x10c   : > { %v4105_v2 = vpop.f32.mrf.mxu0  ;;  %v4541_v3 = vpop.eup %4540  ;;  %v3644_v16 = vadd.f32 -1.0, %v4539_v63  ;;  %v683_v29 = vpack.c.bf16 %v652_v8, %v651_v21  ;;  %v684_v36 = vpack.c.bf16 %v654_v14, %v653_v15  ;;  %vm473_vm12 = vcmp.gt.f32.partialorder %v5264_v46, 0.0 }
 0x10d   : > { %v4543_v9 = vpop.eup %4542  ;;  %4556 = vpow2.f32 %v521_v1  ;;  %v3642_v17 = vadd.f32 -1.0, %v4541_v3  ;;  %v594_v25 = vmul.f32 1.6732632, %v3645_v12  ;;  %v517_v27 = vmul.f32 1.442695, %v5285_v11 }
 0x10e   : > { %v396_v13 = vpop.f32.mrf.mxu0  ;;  %v3643_v6 = vadd.f32 -1.0, %v4543_v9  ;;  %v5298_v34 = vadd.f32 %v4105_v2, %v5214_v4  ;;  %v593_v39 = vmul.f32 1.6732632, %v3644_v16  ;;  %4135 = vmatprep.mubr.bf16.mxu1 %v683_v29  ;;  %vm471_vm13 = vcmp.gt.f32.partialorder %v5268_v53, 0.0 }
 0x10f   : > { %v5288_v18 = vadd.f32 %v5214_v4, %v396_v13  ;;  %v591_v40 = vmul.f32 1.6732632, %v3642_v17  ;;  %4136 = vmatmul.mubr.bf16.vlgmr.msra.gmra.mxu1 %v684_v36  ;;  %v626_v47 = vsel %vm466_vm6, %v5239_v22, %v594_v25  ;;  %vm474_vm14 = vcmp.gt.f32.partialorder %v5272_v56, 0.0 }
 0x110   : > { %v4106_v23 = vpop.f32.mrf.mxu0  ;;  %v4545_v33 = vpop.eup %4544  ;;  %v592_v45 = vmul.f32 1.6732632, %v3643_v6  ;;  %v527_v54 = vmul.f32 1.442695, %v5298_v34  ;;  %v625_v55 = vsel %vm465_vm4, %v5233_v19, %v593_v39  ;;  %v658_v59 = vmul.f32 1.050701, %v626_v47 }
 0x111   : > { %v5292_v24 = vadd.f32 %v4106_v23, %v5214_v4  ;;  %v523_v28 = vmul.f32 1.442695, %v5288_v18  ;;  %v3646_v48 = vadd.f32 -1.0, %v4545_v33  ;;  %v623_v22 = vsel %vm463_vm5, %v5236_v20, %v591_v40 }
 0x112   : > { %v399_v30 = vpop.f32.mrf.mxu0  ;;  %v4547_v38 = vpop.eup %4546  ;;  %v624_v61 = vsel %vm464_vm7, %v5244_v26, %v592_v45  ;;  %v655_v5 = vmul.f32 1.050701, %v623_v22  ;;  %v657_v12 = vmul.f32 1.050701, %v625_v55  ;;  %vm472_vm15 = vcmp.gt.f32.partialorder %v5285_v11, 0.0 }
 0x113   : > { %v529_v37 = vmul.f32 1.442695, %v5292_v24  ;;  %4558 = vpow2.f32 %v523_v28  ;;  %v5302_v41 = vadd.f32 %v5214_v4, %v399_v30  ;;  %v4549_v43 = vpop.eup %4548  ;;  %v3649_v52 = vadd.f32 -1.0, %v4547_v38 }
 0x114   : > { %v4109_v42 = vpop.f32.mrf.mxu0  ;;  %4560 = vpow2.f32 %v517_v27  ;;  %v4551_v51 = vpop.eup %4550  ;;  %v3648_v60 = vadd.f32 -1.0, %v4549_v43  ;;  %v595_v20 = vmul.f32 1.6732632, %v3646_v48  ;;  %v656_v9 = vmul.f32 1.050701, %v624_v61 }
 0x115   : > { %v525_v49 = vmul.f32 1.442695, %v5302_v41  ;;  %4562 = vpow2.f32 %v529_v37  ;;  %v3647_v63 = vadd.f32 -1.0, %v4551_v51  ;;  %v5329_v0 = vadd.f32 %v4109_v42, %v5214_v4 }
 0x116   : > { %v412_v50 = vpop.f32.mrf.mxu0  ;;  %v4553_v62 = vpop.eup %4552  ;;  %v598_v7 = vmul.f32 1.6732632, %v3649_v52  ;;  %v597_v14 = vmul.f32 1.6732632, %v3648_v60  ;;  %v685_v17 = vpack.c.bf16 %v656_v9, %v655_v5  ;;  %v627_v8 = vsel %vm467_vm8, %v5252_v32, %v595_v20 }
 0x117   : > { %4564 = vpow2.f32 %v525_v49  ;;  %v5320_v57 = vadd.f32 %v5214_v4, %v412_v50  ;;  %v3652_v16 = vadd.f32 -1.0, %v4553_v62  ;;  %v535_v23 = vmul.f32 1.442695, %v5329_v0 }
 0x118   : > { %v4110_v58 = vpop.f32.mrf.mxu0  ;;  %v4555_v3 = vpop.eup %4554  ;;  %4566 = vpow2.f32 %v527_v54  ;;  %v686_v15 = vpack.c.bf16 %v658_v59, %v657_v12  ;;  %v596_v25 = vmul.f32 1.6732632, %v3647_v63  ;;  %v630_v27 = vsel %vm470_vm9, %v5255_v35, %v598_v7  ;;  %4139 = vmatprep.mubr.bf16.mxu1 %v685_v17 }
 0x119   : > { %v5326_v19 = vadd.f32 %v4110_v58, %v5214_v4  ;;  %v531_v1 = vmul.f32 1.442695, %v5320_v57  ;;  %v3650_v28 = vadd.f32 -1.0, %v4555_v3  ;;  %v629_v35 = vsel %vm469_vm10, %v5249_v31, %v597_v14 }
 0x11a   : > { %v415_v2 = vpop.f32.mrf.mxu0  ;;  %v4557_v10 = vpop.eup %4556  ;;  %4140 = vmatmul.mubr.bf16.gmra.mxu1 %v686_v15  ;;  %v601_v37 = vmul.f32 1.6732632, %v3652_v16  ;;  %v628_v38 = vsel %vm468_vm11, %v5261_v44, %v596_v25  ;;  %v659_v39 = vmul.f32 1.050701, %v627_v8  ;;  %v662_v40 = vmul.f32 1.050701, %v630_v27 }
 0x11b   : > { %4568 = vpow2.f32 %v531_v1  ;;  %v537_v26 = vmul.f32 1.442695, %v5326_v19  ;;  %v5335_v21 = vadd.f32 %v5214_v4, %v415_v2  ;;  %v3653_v29 = vadd.f32 -1.0, %v4557_v10 }
 0x11c   : > { %v4113_v13 = vpop.f32.mrf.mxu0  ;;  %v599_v47 = vmul.f32 1.6732632, %v3650_v28  ;;  %vm475_vm0 = vcmp.gt.f32.partialorder %v5288_v18, 0.0  ;;  %v660_v49 = vmul.f32 1.050701, %v628_v38  ;;  %v633_v22 = vsel %vm473_vm12, %v5264_v46, %v601_v37 }
 0x11d   : > { %v533_v30 = vmul.f32 1.442695, %v5335_v21  ;;  %4570 = vpow2.f32 %v537_v26  ;;  %v602_v48 = vmul.f32 1.6732632, %v3653_v29  ;;  %v5360_v31 = vadd.f32 %v4113_v13, %v5214_v4 }
 0x11e   : > { %v428_v6 = vpop.f32.mrf.mxu0  ;;  %v661_v51 = vmul.f32 1.050701, %v629_v35  ;;  %vm476_vm1 = vcmp.gt.f32.partialorder %v5302_v41, 0.0  ;;  %v687_v58 = vpack.c.bf16 %v660_v49, %v659_v39  ;;  %v631_v1 = vsel %vm471_vm13, %v5268_v53, %v599_v47 }
 0x11f   : > { %v5348_v32 = vadd.f32 %v5214_v4, %v428_v6  ;;  %4572 = vpow2.f32 %v533_v30  ;;  %v634_v46 = vsel %vm474_vm14, %v5272_v56, %v602_v48  ;;  %vm478_vm2 = vcmp.gt.f32.partialorder %v5292_v24, 0.0 }
 0x120   : > { %v4114_v33 = vpop.f32.mrf.mxu0  ;;  %v4559_v36 = vpop.eup %4558  ;;  %4574 = vpow2.f32 %v535_v23  ;;  %v688_v62 = vpack.c.bf16 %v662_v40, %v661_v51  ;;  %v543_v2 = vmul.f32 1.442695, %v5360_v31  ;;  %4143 = vmatprep.mubr.bf16.mxu1 %v687_v58  ;;  %vm479_vm3 = vcmp.gt.f32.partialorder %v5320_v57, 0.0 }
 0x121   : > { %v539_v42 = vmul.f32 1.442695, %v5348_v32  ;;  %v4561_v45 = vpop.eup %4560  ;;  %v3654_v44 = vadd.f32 -1.0, %v4559_v36  ;;  %v5363_v52 = vadd.f32 %v4114_v33, %v5214_v4  ;;  %v665_v13 = vmul.f32 1.050701, %v633_v22 }
 0x122   : > { %v431_v43 = vpop.f32.mrf.mxu0  ;;  %v4563_v50 = vpop.eup %4562  ;;  %v3651_v60 = vadd.f32 -1.0, %v4561_v45  ;;  %4144 = vmatmul.mubr.bf16.gmra.mxu1 %v688_v62  ;;  %vm477_vm4 = vcmp.gt.f32.partialorder %v5298_v34, 0.0  ;;  %v663_v8 = vmul.f32 1.050701, %v631_v1  ;;  %v666_v23 = vmul.f32 1.050701, %v634_v46 }
 0x123   : > { %4576 = vpow2.f32 %v539_v42  ;;  %v5370_v59 = vadd.f32 %v5214_v4, %v431_v43  ;;  %v545_v20 = vmul.f32 1.442695, %v5363_v52  ;;  %v603_v7 = vmul.f32 1.6732632, %v3654_v44 }
 0x124   : > { %v4117_v54 = vpop.f32.mrf.mxu0  ;;  %v4565_v55 = vpop.eup %4564  ;;  %v3657_v9 = vadd.f32 -1.0, %v4563_v50  ;;  %v600_v17 = vmul.f32 1.6732632, %v3651_v60  ;;  %v690_v48 = vpack.c.bf16 %v666_v23, %v665_v13  ;;  %vm480_vm5 = vcmp.gt.f32.partialorder %v5335_v21, 0.0 }
 0x125   : > { %v3655_v61 = vadd.f32 -1.0, %v4565_v55  ;;  %v541_v3 = vmul.f32 1.442695, %v5370_v59  ;;  %v4567_v5 = vpop.eup %4566  ;;  %4578 = vpow2.f32 %v545_v20  ;;  %v5384_v53 = vadd.f32 %v4117_v54, %v5214_v4 }
 0x126   : > { %v444_v63 = vpop.f32.mrf.mxu0  ;;  %v3656_v15 = vadd.f32 -1.0, %v4567_v5  ;;  %v635_v25 = vsel %vm475_vm0, %v5288_v18, %v603_v7  ;;  %v606_v27 = vmul.f32 1.6732632, %v3657_v9  ;;  %v632_v29 = vsel %vm472_vm15, %v5285_v11, %v600_v17 }
 0x127   : > { %v604_v10 = vmul.f32 1.6732632, %v3655_v61  ;;  %4580 = vpow2.f32 %v541_v3  ;;  %v5387_v56 = vadd.f32 %v5214_v4, %v444_v63  ;;  %v551_v33 = vmul.f32 1.442695, %v5384_v53 }
 0x128   : > { %v4118_v12 = vpop.f32.mrf.mxu0  ;;  %v4569_v26 = vpop.eup %4568  ;;  %4582 = vpow2.f32 %v543_v2  ;;  %v664_v36 = vmul.f32 1.050701, %v632_v29  ;;  %v605_v40 = vmul.f32 1.6732632, %v3656_v15  ;;  %v667_v42 = vmul.f32 1.050701, %v635_v25 }
 0x129   : > { %v636_v14 = vsel %vm476_vm1, %v5302_v41, %v604_v10  ;;  %v3658_v16 = vadd.f32 -1.0, %v4569_v26  ;;  %v547_v28 = vmul.f32 1.442695, %v5387_v56  ;;  %v5402_v38 = vadd.f32 %v4118_v12, %v5214_v4 }
 0x12a   : > { %v447_v6 = vpop.f32.mrf.mxu0  ;;  %v4571_v30 = vpop.eup %4570  ;;  %v668_v41 = vmul.f32 1.050701, %v636_v14  ;;  %v689_v45 = vpack.c.bf16 %v664_v36, %v663_v8  ;;  %v638_v11 = vsel %vm478_vm2, %v5292_v24, %v606_v27  ;;  %v637_v24 = vsel %vm477_vm4, %v5298_v34, %v605_v40 }
 0x12b   : > { %v607_v37 = vmul.f32 1.6732632, %v3658_v16  ;;  %4584 = vpow2.f32 %v547_v28  ;;  %v5405_v18 = vadd.f32 %v5214_v4, %v447_v6  ;;  %v3661_v47 = vadd.f32 -1.0, %v4571_v30 }
 0x12c   : > { %v4573_v35 = vpop.eup %4572  ;;  %v553_v49 = vmul.f32 1.442695, %v5402_v38  ;;  %4586 = vpow2.f32 %v551_v33  ;;  %4147 = vmatprep.mubr.bf16.mxu1 %v689_v45  ;;  %v691_v44 = vpack.c.bf16 %v668_v41, %v667_v42  ;;  %v670_v60 = vmul.f32 1.050701, %v638_v11 }
 0x12d   : > { %v4575_v39 = vpop.eup %4574  ;;  %v3659_v43 = vadd.f32 -1.0, %v4573_v35  ;;  %v549_v4 = vmul.f32 1.442695, %v5405_v18  ;;  %v639_v54 = vsel %vm479_vm3, %v5320_v57, %v607_v37  ;;  %4148 = vmatmul.mubr.bf16.gmra.mxu1 %v690_v48  ;;  %v610_v63 = vmul.f32 1.6732632, %v3661_v47 }
 0x12e   : > { %4588 = vpow2.f32 %v553_v49  ;;  %v3660_v22 = vadd.f32 -1.0, %v4575_v39  ;;  %4151 = vmatprep.mubr.bf16.mxu1 %v691_v44  ;;  %v671_v20 = vmul.f32 1.050701, %v639_v54  ;;  %v669_v1 = vmul.f32 1.050701, %v637_v24  ;;  %v4487_v44 = vld [vmem:[%s7028_s1 + $0x80] sm:$0xff]  }
 0x12f   : > { %v608_v51 = vmul.f32 1.6732632, %v3659_v43  ;;  %4590 = vpow2.f32 %v549_v4  ;;  %vm482_vm6 = vcmp.gt.f32.partialorder %v5326_v19, 0.0  ;;  %vm483_vm7 = vcmp.gt.f32.partialorder %v5348_v32, 0.0  ;;  %v4488_v54 = vld [vmem:[%s7028_s1 + $0xf8] sm:$0xff]  }
 0x130   : > { %v4577_v50 = vpop.eup %4576  ;;  %v609_v2 = vmul.f32 1.6732632, %v3660_v22  ;;  %v692_v34 = vpack.c.bf16 %v670_v60, %v669_v1  ;;  %v642_v9 = vsel %vm482_vm6, %v5326_v19, %v610_v63  ;;  %vm481_vm8 = vcmp.gt.f32.partialorder %v5329_v0, 0.0  ;;  %4215 = vmatprep.subr.bf16.mxu1 %v4488_v54  ;;  %v5461_v24 = vld [vmem:[%s7029_s2 + $0x1] ss:$0 sm:$0xff] }
 0x131   : > { %v3662_v55 = vadd.f32 -1.0, %v4577_v50  ;;  %v640_v58 = vsel %vm480_vm5, %v5335_v21, %v608_v51  ;;  %vm484_vm9 = vcmp.gt.f32.partialorder %v5370_v59, 0.0  ;;  %v674_v17 = vmul.f32 1.050701, %v642_v9  ;;  %4216 = vmatpush3.bf16.msra.mxu1 %v4488_v54 }
 0x132   : > { %v672_v61 = vmul.f32 1.050701, %v640_v58  ;;  %v4579_v62 = vpop.eup %4578  ;;  %v641_v13 = vsel %vm481_vm8, %v5329_v0, %v609_v2  ;;  %vm486_vm10 = vcmp.gt.f32.partialorder %v5363_v52, 0.0  ;;  %vm485_vm11 = vcmp.gt.f32.partialorder %v5360_v31, 0.0 }
 0x133   : > { %v611_v46 = vmul.f32 1.6732632, %v3662_v55  ;;  %v3665_v21 = vadd.f32 -1.0, %v4579_v62  ;;  %v673_v25 = vmul.f32 1.050701, %v641_v13  ;;  %vm487_vm12 = vcmp.gt.f32.partialorder %v5387_v56, 0.0 }
 0x134   : > { %v4581_v57 = vpop.eup %4580  ;;  %v693_v5 = vpack.c.bf16 %v672_v61, %v671_v20  ;;  %vm488_vm13 = vcmp.gt.f32.partialorder %v5405_v18, 0.0  ;;  %vm490_vm14 = vcmp.gt.f32.partialorder %v5402_v38, 0.0  ;;  %vm489_vm15 = vcmp.gt.f32.partialorder %v5384_v53, 0.0  ;;  %v4489_v55 = vld [vmem:[%s7028_s1 + $0xf0] sm:$0xff]  }
 0x135   : > { %v3663_v3 = vadd.f32 -1.0, %v4581_v57  ;;  %v4583_v7 = vpop.eup %4582  ;;  %v643_v12 = vsel %vm483_vm7, %v5348_v32, %v611_v46  ;;  %4152 = vmatmul.mubr.bf16.gmra.mxu1 %v692_v34  ;;  %v614_v15 = vmul.f32 1.6732632, %v3665_v21  ;;  %v694_v41 = vpack.c.bf16 %v674_v17, %v673_v25  ;;  %4217 = vmatprep.subr.bf16.mxu1 %v4489_v55 }
 0x136   : > { %v3664_v14 = vadd.f32 -1.0, %v4583_v7  ;;  %4155 = vmatprep.mubr.bf16.mxu1 %v693_v5  ;;  %v675_v23 = vmul.f32 1.050701, %v643_v12  ;;  %4218 = vmatpush3.bf16.msra.mxu1 %v4489_v55 }
 0x137   : > { %v612_v10 = vmul.f32 1.6732632, %v3663_v3  ;;  %v646_v0 = vsel %vm486_vm10, %v5363_v52, %v614_v15 }
 0x138   : > { %v4585_v26 = vpop.eup %4584  ;;  %v613_v28 = vmul.f32 1.6732632, %v3664_v14  ;;  %v678_v40 = vmul.f32 1.050701, %v646_v0 }
 0x139   : > { %v644_v16 = vsel %vm484_vm9, %v5370_v59, %v612_v10  ;;  %v3666_v8 = vadd.f32 -1.0, %v4585_v26  ;;  %v4587_v6 = vpop.eup %4586 }
 0x13a   : > { %v676_v19 = vmul.f32 1.050701, %v644_v16  ;;  %v645_v36 = vsel %vm485_vm11, %v5360_v31, %v613_v28  ;;  %v3668_v35 = vadd.f32 -1.0, %v4587_v6 }
 0x13b   : > { %v4589_v27 = vpop.eup %4588  ;;  %v615_v32 = vmul.f32 1.6732632, %v3666_v8  ;;  %v677_v43 = vmul.f32 1.050701, %v645_v36 }
 0x13c   : > { %v695_v29 = vpack.c.bf16 %v676_v19, %v675_v23  ;;  %v4591_v30 = vpop.eup %4590  ;;  %v3669_v33 = vadd.f32 -1.0, %v4589_v27  ;;  %v617_v47 = vmul.f32 1.6732632, %v3668_v35 }
 0x13d   : > { %v3667_v59 = vadd.f32 -1.0, %v4591_v30  ;;  %4156 = vmatmul.mubr.bf16.gmra.mxu1 %v694_v41  ;;  %v647_v37 = vsel %vm487_vm12, %v5387_v56, %v615_v32  ;;  %v696_v48 = vpack.c.bf16 %v678_v40, %v677_v43 }
 0x13e   : > { %4159 = vmatprep.mubr.bf16.mxu1 %v695_v29  ;;  %v618_v42 = vmul.f32 1.6732632, %v3669_v33  ;;  %v679_v45 = vmul.f32 1.050701, %v647_v37  ;;  %v649_v56 = vsel %vm489_vm15, %v5384_v53, %v617_v47  ;;  %v4486_v53 = vld [vmem:[%s7028_s1 + $0x88] sm:$0xff]  }
 0x13f   : > { %v616_v39 = vmul.f32 1.6732632, %v3667_v59  ;;  %v681_v51 = vmul.f32 1.050701, %v649_v56 }
 0x140   : > { %v650_v31 = vsel %vm490_vm14, %v5402_v38, %v618_v42  ;;  %v4485_v38 = vld [vmem:[%s7028_s1 + $0x90] sm:$0xff]  }
 0x141   : > { %v648_v52 = vsel %vm488_vm13, %v5405_v18, %v616_v39  ;;  %v682_v50 = vmul.f32 1.050701, %v650_v31  ;;  %v4484_v18 = vld [vmem:[%s7028_s1 + $0x98] sm:$0xff]  }
 0x142   : > { %v680_v11 = vmul.f32 1.050701, %v648_v52  ;;  %4175 = vmatprep.subr.bf16.mxu0 %v4484_v18 }
 0x143   : > { %v698_v4 = vpack.c.bf16 %v682_v50, %v681_v51  ;;  %4176 = vmatpush3.bf16.msra.mxu0 %v4484_v18 }
 0x144   : > { %v697_v49 = vpack.c.bf16 %v680_v11, %v679_v45  ;;  %4177 = vmatprep.subr.bf16.mxu0 %v4485_v38 }
 0x145   : > { %4160 = vmatmul.mubr.bf16.gmra.mxu1 %v696_v48 }
 0x146   : > { %4163 = vmatprep.mubr.bf16.mxu1 %v697_v49 }
 0x147   : > { %4178 = vmatpush3.bf16.msra.mxu0 %v4485_v38 }
 0x148   : > { %4179 = vmatprep.subr.bf16.mxu0 %v4486_v53 }
 0x14b   : > { %4180 = vmatpush3.bf16.msra.mxu0 %v4486_v53 }
 0x14c   : > { %4181 = vmatprep.subr.bf16.mxu0 %v4487_v44 }
 0x14d   : > { %4164 = vmatmul.mubr.bf16.gmra.mxu1 %v698_v4 }
 0x14f   : > { %4182 = vmatpush3.bf16.msra.mxu0 %v4487_v44 }
 0x1cf   : > { %v4137_v22 = vpop.f32.mrf.mxu1 }
 0x1d0   : > { %v5464_v58 = vadd.f32 %v4137_v22, %v5461_v24 }
 0x1d1   : > { %v803_v60 = vpop.f32.mrf.mxu1 }
 0x1d2   : > { %v966_v61 = vmul.f32 1.442695, %v5464_v58  ;;  %v804_v62 = vadd.f32 %v5461_v24, %v803_v60  ;;  %vm932_vm2 = vcmp.gt.f32.partialorder %v5464_v58, 0.0 }
 0x1d3   : > { %v4138_v20 = vpop.f32.mrf.mxu1 }
 0x1d4   : > { %4592 = vpow2.f32 %v966_v61  ;;  %v962_v63 = vmul.f32 1.442695, %v804_v62  ;;  %v815_v57 = vadd.f32 %v4138_v20, %v5461_v24  ;;  %vm930_vm0 = vcmp.gt.f32.partialorder %v804_v62, 0.0 }
 0x1d5   : > { %v806_v1 = vpop.f32.mrf.mxu1 }
 0x1d6   : > { %4594 = vpow2.f32 %v962_v63  ;;  %v968_v46 = vmul.f32 1.442695, %v815_v57  ;;  %v807_v2 = vadd.f32 %v5461_v24, %v806_v1  ;;  %vm933_vm1 = vcmp.gt.f32.partialorder %v815_v57, 0.0 }
 0x1d8   : > { %4596 = vpow2.f32 %v968_v46  ;;  %v964_v3 = vmul.f32 1.442695, %v807_v2  ;;  %vm931_vm3 = vcmp.gt.f32.partialorder %v807_v2, 0.0 }
 0x1da   : > { %4598 = vpow2.f32 %v964_v3  ;;  %v4141_v5 = vpop.f32.mrf.mxu1 }
 0x1db   : > { %v5471_v7 = vadd.f32 %v4141_v5, %v5461_v24 }
 0x1dc   : > { %v819_v34 = vpop.f32.mrf.mxu1 }
 0x1dd   : > { %v5474_v9 = vadd.f32 %v5461_v24, %v819_v34  ;;  %v974_v26 = vmul.f32 1.442695, %v5471_v7  ;;  %vm936_vm4 = vcmp.gt.f32.partialorder %v5471_v7, 0.0 }
 0x1de   : > { %v4142_v21 = vpop.f32.mrf.mxu1 }
 0x1df   : > { %v970_v10 = vmul.f32 1.442695, %v5474_v9  ;;  %v5478_v12 = vadd.f32 %v4142_v21, %v5461_v24  ;;  %vm934_vm5 = vcmp.gt.f32.partialorder %v5474_v9, 0.0 }
 0x1e0   : > { %v822_v13 = vpop.f32.mrf.mxu1 }
 0x1e1   : > { %v4593_v14 = vpop.eup %4592  ;;  %4600 = vpow2.f32 %v970_v10  ;;  %v976_v16 = vmul.f32 1.442695, %v5478_v12  ;;  %v5483_v17 = vadd.f32 %v5461_v24, %v822_v13  ;;  %vm937_vm6 = vcmp.gt.f32.partialorder %v5478_v12, 0.0 }
 0x1e2   : > { %v4145_v19 = vpop.f32.mrf.mxu1  ;;  %v3697_v6 = vadd.f32 -1.0, %v4593_v14 }
 0x1e3   : > { %v4595_v8 = vpop.eup %4594  ;;  %4602 = vpow2.f32 %v976_v16  ;;  %v972_v23 = vmul.f32 1.442695, %v5483_v17  ;;  %v5487_v15 = vadd.f32 %v4145_v19, %v5461_v24  ;;  %vm935_vm7 = vcmp.gt.f32.partialorder %v5483_v17, 0.0 }
 0x1e4   : > { %v3695_v25 = vadd.f32 -1.0, %v4595_v8  ;;  %4604 = vpow2.f32 %v974_v26  ;;  %v835_v27 = vpop.f32.mrf.mxu1  ;;  %v1060_v36 = vmul.f32 1.6732632, %v3697_v6 }
 0x1e5   : > { %v4597_v28 = vpop.eup %4596  ;;  %4606 = vpow2.f32 %v972_v23  ;;  %v982_v32 = vmul.f32 1.442695, %v5487_v15  ;;  %v5491_v29 = vadd.f32 %v5461_v24, %v835_v27  ;;  %vm940_vm8 = vcmp.gt.f32.partialorder %v5487_v15, 0.0 }
 0x1e6   : > { %v3698_v30 = vadd.f32 -1.0, %v4597_v28  ;;  %v4146_v41 = vpop.f32.mrf.mxu1  ;;  %v1058_v33 = vmul.f32 1.6732632, %v3695_v25  ;;  %v1092_v48 = vsel %vm932_vm2, %v5464_v58, %v1060_v36 }
 0x1e7   : > { %v4599_v0 = vpop.eup %4598  ;;  %v978_v59 = vmul.f32 1.442695, %v5491_v29  ;;  %v5495_v39 = vadd.f32 %v4146_v41, %v5461_v24  ;;  %4608 = vpow2.f32 %v982_v32  ;;  %v1124_v53 = vmul.f32 1.050701, %v1092_v48 }
 0x1e8   : > { %v1061_v35 = vmul.f32 1.6732632, %v3698_v30  ;;  %v3696_v37 = vadd.f32 -1.0, %v4599_v0  ;;  %v838_v40 = vpop.f32.mrf.mxu1  ;;  %v1090_v11 = vsel %vm930_vm0, %v804_v62, %v1058_v33  ;;  %vm938_vm9 = vcmp.gt.f32.partialorder %v5491_v29, 0.0 }
 0x1e9   : > { %v5498_v42 = vadd.f32 %v5461_v24, %v838_v40  ;;  %4610 = vpow2.f32 %v978_v59  ;;  %v984_v43 = vmul.f32 1.442695, %v5495_v39  ;;  %v1122_v4 = vmul.f32 1.050701, %v1090_v11 }
 0x1ea   : > { %v1093_v52 = vsel %vm933_vm1, %v815_v57, %v1061_v35  ;;  %v1059_v45 = vmul.f32 1.6732632, %v3696_v37  ;;  %vm941_vm10 = vcmp.gt.f32.partialorder %v5495_v39, 0.0 }
 0x1eb   : > { %v980_v47 = vmul.f32 1.442695, %v5498_v42  ;;  %4612 = vpow2.f32 %v984_v43  ;;  %v1125_v56 = vmul.f32 1.050701, %v1093_v52  ;;  %vm939_vm11 = vcmp.gt.f32.partialorder %v5498_v42, 0.0 }
 0x1ec   : > { %v1091_v31 = vsel %vm931_vm3, %v807_v2, %v1059_v45 }
 0x1ed   : > { %v4149_v49 = vpop.f32.mrf.mxu1  ;;  %4614 = vpow2.f32 %v980_v47  ;;  %v1123_v38 = vmul.f32 1.050701, %v1091_v31  ;;  %v1155_v61 = vpack.c.bf16 %v1125_v56, %v1124_v53 }
 0x1ee   : > { %v5505_v50 = vadd.f32 %v4149_v49, %v5461_v24  ;;  %v4601_v51 = vpop.eup %4600 }
 0x1ef   : > { %v851_v18 = vpop.f32.mrf.mxu1  ;;  %v1154_v58 = vpack.c.bf16 %v1123_v38, %v1122_v4  ;;  %v3699_v62 = vadd.f32 -1.0, %v4601_v51 }
 0x1f0   : > { %v990_v44 = vmul.f32 1.442695, %v5505_v50  ;;  %v4603_v54 = vpop.eup %4602  ;;  %v5509_v55 = vadd.f32 %v5461_v24, %v851_v18  ;;  %vm944_vm13 = vcmp.gt.f32.partialorder %v5505_v50, 0.0 }
 0x1f1   : > { %v4150_v22 = vpop.f32.mrf.mxu1  ;;  %v4605_v60 = vpop.eup %4604  ;;  %v3702_v63 = vadd.f32 -1.0, %v4603_v54  ;;  %4183 = vmatprep.mubr.bf16.mxu0 %v1154_v58  ;;  %v1062_v10 = vmul.f32 1.6732632, %v3699_v62 }
 0x1f2   : > { %v4607_v20 = vpop.eup %4606  ;;  %v986_v57 = vmul.f32 1.442695, %v5509_v55  ;;  %v5513_v1 = vadd.f32 %v4150_v22, %v5461_v24  ;;  %4616 = vpow2.f32 %v990_v44  ;;  %4184 = vmatmul.mubr.bf16.vlgmr.msra.gmra.mxu0 %v1155_v61  ;;  %v3701_v5 = vadd.f32 -1.0, %v4605_v60 }
 0x1f3   : > { %v854_v46 = vpop.f32.mrf.mxu1  ;;  %v3700_v2 = vadd.f32 -1.0, %v4607_v20  ;;  %v1065_v14 = vmul.f32 1.6732632, %v3702_v63  ;;  %v1094_v32 = vsel %vm934_vm5, %v5474_v9, %v1062_v10  ;;  %vm942_vm12 = vcmp.gt.f32.partialorder %v5509_v55, 0.0 }
 0x1f4   : > { %v5516_v3 = vadd.f32 %v5461_v24, %v854_v46  ;;  %4618 = vpow2.f32 %v986_v57  ;;  %v992_v34 = vmul.f32 1.442695, %v5513_v1  ;;  %v4609_v13 = vpop.eup %4608  ;;  %v1064_v25 = vmul.f32 1.6732632, %v3701_v5 }
 0x1f5   : > { %v4153_v21 = vpop.f32.mrf.mxu1  ;;  %v1063_v6 = vmul.f32 1.6732632, %v3700_v2  ;;  %v1097_v33 = vsel %vm937_vm6, %v5478_v12, %v1065_v14  ;;  %v3705_v59 = vadd.f32 -1.0, %v4609_v13  ;;  %v1126_v49 = vmul.f32 1.050701, %v1094_v32 }
 0x1f6   : > { %v988_v26 = vmul.f32 1.442695, %v5516_v3  ;;  %4620 = vpow2.f32 %v992_v34  ;;  %v5521_v16 = vadd.f32 %v4153_v21, %v5461_v24  ;;  %v4611_v8 = vpop.eup %4610  ;;  %v1096_v43 = vsel %vm936_vm4, %v5471_v7, %v1064_v25 }
 0x1f7   : > { %v867_v19 = vpop.f32.mrf.mxu1  ;;  %v3703_v36 = vadd.f32 -1.0, %v4611_v8  ;;  %v1095_v9 = vsel %vm935_vm7, %v5483_v17, %v1063_v6  ;;  %v1129_v11 = vmul.f32 1.050701, %v1097_v33  ;;  %v1068_v31 = vmul.f32 1.6732632, %v3705_v59 }
 0x1f8   : > { %4622 = vpow2.f32 %v988_v26  ;;  %v5525_v23 = vadd.f32 %v5461_v24, %v867_v19  ;;  %v4613_v28 = vpop.eup %4612  ;;  %v998_v30 = vmul.f32 1.442695, %v5521_v16  ;;  %v1127_v51 = vmul.f32 1.050701, %v1095_v9 }
 0x1f9   : > { %v4154_v27 = vpop.f32.mrf.mxu1  ;;  %v3706_v12 = vadd.f32 -1.0, %v4613_v28  ;;  %v1128_v7 = vmul.f32 1.050701, %v1096_v43  ;;  %v1066_v4 = vmul.f32 1.6732632, %v3703_v36  ;;  %v1100_v62 = vsel %vm940_vm8, %v5487_v15, %v1068_v31 }
 0x1fa   : > { %v994_v41 = vmul.f32 1.442695, %v5525_v23  ;;  %v4615_v0 = vpop.eup %4614  ;;  %v5536_v35 = vadd.f32 %v4154_v27, %v5461_v24  ;;  %v1156_v54 = vpack.c.bf16 %v1127_v51, %v1126_v49  ;;  %vm945_vm14 = vcmp.gt.f32.partialorder %v5513_v1, 0.0 }
 0x1fb   : > { %v870_v37 = vpop.f32.mrf.mxu1  ;;  %v3704_v40 = vadd.f32 -1.0, %v4615_v0  ;;  %v1069_v53 = vmul.f32 1.6732632, %v3706_v12  ;;  %v1157_v60 = vpack.c.bf16 %v1129_v11, %v1128_v7  ;;  %v1098_v5 = vsel %vm938_vm9, %v5491_v29, %v1066_v4 }
 0x1fc   : > { %4624 = vpow2.f32 %v994_v41  ;;  %v5539_v52 = vadd.f32 %v5461_v24, %v870_v37  ;;  %v1000_v47 = vmul.f32 1.442695, %v5536_v35  ;;  %4187 = vmatprep.mubr.bf16.mxu0 %v1156_v54  ;;  %v1130_v0 = vmul.f32 1.050701, %v1098_v5 }
 0x1fd   : > { %v4157_v45 = vpop.f32.mrf.mxu1  ;;  %4626 = vpow2.f32 %v998_v30  ;;  %v1067_v18 = vmul.f32 1.6732632, %v3704_v40  ;;  %4188 = vmatmul.mubr.bf16.gmra.mxu0 %v1157_v60  ;;  %v1101_v26 = vsel %vm941_vm10, %v5495_v39, %v1069_v53  ;;  %vm943_vm15 = vcmp.gt.f32.partialorder %v5516_v3, 0.0 }
 0x1fe   : > { %v996_v48 = vmul.f32 1.442695, %v5539_v52  ;;  %v5552_v17 = vadd.f32 %v4157_v45, %v5461_v24  ;;  %4628 = vpow2.f32 %v1000_v47  ;;  %v1133_v32 = vmul.f32 1.050701, %v1101_v26 }
 0x1ff   : > { %v883_v56 = vpop.f32.mrf.mxu1  ;;  %v4617_v38 = vpop.eup %4616  ;;  %v1099_v15 = vsel %vm939_vm11, %v5498_v42, %v1067_v18  ;;  %v1132_v36 = vmul.f32 1.050701, %v1100_v62  ;;  %vm948_vm0 = vcmp.gt.f32.partialorder %v5521_v16, 0.0  ;;  %vm946_vm1 = vcmp.gt.f32.partialorder %v5525_v23, 0.0 }
 0x200   : > { %4630 = vpow2.f32 %v996_v48  ;;  %v5555_v44 = vadd.f32 %v5461_v24, %v883_v56  ;;  %v1006_v63 = vmul.f32 1.442695, %v5552_v17  ;;  %v3709_v13 = vadd.f32 -1.0, %v4617_v38 }
 0x201   : > { %v4158_v22 = vpop.f32.mrf.mxu1  ;;  %v4619_v58 = vpop.eup %4618  ;;  %v1131_v28 = vmul.f32 1.050701, %v1099_v15  ;;  %v1159_v49 = vpack.c.bf16 %v1133_v32, %v1132_v36  ;;  %vm949_vm2 = vcmp.gt.f32.partialorder %v5536_v35, 0.0  ;;  %vm947_vm3 = vcmp.gt.f32.partialorder %v5539_v52, 0.0 }
 0x202   : > { %v5560_v61 = vadd.f32 %v4158_v22, %v5461_v24  ;;  %v3707_v20 = vadd.f32 -1.0, %v4619_v58  ;;  %v1002_v57 = vmul.f32 1.442695, %v5555_v44  ;;  %v1072_v33 = vmul.f32 1.6732632, %v3709_v13 }
 0x203   : > { %v886_v46 = vpop.f32.mrf.mxu1  ;;  %v4621_v2 = vpop.eup %4620  ;;  %v1158_v11 = vpack.c.bf16 %v1131_v28, %v1130_v0  ;;  %vm950_vm4 = vcmp.gt.f32.partialorder %v5555_v44, 0.0  ;;  %vm952_vm7 = vcmp.gt.f32.partialorder %v5552_v17, 0.0 }
 0x204   : > { %v1008_v34 = vmul.f32 1.442695, %v5560_v61  ;;  %v5573_v21 = vadd.f32 %v5461_v24, %v886_v46  ;;  %v3710_v14 = vadd.f32 -1.0, %v4621_v2  ;;  %4632 = vpow2.f32 %v1002_v57 }
 0x205   : > { %v4623_v10 = vpop.eup %4622  ;;  %v4161_v29 = vpop.f32.mrf.mxu1  ;;  %v1070_v19 = vmul.f32 1.6732632, %v3707_v20  ;;  %v1104_v51 = vsel %vm944_vm13, %v5505_v50, %v1072_v33  ;;  %4191 = vmatprep.mubr.bf16.mxu0 %v1158_v11  ;;  %vm953_vm6 = vcmp.gt.f32.partialorder %v5560_v61, 0.0 }
 0x206   : > { %v3708_v8 = vadd.f32 -1.0, %v4623_v10  ;;  %4634 = vpow2.f32 %v1008_v34  ;;  %v1004_v6 = vmul.f32 1.442695, %v5573_v21  ;;  %v1073_v25 = vmul.f32 1.6732632, %v3710_v14  ;;  %4192 = vmatmul.mubr.bf16.gmra.mxu0 %v1159_v49 }
 0x207   : > { %4636 = vpow2.f32 %v1006_v63  ;;  %v5583_v27 = vadd.f32 %v4161_v29, %v5461_v24  ;;  %v899_v42 = vpop.f32.mrf.mxu1  ;;  %v1102_v37 = vsel %vm942_vm12, %v5509_v55, %v1070_v19  ;;  %v1136_v34 = vmul.f32 1.050701, %v1104_v51 }
 0x208   : > { %4638 = vpow2.f32 %v1004_v6  ;;  %v5586_v39 = vadd.f32 %v5461_v24, %v899_v42  ;;  %v1071_v30 = vmul.f32 1.6732632, %v3708_v8  ;;  %v1105_v12 = vsel %vm945_vm14, %v5513_v1, %v1073_v25 }
 0x209   : > { %v4625_v41 = vpop.eup %4624  ;;  %v4162_v59 = vpop.f32.mrf.mxu1  ;;  %v1014_v40 = vmul.f32 1.442695, %v5583_v27  ;;  %v1134_v7 = vmul.f32 1.050701, %v1102_v37  ;;  %v1137_v53 = vmul.f32 1.050701, %v1105_v12 }
 0x20a   : > { %v1010_v9 = vmul.f32 1.442695, %v5586_v39  ;;  %v4627_v43 = vpop.eup %4626  ;;  %v3711_v45 = vadd.f32 -1.0, %v4625_v41  ;;  %v5597_v47 = vadd.f32 %v4162_v59, %v5461_v24  ;;  %v1103_v55 = vsel %vm943_vm15, %v5516_v3, %v1071_v30 }
 0x20b   : > { %v902_v48 = vpop.f32.mrf.mxu1  ;;  %v4629_v56 = vpop.eup %4628  ;;  %v1135_v18 = vmul.f32 1.050701, %v1103_v55  ;;  %v3713_v54 = vadd.f32 -1.0, %v4627_v43  ;;  %v1161_v28 = vpack.c.bf16 %v1137_v53, %v1136_v34  ;;  %vm951_vm5 = vcmp.gt.f32.partialorder %v5573_v21, 0.0 }
 0x20c   : > { %4640 = vpow2.f32 %v1010_v9  ;;  %v5600_v31 = vadd.f32 %v5461_v24, %v902_v48  ;;  %v1016_v1 = vmul.f32 1.442695, %v5597_v47  ;;  %v3714_v22 = vadd.f32 -1.0, %v4629_v56 }
 0x20d   : > { %v4165_v4 = vpop.f32.mrf.mxu1  ;;  %v4631_v38 = vpop.eup %4630  ;;  %4642 = vpow2.f32 %v1014_v40  ;;  %v1074_v58 = vmul.f32 1.6732632, %v3711_v45  ;;  %v1160_v57 = vpack.c.bf16 %v1135_v18, %v1134_v7  ;;  %v1076_v15 = vmul.f32 1.6732632, %v3713_v54 }
 0x20e   : > { %v3712_v60 = vadd.f32 -1.0, %v4631_v38  ;;  %4644 = vpow2.f32 %v1016_v1  ;;  %v1012_v3 = vmul.f32 1.442695, %v5600_v31  ;;  %v1077_v20 = vmul.f32 1.6732632, %v3714_v22 }
 0x20f   : > { %v915_v62 = vpop.f32.mrf.mxu1  ;;  %v5609_v50 = vadd.f32 %v4165_v4, %v5461_v24  ;;  %4195 = vmatprep.mubr.bf16.mxu0 %v1160_v57  ;;  %v1106_v26 = vsel %vm946_vm1, %v5525_v23, %v1074_v58  ;;  %vm954_vm8 = vcmp.gt.f32.partialorder %v5586_v39, 0.0  ;;  %vm955_vm9 = vcmp.gt.f32.partialorder %v5600_v31, 0.0 }
 0x210   : > { %v5612_v63 = vadd.f32 %v5461_v24, %v915_v62  ;;  %v1075_v46 = vmul.f32 1.6732632, %v3712_v60  ;;  %4646 = vpow2.f32 %v1012_v3  ;;  %v1109_v6 = vsel %vm949_vm2, %v5536_v35, %v1077_v20  ;;  %4196 = vmatmul.mubr.bf16.gmra.mxu0 %v1161_v28 }
 0x211   : > { %v4166_v2 = vpop.f32.mrf.mxu1  ;;  %v4633_v5 = vpop.eup %4632  ;;  %v1022_v29 = vmul.f32 1.442695, %v5609_v50  ;;  %v1138_v33 = vmul.f32 1.050701, %v1106_v26  ;;  %v1141_v37 = vmul.f32 1.050701, %v1109_v6 }
 0x212   : > { %v1107_v13 = vsel %vm947_vm3, %v5539_v52, %v1075_v46  ;;  %v3715_v14 = vadd.f32 -1.0, %v4633_v5  ;;  %v1018_v42 = vmul.f32 1.442695, %v5612_v63  ;;  %v5624_v0 = vadd.f32 %v4166_v2, %v5461_v24 }
 0x213   : > { %v4635_v10 = vpop.eup %4634  ;;  %v918_v19 = vpop.f32.mrf.mxu1  ;;  %v1139_v25 = vmul.f32 1.050701, %v1107_v13  ;;  %v1108_v52 = vsel %vm948_vm0, %v5521_v16, %v1076_v15  ;;  %vm957_vm10 = vcmp.gt.f32.partialorder %v5597_v47, 0.0  ;;  %vm956_vm11 = vcmp.gt.f32.partialorder %v5583_v27, 0.0 }
 0x214   : > { %v4637_v8 = vpop.eup %4636  ;;  %v1078_v30 = vmul.f32 1.6732632, %v3715_v14  ;;  %v3718_v41 = vadd.f32 -1.0, %v4635_v10  ;;  %v5627_v23 = vadd.f32 %v5461_v24, %v918_v19  ;;  %4648 = vpow2.f32 %v1018_v42 }
 0x215   : > { %v4639_v32 = vpop.eup %4638  ;;  %v3717_v59 = vadd.f32 -1.0, %v4637_v8  ;;  %4650 = vpow2.f32 %v1022_v29  ;;  %v1024_v36 = vmul.f32 1.442695, %v5624_v0  ;;  %v1162_v16 = vpack.c.bf16 %v1139_v25, %v1138_v33 }
 0x216   : > { %v3716_v35 = vadd.f32 -1.0, %v4639_v32  ;;  %v1110_v40 = vsel %vm950_vm4, %v5555_v44, %v1078_v30  ;;  %v1020_v24 = vmul.f32 1.442695, %v5627_v23  ;;  %v1081_v12 = vmul.f32 1.6732632, %v3718_v41 }
 0x217   : > { %4652 = vpow2.f32 %v1024_v36  ;;  %v1140_v45 = vmul.f32 1.050701, %v1108_v52  ;;  %v1080_v55 = vmul.f32 1.6732632, %v3717_v59  ;;  %v1142_v56 = vmul.f32 1.050701, %v1110_v40  ;;  %4199 = vmatprep.mubr.bf16.mxu0 %v1162_v16 }
 0x218   : > { %v1079_v9 = vmul.f32 1.6732632, %v3716_v35  ;;  %4654 = vpow2.f32 %v1020_v24  ;;  %v1113_v1 = vsel %vm953_vm6, %v5560_v61, %v1081_v12  ;;  %vm958_vm12 = vcmp.gt.f32.partialorder %v5612_v63, 0.0  ;;  %v4493_v40 = vld [vmem:[%s7028_s1 + $0xd0] sm:$0xff]   ;;  %v4495_v24 = vld [vmem:[%s7028_s1 + $0xc0] sm:$0xff]  }
 0x219   : > { %v4641_v43 = vpop.eup %4640  ;;  %v1163_v7 = vpack.c.bf16 %v1141_v37, %v1140_v45  ;;  %v1145_v58 = vmul.f32 1.050701, %v1113_v1  ;;  %vm959_vm13 = vcmp.gt.f32.partialorder %v5627_v23, 0.0  ;;  %vm961_vm14 = vcmp.gt.f32.partialorder %v5624_v0, 0.0  ;;  %v5679_v16 = vld [vmem:[%s7029_s2 + $0x2] ss:$0 sm:$0xff] }
 0x21a   : > { %v1111_v11 = vsel %vm951_vm5, %v5573_v21, %v1079_v9  ;;  %v3719_v48 = vadd.f32 -1.0, %v4641_v43  ;;  %v4643_v49 = vpop.eup %4642  ;;  %v1112_v21 = vsel %vm952_vm7, %v5552_v17, %v1080_v55  ;;  %vm960_vm15 = vcmp.gt.f32.partialorder %v5609_v50, 0.0  ;;  %v4494_v9 = vld [vmem:[%s7028_s1 + $0xc8] sm:$0xff]  }
 0x21b   : > { %v1143_v51 = vmul.f32 1.050701, %v1111_v11  ;;  %v4645_v44 = vpop.eup %4644  ;;  %4200 = vmatmul.mubr.bf16.gmra.mxu0 %v1163_v7  ;;  %v3721_v54 = vadd.f32 -1.0, %v4643_v49  ;;  %v1144_v61 = vmul.f32 1.050701, %v1112_v21 }
 0x21c   : > { %v1082_v4 = vmul.f32 1.6732632, %v3719_v48  ;;  %v3722_v18 = vadd.f32 -1.0, %v4645_v44 }
 0x21d   : > { %v1164_v38 = vpack.c.bf16 %v1143_v51, %v1142_v56  ;;  %v4647_v53 = vpop.eup %4646  ;;  %v1084_v57 = vmul.f32 1.6732632, %v3721_v54  ;;  %v1165_v15 = vpack.c.bf16 %v1145_v58, %v1144_v61 }
 0x21e   : > { %v3720_v22 = vadd.f32 -1.0, %v4647_v53  ;;  %v1114_v60 = vsel %vm954_vm8, %v5586_v39, %v1082_v4  ;;  %v1085_v3 = vmul.f32 1.6732632, %v3722_v18 }
 0x21f   : > { %4203 = vmatprep.mubr.bf16.mxu0 %v1164_v38  ;;  %v1146_v2 = vmul.f32 1.050701, %v1114_v60  ;;  %v1116_v29 = vsel %vm956_vm11, %v5583_v27, %v1084_v57 }
 0x220   : > { %v1083_v62 = vmul.f32 1.6732632, %v3720_v22  ;;  %v1117_v10 = vsel %vm957_vm10, %v5597_v47, %v1085_v3  ;;  %v1148_v42 = vmul.f32 1.050701, %v1116_v29 }
 0x221   : > { %v4649_v20 = vpop.eup %4648  ;;  %v1149_v6 = vmul.f32 1.050701, %v1117_v10 }
 0x222   : > { %v1115_v46 = vsel %vm955_vm9, %v5600_v31, %v1083_v62  ;;  %v4651_v17 = vpop.eup %4650  ;;  %v3723_v34 = vadd.f32 -1.0, %v4649_v20 }
 0x223   : > { %v1147_v5 = vmul.f32 1.050701, %v1115_v46  ;;  %4204 = vmatmul.mubr.bf16.gmra.mxu0 %v1165_v15  ;;  %v3725_v19 = vadd.f32 -1.0, %v4651_v17  ;;  %v1167_v27 = vpack.c.bf16 %v1149_v6, %v1148_v42 }
 0x224   : > { %v4653_v26 = vpop.eup %4652  ;;  %v1086_v39 = vmul.f32 1.6732632, %v3723_v34 }
 0x225   : > { %v1166_v13 = vpack.c.bf16 %v1147_v5, %v1146_v2  ;;  %v4655_v14 = vpop.eup %4654  ;;  %v3726_v8 = vadd.f32 -1.0, %v4653_v26  ;;  %v1088_v32 = vmul.f32 1.6732632, %v3725_v19 }
 0x226   : > { %v3724_v31 = vadd.f32 -1.0, %v4655_v14  ;;  %v1118_v47 = vsel %vm958_vm12, %v5612_v63, %v1086_v39 }
 0x227   : > { %4207 = vmatprep.mubr.bf16.mxu0 %v1166_v13  ;;  %v1089_v25 = vmul.f32 1.6732632, %v3726_v8  ;;  %v1150_v41 = vmul.f32 1.050701, %v1118_v47  ;;  %v1120_v33 = vsel %vm960_vm15, %v5609_v50, %v1088_v32  ;;  %v4492_v50 = vld [vmem:[%s7028_s1 + $0xd8] sm:$0xff]  }
 0x228   : > { %v1087_v28 = vmul.f32 1.6732632, %v3724_v31  ;;  %v1152_v36 = vmul.f32 1.050701, %v1120_v33 }
 0x229   : > { %v1121_v52 = vsel %vm961_vm14, %v5624_v0, %v1089_v25  ;;  %v4491_v0 = vld [vmem:[%s7028_s1 + $0xe0] sm:$0xff]  }
 0x22a   : > { %v1119_v30 = vsel %vm959_vm13, %v5627_v23, %v1087_v28  ;;  %v1153_v63 = vmul.f32 1.050701, %v1121_v52  ;;  %v4490_v23 = vld [vmem:[%s7028_s1 + $0xe8] sm:$0xff]  }
 0x22b   : > { %v1151_v35 = vmul.f32 1.050701, %v1119_v30  ;;  %4208 = vmatmul.mubr.bf16.gmra.mxu0 %v1167_v27  ;;  %4219 = vmatprep.subr.bf16.mxu1 %v4490_v23 }
 0x22c   : > { %v1169_v37 = vpack.c.bf16 %v1153_v63, %v1152_v36  ;;  %4220 = vmatpush3.bf16.msra.mxu1 %v4490_v23 }
 0x22d   : > { %v1168_v59 = vpack.c.bf16 %v1151_v35, %v1150_v41  ;;  %4221 = vmatprep.subr.bf16.mxu1 %v4491_v0 }
 0x22f   : > { %4211 = vmatprep.mubr.bf16.mxu0 %v1168_v59 }
 0x230   : > { %4222 = vmatpush3.bf16.msra.mxu1 %v4491_v0  ;;  %v4496_v0 = vld [vmem:[%s7028_s1 + $0x138] sm:$0xff]  }
 0x231   : > { %4223 = vmatprep.subr.bf16.mxu1 %v4492_v50  ;;  %4263 = vmatprep.subr.bf16.mxu0 %v4496_v0 }
 0x232   : > { %4264 = vmatpush3.bf16.msra.mxu0 %v4496_v0 }
 0x233   : > { %4212 = vmatmul.mubr.bf16.gmra.mxu0 %v1169_v37 }
 0x234   : > { %4224 = vmatpush3.bf16.msra.mxu1 %v4492_v50  ;;  %v4497_v50 = vld [vmem:[%s7028_s1 + $0x130] sm:$0xff]  }
 0x235   : > { %4225 = vmatprep.subr.bf16.mxu1 %v4493_v40  ;;  %4265 = vmatprep.subr.bf16.mxu0 %v4497_v50 }
 0x236   : > { %4266 = vmatpush3.bf16.msra.mxu0 %v4497_v50 }
 0x238   : > { %4226 = vmatpush3.bf16.msra.mxu1 %v4493_v40 }
 0x239   : > { %4227 = vmatprep.subr.bf16.mxu1 %v4494_v9 }
 0x23c   : > { %4228 = vmatpush3.bf16.msra.mxu1 %v4494_v9 }
 0x23d   : > { %4229 = vmatprep.subr.bf16.mxu1 %v4495_v24 }
 0x240   : > { %4230 = vmatpush3.bf16.msra.mxu1 %v4495_v24 }
 0x2b2   : > { %v4185_v43 = vpop.f32.mrf.mxu0 }
 0x2b3   : > { %v5682_v11 = vadd.f32 %v4185_v43, %v5679_v16 }
 0x2b4   : > { %v1274_v12 = vpop.f32.mrf.mxu0 }
 0x2b5   : > { %v1435_v55 = vand.u32 2147483647, %v5682_v11  ;;  %v5689_v56 = vadd.f32 %v5679_v16, %v1274_v12  ;;  %v1403_v24 = vmin.f32 %v5682_v11, 0.0 }
 0x2b6   : > { %v4186_v45 = vpop.f32.mrf.mxu0 }
 0x2b7   : > { %v5685_v48 = vadd.f32 %v4186_v45, %v5679_v16  ;;  %v1467_v7 = vsub.f32 0.0, %v1435_v55  ;;  %v1433_v1 = vand.u32 2147483647, %v5689_v56 }
 0x2b8   : > { %v1277_v49 = vpop.f32.mrf.mxu0 }
 0x2b9   : > { %v1436_v51 = vand.u32 2147483647, %v5685_v48  ;;  %v5693_v44 = vadd.f32 %v5679_v16, %v1277_v49  ;;  %v1501_v21 = vmul.f32 1.442695, %v1467_v7  ;;  %v1465_v54 = vsub.f32 0.0, %v1433_v1 }
 0x2ba   : > { %v1401_v7 = vmin.f32 %v5689_v56, 0.0 }
 0x2bb   : > { %v1468_v4 = vsub.f32 0.0, %v1436_v51  ;;  %v1434_v18 = vand.u32 2147483647, %v5693_v44  ;;  %4656 = vpow2.f32 %v1501_v21  ;;  %v1497_v62 = vmul.f32 1.442695, %v1465_v54  ;;  %v4498_v51 = vld [vmem:[%s7028_s1 + $0x128] sm:$0xff]  }
 0x2bc   : > { %4267 = vmatprep.subr.bf16.mxu0 %v4498_v51 }
 0x2bd   : > { %v4189_v38 = vpop.f32.mrf.mxu0  ;;  %v1503_v22 = vmul.f32 1.442695, %v1468_v4  ;;  %v1466_v58 = vsub.f32 0.0, %v1434_v18  ;;  %v1404_v4 = vmin.f32 %v5685_v48, 0.0  ;;  %4268 = vmatpush3.bf16.msra.mxu0 %v4498_v51 }
 0x2be   : > { %v5698_v20 = vadd.f32 %v4189_v38, %v5679_v16 }
 0x2bf   : > { %v1290_v53 = vpop.f32.mrf.mxu0  ;;  %4658 = vpow2.f32 %v1503_v22  ;;  %v1499_v61 = vmul.f32 1.442695, %v1466_v58 }
 0x2c0   : > { %v5701_v57 = vadd.f32 %v5679_v16, %v1290_v53  ;;  %4660 = vpow2.f32 %v1497_v62  ;;  %v1439_v17 = vand.u32 2147483647, %v5698_v20  ;;  %v1402_v53 = vmin.f32 %v5693_v44, 0.0 }
 0x2c1   : > { %v4190_v60 = vpop.f32.mrf.mxu0  ;;  %4662 = vpow2.f32 %v1499_v61 }
 0x2c2   : > { %v5705_v5 = vadd.f32 %v4190_v60, %v5679_v16  ;;  %v1437_v34 = vand.u32 2147483647, %v5701_v57  ;;  %v1471_v10 = vsub.f32 0.0, %v1439_v17  ;;  %v1407_v60 = vmin.f32 %v5698_v20, 0.0 }
 0x2c3   : > { %v1293_v3 = vpop.f32.mrf.mxu0 }
 0x2c4   : > { %v1440_v39 = vand.u32 2147483647, %v5705_v5  ;;  %v1469_v13 = vsub.f32 0.0, %v1437_v34  ;;  %v1509_v19 = vmul.f32 1.442695, %v1471_v10  ;;  %v5714_v31 = vadd.f32 %v5679_v16, %v1293_v3  ;;  %v4499_v34 = vld [vmem:[%s7028_s1 + $0x120] sm:$0xff]  }
 0x2c5   : > { %v1405_v3 = vmin.f32 %v5701_v57, 0.0  ;;  %4269 = vmatprep.subr.bf16.mxu0 %v4499_v34 }
 0x2c6   : > { %v4193_v46 = vpop.f32.mrf.mxu0  ;;  %v1472_v6 = vsub.f32 0.0, %v1440_v39  ;;  %v1505_v25 = vmul.f32 1.442695, %v1469_v13  ;;  %4664 = vpow2.f32 %v1509_v19  ;;  %v1438_v41 = vand.u32 2147483647, %v5714_v31  ;;  %4270 = vmatpush3.bf16.msra.mxu0 %v4499_v34 }
 0x2c7   : > { %v5726_v52 = vadd.f32 %v4193_v46, %v5679_v16 }
 0x2c8   : > { %v1306_v2 = vpop.f32.mrf.mxu0  ;;  %v5709_v29 = vpop.eup %4656  ;;  %v1511_v27 = vmul.f32 1.442695, %v1472_v6  ;;  %4666 = vpow2.f32 %v1505_v25  ;;  %v1470_v36 = vsub.f32 0.0, %v1438_v41 }
 0x2c9   : > { %v1579_v42 = vadd.f32 1.0, %v5709_v29  ;;  %v5730_v33 = vadd.f32 %v5679_v16, %v1306_v2  ;;  %v1443_v37 = vand.u32 2147483647, %v5726_v52  ;;  %v1582_v43 = vmul.f32 -0.5, %v5709_v29 }
 0x2ca   : > { %v4194_v15 = vpop.f32.mrf.mxu0  ;;  %v1507_v45 = vmul.f32 1.442695, %v1470_v36  ;;  %v1585_v58 = vand.u32 2147483647, %v5709_v29 }
 0x2cb   : > { %4668 = vlog2.f32 %v1579_v42  ;;  %v5737_v23 = vadd.f32 %v4194_v15, %v5679_v16  ;;  %v1441_v40 = vand.u32 2147483647, %v5730_v33  ;;  %v1475_v49 = vsub.f32 0.0, %v1443_v37 }
 0x2cc   : > { %v1309_v26 = vpop.f32.mrf.mxu0  ;;  %v5711_v8 = vpop.eup %4658  ;;  %v1583_v46 = vadd.f32 1.0, %v1582_v43  ;;  %vm5785_vm0 = vcmp.lt.f32.partialorder %v1585_v58, 0.0004427343 }
 0x2cd   : > { %v5719_v28 = vpop.eup %4660  ;;  %v1588_v32 = vadd.f32 1.0, %v5711_v8  ;;  %v5751_v12 = vadd.f32 %v5679_v16, %v1309_v26  ;;  %v1444_v55 = vand.u32 2147483647, %v5737_v23  ;;  %v1591_v38 = vmul.f32 -0.5, %v5711_v8 }
 0x2ce   : > { %v5722_v30 = vpop.eup %4662  ;;  %v1561_v35 = vadd.f32 1.0, %v5719_v28  ;;  %v1564_v1 = vmul.f32 -0.5, %v5719_v28  ;;  %v1473_v54 = vsub.f32 0.0, %v1441_v40  ;;  %v1517_v17 = vmul.f32 1.442695, %v1475_v49 }
 0x2cf   : > { %4670 = vlog2.f32 %v1588_v32  ;;  %v1570_v63 = vadd.f32 1.0, %v5722_v30  ;;  %v1573_v21 = vmul.f32 -0.5, %v5722_v30  ;;  %v1442_v62 = vand.u32 2147483647, %v5751_v12 }
 0x2d0   : > { %v4197_v14 = vpop.f32.mrf.mxu0  ;;  %4672 = vpow2.f32 %v1511_v27  ;;  %v1476_v2 = vsub.f32 0.0, %v1444_v55  ;;  %v1565_v15 = vadd.f32 1.0, %v1564_v1  ;;  %v1567_v10 = vand.u32 2147483647, %v5719_v28 }
 0x2d1   : > { %4674 = vlog2.f32 %v1561_v35  ;;  %v5761_v18 = vadd.f32 %v4197_v14, %v5679_v16  ;;  %v1408_v26 = vmin.f32 %v5705_v5, 0.0  ;;  %v1592_v14 = vadd.f32 1.0, %v1591_v38 }
 0x2d2   : > { %v5717_v47 = vpop.f32.mrf.mxu0  ;;  %4676 = vlog2.f32 %v1570_v63  ;;  %v1594_v19 = vand.u32 2147483647, %v5711_v8  ;;  %v1574_v6 = vadd.f32 1.0, %v1573_v21  ;;  %v1513_v25 = vmul.f32 1.442695, %v1473_v54 }
 0x2d3   : > { %v5772_v61 = vpop.eup %4664  ;;  %4678 = vpow2.f32 %v1507_v45  ;;  %v1447_v39 = vand.u32 2147483647, %v5761_v18  ;;  %v1576_v41 = vand.u32 2147483647, %v5722_v30  ;;  %v1474_v63 = vsub.f32 0.0, %v1442_v62 }
 0x2d4   : > { %v5732_v59 = vpop.f32.mrf.mxu0  ;;  %v1615_v35 = vadd.f32 1.0, %v5772_v61  ;;  %v1584_v37 = vmul.f32 %v5709_v29, %v1583_v46  ;;  %4680 = vpow2.f32 %v1517_v17  ;;  %v1519_v50 = vmul.f32 1.442695, %v1476_v2 }
 0x2d5   : > { %v5780_v13 = vpop.eup %4666  ;;  %v1566_v43 = vmul.f32 %v5719_v28, %v1565_v15  ;;  %vm5796_vm1 = vcmp.lt.f32.partialorder %v1567_v10, 0.0004427343  ;;  %v1479_v55 = vsub.f32 0.0, %v1447_v39  ;;  %v5803_v51 = vadd.f32 %v5679_v16, %v5717_v47 }
 0x2d6   : > { %v5746_v9 = vpop.f32.mrf.mxu0  ;;  %v1597_v49 = vadd.f32 1.0, %v5780_v13  ;;  %v1593_v29 = vmul.f32 %v5711_v8, %v1592_v14  ;;  %vm5806_vm2 = vcmp.lt.f32.partialorder %v1594_v19, 0.0004427343  ;;  %v5811_v38 = vmul.f32 %v5722_v30, %v1574_v6 }
 0x2d7   : > { %4682 = vpow2.f32 %v1513_v25  ;;  %vm5815_vm3 = vcmp.lt.f32.partialorder %v1576_v41, 0.0004427343  ;;  %v1515_v47 = vmul.f32 1.442695, %v1474_v63  ;;  %v5821_v8 = vadd.f32 %v5732_v59, %v5679_v16 }
 0x2d8   : > { %v4669_v32 = vpop.eup %4668  ;;  %4684 = vlog2.f32 %v1615_v35  ;;  %v1618_v30 = vmul.f32 -0.5, %v5772_v61  ;;  %v1525_v2 = vmul.f32 1.442695, %v1479_v55  ;;  %v1445_v15 = vand.u32 2147483647, %v5803_v51 }
 0x2d9   : > { %v1581_v62 = vmul.f32 0.6931472, %v4669_v32  ;;  %4686 = vpow2.f32 %v1519_v50  ;;  %v5828_v10 = vadd.f32 %v5679_v16, %v5746_v9  ;;  %v1600_v59 = vmul.f32 -0.5, %v5780_v13 }
 0x2da   : > { %4688 = vlog2.f32 %v1597_v49  ;;  %v1448_v32 = vand.u32 2147483647, %v5821_v8  ;;  %v1477_v50 = vsub.f32 0.0, %v1445_v15  ;;  %v1621_v27 = vand.u32 2147483647, %v5772_v61 }
 0x2db   : > { %v5766_v22 = vpop.f32.mrf.mxu0  ;;  %4690 = vpow2.f32 %v1515_v47  ;;  %v1587_v9 = vsel %vm5785_vm0, %v1584_v37, %v1581_v62  ;;  %v1446_v49 = vand.u32 2147483647, %v5828_v10  ;;  %v1601_v37 = vadd.f32 1.0, %v1600_v59 }
 0x2dc   : > { %v4671_v36 = vpop.eup %4670  ;;  %v1480_v62 = vsub.f32 0.0, %v1448_v32  ;;  %vm5874_vm4 = vcmp.lt.f32.partialorder %v1621_v27, 0.0004427343 }
 0x2dd   : > { %v5783_v42 = vpop.f32.mrf.mxu0  ;;  %v5793_v40 = vpop.eup %4672  ;;  %v1590_v54 = vmul.f32 0.6931472, %v4671_v36  ;;  %v1619_v36 = vadd.f32 1.0, %v1618_v30 }
 0x2de   : > { %v4675_v21 = vpop.eup %4674  ;;  %v1624_v46 = vadd.f32 1.0, %v5793_v40  ;;  %v1627_v35 = vmul.f32 -0.5, %v5793_v40  ;;  %v1630_v15 = vand.u32 2147483647, %v5793_v40 }
 0x2df   : > { %v5813_v28 = vpop.f32.mrf.mxu0  ;;  %v4677_v17 = vpop.eup %4676  ;;  %v1563_v39 = vmul.f32 0.6931472, %v4675_v21  ;;  %v1596_v6 = vsel %vm5806_vm2, %v1593_v29, %v1590_v54  ;;  %v5854_v21 = vsub.f32 %v1403_v24, %v1587_v9  ;;  %v5870_v24 = vmul.f32 %v5772_v61, %v1619_v36 }
 0x2e0   : > { %v1572_v41 = vmul.f32 0.6931472, %v4677_v17  ;;  %4692 = vlog2.f32 %v1624_v46  ;;  %v5840_v63 = vpop.eup %4678  ;;  %v5847_v29 = vsub.f32 %v1404_v4, %v1596_v6  ;;  %v1603_v4 = vand.u32 2147483647, %v5780_v13 }
 0x2e1   : > { %v1341_v19 = vpop.f32.mrf.mxu0  ;;  %4694 = vpow2.f32 %v1525_v2  ;;  %v1569_v55 = vsel %vm5796_vm1, %v1566_v43, %v1563_v39  ;;  %v1628_v43 = vadd.f32 1.0, %v1627_v35  ;;  %v1606_v45 = vadd.f32 1.0, %v5840_v63  ;;  %v5863_v30 = vpop.eup %4680 }
 0x2e2   : > { %v1578_v48 = vsel %vm5815_vm3, %v5811_v38, %v1572_v41  ;;  %v5867_v11 = vsub.f32 %v1401_v7, %v1569_v55  ;;  %v1521_v46 = vmul.f32 1.442695, %v1477_v50  ;;  %v1478_v17 = vsub.f32 0.0, %v1446_v49 }
 0x2e3   : > { %v5850_v1 = vpop.f32.mrf.mxu0  ;;  %v5879_v2 = vmul.f32 %v5780_v13, %v1601_v37  ;;  %v1609_v56 = vmul.f32 -0.5, %v5840_v63  ;;  %v5887_v61 = vsub.f32 %v1402_v53, %v1578_v48  ;;  %v1527_v6 = vmul.f32 1.442695, %v1480_v62 }
 0x2e4   : > { %v5883_v39 = vpop.eup %4682  ;;  %v5891_v32 = vadd.f32 %v5679_v16, %v1341_v19  ;;  %vm5893_vm5 = vcmp.lt.f32.partialorder %v1603_v4, 0.0004427343  ;;  %v5898_v41 = vmul.f32 %v5793_v40, %v1628_v43  ;;  %4696 = vlog2.f32 %v1606_v45 }
 0x2e5   : > { %v1354_v7 = vpop.f32.mrf.mxu0  ;;  %v4685_v9 = vpop.eup %4684  ;;  %v1651_v35 = vadd.f32 1.0, %v5863_v30  ;;  %v1654_v44 = vmul.f32 -0.5, %v5863_v30  ;;  %v1612_v36 = vand.u32 2147483647, %v5840_v63  ;;  %4698 = vpow2.f32 %v1521_v46 }
 0x2e6   : > { %v5902_v53 = vpop.eup %4686  ;;  %v1523_v50 = vmul.f32 1.442695, %v1478_v17  ;;  %v1610_v55 = vadd.f32 1.0, %v1609_v56  ;;  %v1633_v27 = vadd.f32 1.0, %v5883_v39  ;;  %v1636_v40 = vmul.f32 -0.5, %v5883_v39 }
 0x2e7   : > { %v4689_v49 = vpop.eup %4688  ;;  %v5910_v37 = vadd.f32 %v5679_v16, %v5783_v42  ;;  %v5912_v62 = vpop.f32.mrf.mxu0  ;;  %v1617_v48 = vmul.f32 0.6931472, %v4685_v9  ;;  %4700 = vpow2.f32 %v1527_v6  ;;  %v5916_v4 = vadd.f32 %v5766_v22, %v5679_v16 }
 0x2e8   : > { %v1450_v43 = vand.u32 2147483647, %v5891_v32  ;;  %v5919_v45 = vpop.eup %4690  ;;  %vm5921_vm6 = vcmp.lt.f32.partialorder %v1630_v15, 0.0004427343  ;;  %4702 = vlog2.f32 %v1651_v35  ;;  %v1655_v17 = vadd.f32 1.0, %v1654_v44 }
 0x2e9   : > { %v1660_v42 = vadd.f32 1.0, %v5902_v53  ;;  %v1663_v56 = vmul.f32 -0.5, %v5902_v53  ;;  %v1599_v6 = vmul.f32 0.6931472, %v4689_v49  ;;  %v1657_v19 = vand.u32 2147483647, %v5863_v30  ;;  %v1357_v47 = vpop.f32.mrf.mxu0 }
 0x2ea   : > { %4704 = vpow2.f32 %v1523_v50  ;;  %v5930_v22 = vadd.f32 %v5813_v28, %v5679_v16  ;;  %v5935_v15 = vmul.f32 %v5840_v63, %v1610_v55  ;;  %v1637_v35 = vadd.f32 1.0, %v1636_v40 }
 0x2eb   : > { %4706 = vlog2.f32 %v1633_v27  ;;  %v1449_v44 = vand.u32 2147483647, %v5910_v37  ;;  %v1623_v49 = vsel %vm5874_vm4, %v5870_v24, %v1617_v48  ;;  %v1639_v50 = vand.u32 2147483647, %v5883_v39 }
 0x2ec   : > { %v1451_v54 = vand.u32 2147483647, %v5916_v4  ;;  %v1482_v28 = vsub.f32 0.0, %v1450_v43  ;;  %v5944_v58 = vmul.f32 %v5863_v30, %v1655_v17  ;;  %4708 = vlog2.f32 %v1660_v42  ;;  %v5962_v42 = vpop.f32.mrf.mxu0 }
 0x2ed   : > { %v4693_v9 = vpop.eup %4692  ;;  %v1664_v63 = vadd.f32 1.0, %v1663_v56  ;;  %v1642_v55 = vadd.f32 1.0, %v5919_v45  ;;  %v1605_v27 = vsel %vm5893_vm5, %v5879_v2, %v1599_v6  ;;  %v1452_v24 = vand.u32 2147483647, %v5930_v22 }
 0x2ee   : > { %v5932_v59 = vpop.eup %4694  ;;  %v1626_v40 = vmul.f32 0.6931472, %v4693_v9  ;;  %v5954_v48 = vsub.f32 %v1407_v60, %v1623_v49  ;;  %v5957_v30 = vmul.f32 %v5883_v39, %v1637_v35  ;;  %v1481_v43 = vsub.f32 0.0, %v1449_v44 }
 0x2ef   : > { %v1687_v38 = vadd.f32 1.0, %v5932_v59  ;;  %v5960_v17 = vadd.f32 %v5679_v16, %v1354_v7  ;;  %vm5964_vm7 = vcmp.lt.f32.partialorder %v1612_v36, 0.0004427343  ;;  %v1666_v13 = vand.u32 2147483647, %v5902_v53 }
 0x2f0   : > { %v1483_v20 = vsub.f32 0.0, %v1451_v54  ;;  %v1531_v60 = vmul.f32 1.442695, %v1482_v28  ;;  %v5972_v39 = vsub.f32 %v1405_v3, %v1605_v27  ;;  %4710 = vlog2.f32 %v1642_v55  ;;  %v1370_v28 = vpop.f32.mrf.mxu0 }
 0x2f1   : > { %v1645_v7 = vmul.f32 -0.5, %v5919_v45  ;;  %v5976_v9 = vadd.f32 %v5679_v16, %v1357_v47  ;;  %v4697_v36 = vpop.eup %4696  ;;  %v1632_v6 = vsel %vm5921_vm6, %v5898_v41, %v1626_v40  ;;  %v5982_v35 = vmul.f32 %v5902_v53, %v1664_v63 }
 0x2f2   : > { %4712 = vlog2.f32 %v1687_v38  ;;  %v1484_v54 = vsub.f32 0.0, %v1452_v24  ;;  %v5984_v44 = vpop.eup %4698  ;;  %v1529_v57 = vmul.f32 1.442695, %v1481_v43  ;;  %v5988_v3 = vadd.f32 %v5850_v1, %v5679_v16 }
 0x2f3   : > { %v1453_v47 = vand.u32 2147483647, %v5960_v17  ;;  %v1454_v49 = vand.u32 2147483647, %v5976_v9  ;;  %vm5992_vm8 = vcmp.lt.f32.partialorder %v1657_v19, 0.0004427343  ;;  %4714 = vpow2.f32 %v1531_v60 }
 0x2f4   : > { %7049 = vst [vmem:[#allocation2_spill] sm:$0xff] %v5988_v3  ;;  %v1690_v41 = vmul.f32 -0.5, %v5932_v59  ;;  %v1533_v53 = vmul.f32 1.442695, %v1483_v20  ;;  %v5999_v63 = vadd.f32 %v5912_v62, %v5679_v16  ;;  %v6001_v55 = vpop.eup %4700  ;;  %v1608_v1 = vmul.f32 0.6931472, %v4697_v36 }
 0x2f5   : > { %v1646_v27 = vadd.f32 1.0, %v1645_v7  ;;  %v1648_v40 = vand.u32 2147483647, %v5919_v45  ;;  %v1486_v38 = vsub.f32 0.0, %v1454_v49  ;;  %v4703_v24 = vpop.eup %4702  ;;  %v6006_v19 = vsub.f32 %v1408_v26, %v1632_v6 }
 0x2f6   : > { %7052 = vst [vmem:[#allocation3_spill] sm:$0xff] %v5999_v63  ;;  %vm6008_vm9 = vcmp.lt.f32.partialorder %v1639_v50, 0.0004427343  ;;  %v1693_v20 = vand.u32 2147483647, %v5932_v59  ;;  %v1669_v62 = vadd.f32 1.0, %v5984_v44  ;;  %v6015_v60 = vadd.f32 %v5679_v16, %v1370_v28 }
 0x2f7   : > { %v6017_v7 = vpop.eup %4704  ;;  %4716 = vpow2.f32 %v1529_v57  ;;  %v1535_v36 = vmul.f32 1.442695, %v1484_v54  ;;  %v1455_v49 = vand.u32 2147483647, %v5988_v3  ;;  %v1485_v5 = vsub.f32 0.0, %v1453_v47 }
 0x2f8   : > { %v4707_v26 = vpop.eup %4706  ;;  %vm6020_vm10 = vcmp.lt.f32.partialorder %v1666_v13, 0.0004427343  ;;  %v1691_v6 = vadd.f32 1.0, %v1690_v41  ;;  %v1696_v56 = vadd.f32 1.0, %v6001_v55  ;;  %4718 = vpow2.f32 %v1533_v53 }
 0x2f9   : > { %v1456_v25 = vand.u32 2147483647, %v5999_v63  ;;  %v1614_v28 = vsel %vm5964_vm7, %v5935_v15, %v1608_v1  ;;  %v1653_v57 = vmul.f32 0.6931472, %v4703_v24  ;;  %v6030_v54 = vmul.f32 %v5919_v45, %v1646_v27  ;;  %v4709_v14 = vpop.eup %4708  ;;  %v4210_v63 = vpop.f32.mrf.mxu0 }
 0x2fa   : > { %v1539_v47 = vmul.f32 1.442695, %v1486_v38  ;;  %4720 = vlog2.f32 %v1669_v62  ;;  %v1678_v13 = vadd.f32 1.0, %v6017_v7  ;;  %v1419_v41 = vmin.f32 %v5916_v4, 0.0 }
 0x2fb   : > { %v1457_v34 = vand.u32 2147483647, %v6015_v60  ;;  %v1635_v53 = vmul.f32 0.6931472, %v4707_v26  ;;  %4722 = vpow2.f32 %v1535_v36  ;;  %v1487_v0 = vsub.f32 0.0, %v1455_v49 }
 0x2fc   : > { %v1537_v3 = vmul.f32 1.442695, %v1485_v5  ;;  %v7057_v15 = vmin.f32 %v5714_v31, 0.0  ;;  %v6040_v45 = vmul.f32 %v5932_v59, %v1691_v6  ;;  %4724 = vlog2.f32 %v1696_v56 }
 0x2fd   : > { %v1488_v1 = vsub.f32 0.0, %v1456_v25  ;;  %v1659_v27 = vsel %vm5992_vm8, %v5944_v58, %v1653_v57  ;;  %v1662_v38 = vmul.f32 0.6931472, %v4709_v14  ;;  %vm6045_vm11 = vcmp.lt.f32.partialorder %v1648_v40, 0.0004427343  ;;  %v4711_v31 = vpop.eup %4710 }
 0x2fe   : > { %v6037_v2 = vsub.f32 %v7057_v15, %v1614_v28  ;;  %v1672_v62 = vmul.f32 -0.5, %v5984_v44  ;;  %4726 = vpow2.f32 %v1539_v47  ;;  %vm6050_vm12 = vcmp.lt.f32.partialorder %v1693_v20, 0.0004427343 }
 0x2ff   : > { %4728 = vlog2.f32 %v1678_v13  ;;  %v1417_v25 = vmin.f32 %v5910_v37, 0.0  ;;  %v1489_v59 = vsub.f32 0.0, %v1457_v34  ;;  %v6056_v56 = vadd.f32 %v4210_v63, %v5679_v16  ;;  %v4713_v14 = vpop.eup %4712  ;;  %v1373_v63 = vpop.f32.mrf.mxu0 }
 0x300   : > { %v1641_v58 = vsel %vm6008_vm9, %v5957_v30, %v1635_v53  ;;  %v1420_v46 = vmin.f32 %v5930_v22, 0.0  ;;  %v1541_v40 = vmul.f32 1.442695, %v1487_v0  ;;  %4730 = vpow2.f32 %v1537_v3  ;;  %v6071_v6 = vpop.eup %4714 }
 0x301   : > { %v7062_v20 = vmin.f32 %v5726_v52, 0.0  ;;  %v1418_v5 = vmin.f32 %v5891_v32, 0.0  ;;  %v1543_v26 = vmul.f32 1.442695, %v1488_v1  ;;  %v6069_v34 = vadd.f32 %v5962_v42, %v5679_v16 }
 0x302   : > { %v1668_v30 = vsel %vm6020_vm10, %v5982_v35, %v1662_v38  ;;  %v1644_v0 = vmul.f32 0.6931472, %v4711_v31  ;;  %v1673_v3 = vadd.f32 1.0, %v1672_v62  ;;  %v1675_v52 = vand.u32 2147483647, %v5984_v44 }
 0x303   : > { %v6064_v49 = vsub.f32 %v7062_v20, %v1659_v27  ;;  %v7063_v43 = vmin.f32 %v5730_v33, 0.0  ;;  %v1699_v57 = vmul.f32 -0.5, %v6001_v55  ;;  %v1545_v47 = vmul.f32 1.442695, %v1489_v59 }
 0x304   : > { %v1460_v42 = vand.u32 2147483647, %v6056_v56  ;;  %v1689_v13 = vmul.f32 0.6931472, %v4713_v14  ;;  %4732 = vpow2.f32 %v1541_v40  ;;  %v1881_v53 = vpack.c.bf16 %v5887_v61, %v5867_v11  ;;  %v6088_v50 = vpop.eup %4716 }
 0x305   : > { %v6079_v28 = vsub.f32 %v7063_v43, %v1641_v58  ;;  %v6086_v35 = vadd.f32 %v5679_v16, %v1373_v63  ;;  %v7064_v15 = vmin.f32 %v5737_v23, 0.0  ;;  %v1714_v1 = vadd.f32 1.0, %v6071_v6  ;;  %v6096_v38 = vpop.eup %4718  ;;  %v4213_v58 = vpop.f32.mrf.mxu0 }
 0x306   : > { %4734 = vpow2.f32 %v1543_v26  ;;  %v1459_v27 = vand.u32 2147483647, %v6069_v34  ;;  %v1674_v62 = vmul.f32 %v5984_v44, %v1673_v3  ;;  %vm6099_vm13 = vcmp.lt.f32.partialorder %v1675_v52, 0.0004427343  ;;  %4231 = vmatprep.mubr.bf16.mxu1 %v1881_v53 }
 0x307   : > { %v6092_v33 = vsub.f32 %v7064_v15, %v1668_v30  ;;  %v1702_v61 = vand.u32 2147483647, %v6001_v55  ;;  %v1492_v31 = vsub.f32 0.0, %v1460_v42  ;;  %v1650_v23 = vsel %vm6045_vm11, %v6030_v54, %v1644_v0  ;;  %v4721_v40 = vpop.eup %4720 }
 0x308   : > { %v1700_v59 = vadd.f32 1.0, %v1699_v57  ;;  %4736 = vpow2.f32 %v1545_v47  ;;  %v7067_v14 = vpack.c.bf16 %v5847_v29, %v5854_v21  ;;  %v1458_v44 = vand.u32 2147483647, %v6086_v35  ;;  %v6117_v24 = vpop.eup %4722 }
 0x309   : > { %v1695_v20 = vsel %vm6050_vm12, %v6040_v45, %v1689_v13  ;;  %v1681_v26 = vmul.f32 -0.5, %v6017_v7  ;;  %v1684_v63 = vand.u32 2147483647, %v6017_v7  ;;  %v1705_v54 = vadd.f32 1.0, %v6088_v50  ;;  %v4725_v0 = vpop.eup %4724 }
 0x30a   : > { %4232 = vmatmul.mubr.bf16.vlgmr.msra.gmra.mxu1 %v7067_v14  ;;  %v1723_v30 = vadd.f32 1.0, %v6096_v38  ;;  %v1726_v29 = vmul.f32 -0.5, %v6096_v38  ;;  %4738 = vlog2.f32 %v1714_v1  ;;  %v1491_v21 = vsub.f32 0.0, %v1459_v27 }
 0x30b   : > { %v7068_v3 = vmin.f32 %v5751_v12, 0.0  ;;  %v1551_v45 = vmul.f32 1.442695, %v1492_v31  ;;  %v1490_v36 = vsub.f32 0.0, %v1458_v44  ;;  %v6126_v43 = vadd.f32 %v4213_v58, %v5679_v16  ;;  %v6128_v57 = vpop.eup %4726 }
 0x30c   : > { %v7069_v47 = vmin.f32 %v5761_v18, 0.0  ;;  %v1671_v13 = vmul.f32 0.6931472, %v4721_v40  ;;  %v1701_v53 = vmul.f32 %v6001_v55, %v1700_v59  ;;  %vm6135_vm14 = vcmp.lt.f32.partialorder %v1702_v61, 0.0004427343  ;;  %v4729_v12 = vpop.eup %4728  ;;  %v1386_v55 = vpop.f32.mrf.mxu0 }
 0x30d   : > { %v6123_v52 = vsub.f32 %v7068_v3, %v1650_v23  ;;  %v1682_v1 = vadd.f32 1.0, %v1681_v26  ;;  %vm6139_vm15 = vcmp.lt.f32.partialorder %v1684_v63, 0.0004427343  ;;  %4740 = vlog2.f32 %v1705_v54  ;;  %v6144_v23 = vpop.eup %4730 }
 0x30e   : > { %v6132_v42 = vsub.f32 %v7069_v47, %v1695_v20  ;;  %v1732_v31 = vadd.f32 1.0, %v6117_v24  ;;  %4742 = vlog2.f32 %v1723_v30  ;;  %v1727_v18 = vadd.f32 1.0, %v1726_v29 }
 0x30f   : > { %v1549_v14 = vmul.f32 1.442695, %v1491_v21  ;;  %v1547_v44 = vmul.f32 1.442695, %v1490_v36  ;;  %v1421_v61 = vmin.f32 %v5960_v17, 0.0  ;;  %v1750_v59 = vadd.f32 1.0, %v6128_v57 }
 0x310   : > { %4744 = vpow2.f32 %v1551_v45  ;;  %v1463_v58 = vand.u32 2147483647, %v6126_v43  ;;  %v1677_v40 = vsel %vm6099_vm13, %v1674_v62, %v1671_v13  ;;  %v1698_v20 = vmul.f32 0.6931472, %v4725_v0  ;;  %v4214_v13 = vpop.f32.mrf.mxu0 }
 0x311   : > { %v1708_v26 = vmul.f32 -0.5, %v6088_v50  ;;  %4746 = vpow2.f32 %v1547_v44  ;;  %v1680_v63 = vmul.f32 0.6931472, %v4729_v12  ;;  %v1741_v54 = vadd.f32 1.0, %v6144_v23  ;;  %v6156_v29 = vpop.eup %4732 }
 0x312   : > { %4748 = vlog2.f32 %v1732_v31  ;;  %v6154_v30 = vadd.f32 %v5679_v16, %v1386_v55  ;;  %v1683_v21 = vmul.f32 %v6017_v7, %v1682_v1  ;;  %v6160_v3 = vmul.f32 %v6096_v38, %v1727_v18 }
 0x313   : > { %v1729_v62 = vand.u32 2147483647, %v6096_v38  ;;  %4750 = vpow2.f32 %v1549_v14  ;;  %v6163_v11 = vpop.eup %4734  ;;  %v7074_v0 = vmin.f32 %v5803_v51, 0.0  ;;  %v1711_v36 = vand.u32 2147483647, %v6088_v50 }
 0x314   : > { %4752 = vlog2.f32 %v1750_v59  ;;  %v1495_v47 = vsub.f32 0.0, %v1463_v58  ;;  %v1704_v7 = vsel %vm6135_vm14, %v1701_v53, %v1698_v20  ;;  %v1709_v12 = vadd.f32 1.0, %v1708_v26 }
 0x315   : > { %v6167_v45 = vsub.f32 %v7074_v0, %v1677_v40  ;;  %v1735_v1 = vmul.f32 -0.5, %v6117_v24  ;;  %v1717_v38 = vmul.f32 -0.5, %v6071_v6  ;;  %v6174_v31 = vpop.eup %4736  ;;  %v1686_v51 = vsel %vm6139_vm15, %v1683_v21, %v1680_v63 }
 0x316   : > { %v1759_v18 = vadd.f32 1.0, %v6156_v29  ;;  %4754 = vlog2.f32 %v1741_v54  ;;  %v1461_v14 = vand.u32 2147483647, %v6154_v30  ;;  %v1720_v44 = vand.u32 2147483647, %v6071_v6 }
 0x317   : > { %v1768_v15 = vadd.f32 1.0, %v6163_v11  ;;  %v6183_v53 = vadd.f32 %v4214_v13, %v5679_v16  ;;  %v1883_v55 = vpack.c.bf16 %v6037_v2, %v5972_v39  ;;  %v4739_v59 = vpop.eup %4738  ;;  %v7075_v58 = vmin.f32 %v5821_v8, 0.0  ;;  %v1389_v8 = vpop.f32.mrf.mxu0 }
 0x318   : > { %v1738_v40 = vand.u32 2147483647, %v6117_v24  ;;  %v1557_v20 = vmul.f32 1.442695, %v1495_v47  ;;  %v1884_v26 = vpack.c.bf16 %v6006_v19, %v5954_v48  ;;  %v6195_v63 = vmul.f32 %v6088_v50, %v1709_v12 }
 0x319   : > { %v6189_v27 = vsub.f32 %v7075_v58, %v1704_v7  ;;  %vm6197_vm0 = vcmp.lt.f32.partialorder %v1711_v36, 0.0004427343  ;;  %v1718_v21 = vadd.f32 1.0, %v1717_v38  ;;  %v1777_v39 = vadd.f32 1.0, %v6174_v31  ;;  %4235 = vmatprep.mubr.bf16.mxu1 %v1883_v55 }
 0x31a   : > { %v1493_v2 = vsub.f32 0.0, %v1461_v14  ;;  %v7078_v0 = vmin.f32 %v5828_v10, 0.0  ;;  %v1736_v47 = vadd.f32 1.0, %v1735_v1  ;;  %4756 = vlog2.f32 %v1759_v18  ;;  %4236 = vmatmul.mubr.bf16.gmra.mxu1 %v1884_v26  ;;  %v4741_v19 = vpop.eup %4740 }
 0x31b   : > { %v1464_v48 = vand.u32 2147483647, %v6183_v53  ;;  %vm6205_vm1 = vcmp.lt.f32.partialorder %v1729_v62, 0.0004427343  ;;  %v1716_v36 = vmul.f32 0.6931472, %v4739_v59  ;;  %4758 = vlog2.f32 %v1768_v15  ;;  %v4743_v10 = vpop.eup %4742 }
 0x31c   : > { %v1862_v13 = vsub.f32 %v7078_v0, %v1686_v51  ;;  %vm6209_vm2 = vcmp.lt.f32.partialorder %v1720_v44, 0.0004427343  ;;  %v1762_v12 = vmul.f32 -0.5, %v6156_v29  ;;  %4760 = vpow2.f32 %v1557_v20 }
 0x31d   : > { %v1553_v1 = vmul.f32 1.442695, %v1493_v2  ;;  %v1496_v38 = vsub.f32 0.0, %v1464_v48  ;;  %v6215_v51 = vadd.f32 %v5679_v16, %v1389_v8  ;;  %v6217_v18 = vpop.eup %4744  ;;  %v1719_v62 = vmul.f32 %v6071_v6, %v1718_v21 }
 0x31e   : > { %v1744_v14 = vmul.f32 -0.5, %v6144_v23  ;;  %4762 = vlog2.f32 %v1777_v39  ;;  %v1885_v44 = vpack.c.bf16 %v6123_v52, %v6079_v28  ;;  %v6223_v55 = vpop.eup %4746  ;;  %v1707_v15 = vmul.f32 0.6931472, %v4741_v19 }
 0x31f   : > { %v1753_v59 = vmul.f32 -0.5, %v6128_v57  ;;  %4764 = vpow2.f32 %v1553_v1  ;;  %v1559_v58 = vmul.f32 1.442695, %v1496_v38  ;;  %v4749_v20 = vpop.eup %4748  ;;  %v1725_v16 = vmul.f32 0.6931472, %v4743_v10 }
 0x320   : > { %v1737_v26 = vmul.f32 %v6117_v24, %v1736_v47  ;;  %vm6227_vm3 = vcmp.lt.f32.partialorder %v1738_v40, 0.0004427343  ;;  %v1722_v6 = vsel %vm6209_vm2, %v1719_v62, %v1716_v36  ;;  %v1786_v28 = vadd.f32 1.0, %v6223_v55  ;;  %4239 = vmatprep.mubr.bf16.mxu1 %v1885_v44  ;;  %v6234_v52 = vpop.eup %4750 }
 0x321   : > { %4766 = vpow2.f32 %v1559_v58  ;;  %v1462_v21 = vand.u32 2147483647, %v6215_v51  ;;  %v1886_v39 = vpack.c.bf16 %v6092_v33, %v6064_v49  ;;  %v1887_v24 = vpack.c.bf16 %v1862_v13, %v6167_v45  ;;  %v4753_v40 = vpop.eup %4752 }
 0x322   : > { %v1763_v8 = vadd.f32 1.0, %v1762_v12  ;;  %v1745_v0 = vadd.f32 1.0, %v1744_v14  ;;  %v1804_v47 = vadd.f32 1.0, %v6217_v18  ;;  %4768 = vlog2.f32 %v1786_v28 }
 0x323   : > { %v1713_v48 = vsel %vm6197_vm0, %v6195_v63, %v1707_v15  ;;  %v1771_v19 = vmul.f32 -0.5, %v6163_v11  ;;  %v1754_v36 = vadd.f32 1.0, %v1753_v59  ;;  %v1494_v7 = vsub.f32 0.0, %v1462_v21  ;;  %4240 = vmatmul.mubr.bf16.gmra.mxu1 %v1886_v39  ;;  %v4755_v10 = vpop.eup %4754 }
 0x324   : > { %v1866_v49 = vsub.f32 %v1418_v5, %v1722_v6  ;;  %v1747_v33 = vand.u32 2147483647, %v6144_v23  ;;  %v1756_v45 = vand.u32 2147483647, %v6128_v57  ;;  %v1795_v13 = vadd.f32 1.0, %v6234_v52  ;;  %4243 = vmatprep.mubr.bf16.mxu1 %v1887_v24 }
 0x325   : > { %v1731_v63 = vsel %vm6205_vm1, %v6160_v3, %v1725_v16  ;;  %v1734_v54 = vmul.f32 0.6931472, %v4749_v20  ;;  %v1752_v12 = vmul.f32 0.6931472, %v4753_v40  ;;  %v1555_v1 = vmul.f32 1.442695, %v1494_v7 }
 0x326   : > { %v1865_v38 = vsub.f32 %v1417_v25, %v1713_v48  ;;  %v1746_v32 = vmul.f32 %v6144_v23, %v1745_v0  ;;  %v1774_v5 = vand.u32 2147483647, %v6163_v11  ;;  %4770 = vlog2.f32 %v1804_v47 }
 0x327   : > { %v1743_v62 = vmul.f32 0.6931472, %v4755_v10  ;;  %v1772_v14 = vadd.f32 1.0, %v1771_v19  ;;  %v1755_v44 = vmul.f32 %v6128_v57, %v1754_v36  ;;  %4772 = vpow2.f32 %v1555_v1  ;;  %v4757_v15 = vpop.eup %4756 }
 0x328   : > { %vm6258_vm4 = vcmp.lt.f32.partialorder %v1756_v45, 0.0004427343  ;;  %4774 = vlog2.f32 %v1795_v13  ;;  %v1789_v3 = vmul.f32 -0.5, %v6223_v55  ;;  %v1889_v37 = vpack.c.bf16 %v1866_v49, %v1865_v38  ;;  %v4759_v25 = vpop.eup %4758  ;;  %v7097_v38 = vld [vmem:[#allocation3_spill] sm:$0xff] }
 0x329   : > { %v1740_v23 = vsel %vm6227_vm3, %v1737_v26, %v1734_v54  ;;  %v1758_v59 = vsel %vm6258_vm4, %v1755_v44, %v1752_v12  ;;  %v1780_v58 = vmul.f32 -0.5, %v6174_v31  ;;  %v1888_v57 = vpack.c.bf16 %v6189_v27, %v6132_v42  ;;  %v6270_v20 = vpop.eup %4760 }
 0x32a   : > { %v1764_v16 = vmul.f32 %v6156_v29, %v1763_v8  ;;  %v1765_v6 = vand.u32 2147483647, %v6156_v29  ;;  %vm6274_vm5 = vcmp.lt.f32.partialorder %v1747_v33, 0.0004427343  ;;  %v1422_v26 = vmin.f32 %v5976_v9, 0.0 }
 0x32b   : > { %v4763_v2 = vpop.eup %4762  ;;  %v1867_v21 = vsub.f32 %v1419_v41, %v1731_v63  ;;  %v1749_v39 = vsel %vm6274_vm5, %v1746_v32, %v1743_v62  ;;  %vm6283_vm6 = vcmp.lt.f32.partialorder %v1774_v5, 0.0004427343  ;;  %v1426_v27 = vmin.f32 %v6086_v35, 0.0  ;;  %4244 = vmatmul.mubr.bf16.gmra.mxu1 %v1888_v57 }
 0x32c   : > { %v6288_v29 = vpop.eup %4764  ;;  %v1868_v24 = vsub.f32 %v1420_v46, %v1740_v23  ;;  %v1773_v9 = vmul.f32 %v6163_v11, %v1772_v14  ;;  %v1870_v40 = vsub.f32 %v1422_v26, %v1758_v59  ;;  %v1790_v4 = vadd.f32 1.0, %v1789_v3  ;;  %4247 = vmatprep.mubr.bf16.mxu1 %v1889_v37  ;;  %v7098_v37 = vld [vmem:[#allocation2_spill] sm:$0xff] }
 0x32d   : > { %v1761_v41 = vmul.f32 0.6931472, %v4757_v15  ;;  %v1781_v8 = vadd.f32 1.0, %v1780_v58  ;;  %v1792_v0 = vand.u32 2147483647, %v6223_v55  ;;  %v1813_v47 = vadd.f32 1.0, %v6288_v29 }
 0x32e   : > { %v6295_v48 = vpop.eup %4766  ;;  %v1869_v35 = vsub.f32 %v1421_v61, %v1749_v39  ;;  %v1770_v19 = vmul.f32 0.6931472, %v4759_v25  ;;  %v1783_v22 = vand.u32 2147483647, %v6174_v31  ;;  %v1831_v46 = vadd.f32 1.0, %v6270_v20 }
 0x32f   : > { %v4769_v11 = vpop.eup %4768  ;;  %v1798_v36 = vmul.f32 -0.5, %v6234_v52  ;;  %v1779_v7 = vmul.f32 0.6931472, %v4763_v2  ;;  %v1807_v10 = vmul.f32 -0.5, %v6217_v18  ;;  %v1840_v49 = vadd.f32 1.0, %v6295_v48 }
 0x330   : > { %v1788_v33 = vmul.f32 0.6931472, %v4769_v11  ;;  %v1791_v45 = vmul.f32 %v6223_v55, %v1790_v4  ;;  %4776 = vlog2.f32 %v1813_v47  ;;  %v1891_v13 = vpack.c.bf16 %v1870_v40, %v1869_v35 }
 0x331   : > { %v1782_v17 = vmul.f32 %v6174_v31, %v1781_v8  ;;  %vm6306_vm7 = vcmp.lt.f32.partialorder %v1792_v0, 0.0004427343  ;;  %4778 = vlog2.f32 %v1840_v49  ;;  %v1890_v63 = vpack.c.bf16 %v1868_v24, %v1867_v21 }
 0x332   : > { %v1776_v54 = vsel %vm6283_vm6, %v1773_v9, %v1770_v19  ;;  %vm6312_vm8 = vcmp.lt.f32.partialorder %v1783_v22, 0.0004427343  ;;  %v1794_v55 = vsel %vm6306_vm7, %v1791_v45, %v1788_v33  ;;  %4780 = vlog2.f32 %v1831_v46 }
 0x333   : > { %v4771_v1 = vpop.eup %4770  ;;  %vm6318_vm9 = vcmp.lt.f32.partialorder %v1765_v6, 0.0004427343  ;;  %v1424_v32 = vmin.f32 %v7097_v38, 0.0  ;;  %v1785_v5 = vsel %vm6312_vm8, %v1782_v17, %v1779_v7  ;;  %4248 = vmatmul.mubr.bf16.gmra.mxu1 %v1890_v63  ;;  %v1425_v44 = vmin.f32 %v6015_v60, 0.0 }
 0x334   : > { %v6325_v62 = vpop.eup %4772  ;;  %v1767_v14 = vsel %vm6318_vm9, %v1764_v16, %v1761_v41  ;;  %v1808_v15 = vadd.f32 1.0, %v1807_v10  ;;  %v1874_v50 = vsub.f32 %v1426_v27, %v1794_v55  ;;  %4251 = vmatprep.mubr.bf16.mxu1 %v1891_v13  ;;  %v1423_v25 = vmin.f32 %v7098_v37, 0.0 }
 0x335   : > { %v4775_v3 = vpop.eup %4774  ;;  %v1872_v23 = vsub.f32 %v1424_v32, %v1776_v54  ;;  %v1810_v59 = vand.u32 2147483647, %v6217_v18  ;;  %v1822_v58 = vadd.f32 1.0, %v6325_v62  ;;  %v1799_v57 = vadd.f32 1.0, %v1798_v36 }
 0x336   : > { %v1873_v6 = vsub.f32 %v1425_v44, %v1785_v5  ;;  %v1806_v28 = vmul.f32 0.6931472, %v4771_v1  ;;  %v1871_v26 = vsub.f32 %v1423_v25, %v1767_v14  ;;  %v1801_v2 = vand.u32 2147483647, %v6234_v52  ;;  %v6375_v25 = vld [vmem:[%s7029_s2 + $0x3] ss:$0 sm:$0xff] }
 0x337   : > { %4782 = vlog2.f32 %v1822_v58  ;;  %v1797_v16 = vmul.f32 0.6931472, %v4775_v3  ;;  %v1809_v60 = vmul.f32 %v6217_v18, %v1808_v15  ;;  %vm1811_vm10 = vcmp.lt.f32.partialorder %v1810_v59, 0.0004427343 }
 0x338   : > { %v1893_v21 = vpack.c.bf16 %v1874_v50, %v1873_v6  ;;  %v1892_v39 = vpack.c.bf16 %v1872_v23, %v1871_v26  ;;  %v1800_v42 = vmul.f32 %v6234_v52, %v1799_v57  ;;  %v1843_v24 = vmul.f32 -0.5, %v6295_v48 }
 0x339   : > { %v1812_v27 = vsel %vm1811_vm10, %v1809_v60, %v1806_v28  ;;  %vm1802_vm11 = vcmp.lt.f32.partialorder %v1801_v2, 0.0004427343  ;;  %v1428_v9 = vmin.f32 %v6056_v56, 0.0  ;;  %v1816_v40 = vmul.f32 -0.5, %v6288_v29 }
 0x33a   : > { %v1803_v4 = vsel %vm1802_vm11, %v1800_v42, %v1797_v16  ;;  %v1834_v41 = vmul.f32 -0.5, %v6270_v20  ;;  %v1427_v18 = vmin.f32 %v6069_v34, 0.0  ;;  %v1825_v47 = vmul.f32 -0.5, %v6325_v62 }
 0x33b   : > { %4252 = vmatmul.mubr.bf16.gmra.mxu1 %v1892_v39  ;;  %v1876_v0 = vsub.f32 %v1428_v9, %v1812_v27  ;;  %v1844_v35 = vadd.f32 1.0, %v1843_v24  ;;  %v1817_v46 = vadd.f32 1.0, %v1816_v40  ;;  %v1846_v56 = vand.u32 2147483647, %v6295_v48 }
 0x33c   : > { %4255 = vmatprep.mubr.bf16.mxu1 %v1893_v21  ;;  %v1875_v22 = vsub.f32 %v1427_v18, %v1803_v4  ;;  %v1835_v11 = vadd.f32 1.0, %v1834_v41  ;;  %v1819_v36 = vand.u32 2147483647, %v6288_v29  ;;  %v1837_v10 = vand.u32 2147483647, %v6270_v20 }
 0x33d   : > { %v4777_v8 = vpop.eup %4776  ;;  %v1826_v33 = vadd.f32 1.0, %v1825_v47  ;;  %v1845_v13 = vmul.f32 %v6295_v48, %v1844_v35  ;;  %v1828_v17 = vand.u32 2147483647, %v6325_v62  ;;  %v1818_v61 = vmul.f32 %v6288_v29, %v1817_v46 }
 0x33e   : > { %v4779_v52 = vpop.eup %4778  ;;  %v1815_v49 = vmul.f32 0.6931472, %v4777_v8  ;;  %v1894_v45 = vpack.c.bf16 %v1876_v0, %v1875_v22  ;;  %vm6348_vm12 = vcmp.lt.f32.partialorder %v1846_v56, 0.0004427343  ;;  %v1836_v12 = vmul.f32 %v6270_v20, %v1835_v11 }
 0x33f   : > { %v4781_v19 = vpop.eup %4780  ;;  %v1842_v7 = vmul.f32 0.6931472, %v4779_v52  ;;  %vm1820_vm13 = vcmp.lt.f32.partialorder %v1819_v36, 0.0004427343  ;;  %v1432_v55 = vmin.f32 %v6183_v53, 0.0  ;;  %v1827_v38 = vmul.f32 %v6325_v62, %v1826_v33  ;;  %v4500_v62 = vld [vmem:[%s7028_s1 + $0x118] sm:$0xff]  }
 0x340   : > { %v1833_v34 = vmul.f32 0.6931472, %v4781_v19  ;;  %vm1838_vm14 = vcmp.lt.f32.partialorder %v1837_v10, 0.0004427343  ;;  %v1821_v48 = vsel %vm1820_vm13, %v1818_v61, %v1815_v49  ;;  %v1429_v32 = vmin.f32 %v6154_v30, 0.0  ;;  %4271 = vmatprep.subr.bf16.mxu0 %v4500_v62  ;;  %v4501_v30 = vld [vmem:[%s7028_s1 + $0x110] sm:$0xff]  }
 0x341   : > { %v1848_v1 = vsel %vm6348_vm12, %v1845_v13, %v1842_v7  ;;  %v1430_v5 = vmin.f32 %v6215_v51, 0.0  ;;  %vm1829_vm15 = vcmp.lt.f32.partialorder %v1828_v17, 0.0004427343  ;;  %v1431_v14 = vmin.f32 %v6126_v43, 0.0  ;;  %4272 = vmatpush3.bf16.msra.mxu0 %v4500_v62  ;;  %v4502_v43 = vld [vmem:[%s7028_s1 + $0x108] sm:$0xff]   ;;  %v4503_v51 = vld [vmem:[%s7028_s1 + $0x100] sm:$0xff]  }
 0x342   : > { %v1839_v29 = vsel %vm1838_vm14, %v1836_v12, %v1833_v34  ;;  %v1880_v20 = vsub.f32 %v1432_v55, %v1848_v1  ;;  %v1877_v15 = vsub.f32 %v1429_v32, %v1821_v48  ;;  %4273 = vmatprep.subr.bf16.mxu0 %v4501_v30  ;;  %v207_v4 = vlaneseq  ;;  %v5040_v10 = vld [vmem:[%s5126_s24 + $0x18] sm:$0xff]  ;;  %v5041_v17 = vld [vmem:[%s5126_s24] sm:$0xff] }
 0x343   : > { %4256 = vmatmul.mubr.bf16.gmra.mxu1 %v1894_v45  ;;  %v1879_v50 = vsub.f32 %v1431_v14, %v1839_v29 }
 0x344   : > { %v4783_v54 = vpop.eup %4782  ;;  %v6398_v35 = vand.u32 127, %v207_v4 }
 0x345   : > { %v1824_v31 = vmul.f32 0.6931472, %v4783_v54  ;;  %v1896_v37 = vpack.c.bf16 %v1880_v20, %v1879_v50  ;;  %4274 = vmatpush3.bf16.msra.mxu0 %v4501_v30  ;;  %v5042_v54 = vld [vmem:[%s5126_s24 + $0x10] sm:$0xff] }
 0x346   : > { %4275 = vmatprep.subr.bf16.mxu0 %v4502_v43  ;;  %vm210_vm0 = vcmp.ge.s32.totalorder %v6398_v35, 8  ;;  %vm211_vm1 = vcmp.lt.s32.totalorder %v6398_v35, 16  ;;  %vm209_vm2 = vcmp.lt.s32.totalorder %v6398_v35, 8  ;;  %v4511_v35 = vld [vmem:[%s7028_s1 + $0x140] sm:$0xff]  }
 0x347   : > { %v1830_v44 = vsel %vm1829_vm15, %v1827_v38, %v1824_v31  ;;  %vm6426_vm3 = vmand %vm210_vm0, %vm211_vm1  ;;  %v4510_v31 = vld [vmem:[%s7028_s1 + $0x148] sm:$0xff]  }
 0x348   : > { %v1878_v53 = vsub.f32 %v1430_v5, %v1830_v44 }
 0x349   : > { %4276 = vmatpush3.bf16.msra.mxu0 %v4502_v43 }
 0x34a   : > { %v1895_v3 = vpack.c.bf16 %v1878_v53, %v1877_v15  ;;  %4277 = vmatprep.subr.bf16.mxu0 %v4503_v51  ;;  %v5043_v15 = vld [vmem:[%s5126_s24 + $0x8] sm:$0xff] }
 0x34c   : > { %4259 = vmatprep.mubr.bf16.mxu1 %v1895_v3 }
 0x34d   : > { %4260 = vmatmul.mubr.bf16.gmra.mxu1 %v1896_v37  ;;  %4278 = vmatpush3.bf16.msra.mxu0 %v4503_v51 }
 0x3ca   : > { %v4233_v23 = vpop.f32.mrf.mxu1 }
 0x3cb   : > { %v6378_v59 = vadd.f32 %v4233_v23, %v6375_v25 }
 0x3cc   : > { %v2001_v58 = vpop.f32.mrf.mxu1 }
 0x3cd   : > { %v2162_v57 = vmul.f32 0.5, %v6378_v59  ;;  %v2002_v6 = vadd.f32 %v6375_v25, %v2001_v58  ;;  %3440 = vrot.lane.b32.xlu1 %v6378_v59, %s5080_s11 }
 0x3ce   : > { %v4234_v28 = vpop.f32.mrf.mxu1 }
 0x3cf   : > { %v2196_v26 = vmul.f32 1.442695, %v2162_v57  ;;  %v2160_v2 = vmul.f32 0.5, %v2002_v6  ;;  %v2013_v16 = vadd.f32 %v4234_v28, %v6375_v25  ;;  %3436 = vrot.lane.b32.xlu0 %v2002_v6, %s5080_s11  ;;  %v2128_v38 = vsel %vm209_vm2, %v2002_v6, 0.0 }
 0x3d0   : > { %v2004_v60 = vpop.f32.mrf.mxu1 }
 0x3d1   : > { %v2192_v21 = vmul.f32 1.442695, %v2160_v2  ;;  %v2163_v39 = vmul.f32 0.5, %v2013_v16  ;;  %3442 = vrot.lane.b32.xlu1 %v2013_v16, %s5080_s11  ;;  %v2005_v42 = vadd.f32 %v6375_v25, %v2004_v60  ;;  %4784 = vpow2.f32 %v2196_v26 }
 0x3d2   : > { %v2131_v29 = vsel %vm209_vm2, %v2013_v16, 0.0  ;;  %v2130_v26 = vsel %vm209_vm2, %v6378_v59, 0.0 }
 0x3d3   : > { %v2198_v27 = vmul.f32 1.442695, %v2163_v39  ;;  %4786 = vpow2.f32 %v2192_v21  ;;  %v2161_v24 = vmul.f32 0.5, %v2005_v42  ;;  %3438 = vrot.lane.b32.xlu0 %v2005_v42, %s5080_s11  ;;  %v2129_v50 = vsel %vm209_vm2, %v2005_v42, 0.0 }
 0x3d5   : > { %4788 = vpow2.f32 %v2198_v27  ;;  %v2194_v9 = vmul.f32 1.442695, %v2161_v24 }
 0x3d7   : > { %4790 = vpow2.f32 %v2194_v9 }
 0x3da   : > { %v4237_v40 = vpop.f32.mrf.mxu1 }
 0x3db   : > { %v6390_v41 = vadd.f32 %v4237_v40, %v6375_v25 }
 0x3dc   : > { %v2017_v8 = vpop.f32.mrf.mxu1 }
 0x3dd   : > { %v2166_v18 = vmul.f32 0.5, %v6390_v41  ;;  %v6394_v0 = vadd.f32 %v6375_v25, %v2017_v8  ;;  %3448 = vrot.lane.b32.xlu0 %v6390_v41, %s5080_s11 }
 0x3de   : > { %v4238_v47 = vpop.f32.mrf.mxu1  ;;  %v4785_v52 = vpop.eup %4784 }
 0x3df   : > { %v2204_v19 = vmul.f32 1.442695, %v2166_v18  ;;  %v2164_v22 = vmul.f32 0.5, %v6394_v0  ;;  %v6402_v46 = vadd.f32 %v4238_v47, %v6375_v25  ;;  %v2258_v12 = vmul.f32 %v5042_v54, %v4785_v52 }
 0x3e0   : > { %v4787_v56 = vpop.eup %4786  ;;  %v2020_v11 = vpop.f32.mrf.mxu1 }
 0x3e1   : > { %v2200_v7 = vmul.f32 1.442695, %v2164_v22  ;;  %3450 = vrot.lane.b32.xlu1 %v6402_v46, %s5080_s11  ;;  %3444 = vrot.lane.b32.xlu0 %v6394_v0, %s5080_s11  ;;  %4792 = vpow2.f32 %v2204_v19  ;;  %v2167_v33 = vmul.f32 0.5, %v6402_v46  ;;  %v6413_v45 = vadd.f32 %v6375_v25, %v2020_v11 }
 0x3e2   : > { %v4789_v36 = vpop.eup %4788  ;;  %v2256_v61 = vmul.f32 %v5041_v17, %v4787_v56  ;;  %v2290_v30 = vsel %vm6426_vm3, %v2258_v12, 0.0  ;;  %v2134_v11 = vsel %vm209_vm2, %v6390_v41, 0.0  ;;  %v5044_v41 = vld [vmem:[%s5126_s24 + $0x30] sm:$0xff]  ;;  %v5045_v12 = vld [vmem:[%s5126_s24 + $0x20] sm:$0xff] }
 0x3e3   : > { %v2259_v49 = vmul.f32 %v5040_v10, %v4789_v36  ;;  %v4241_v34 = vpop.f32.mrf.mxu1  ;;  %4794 = vpow2.f32 %v2200_v7  ;;  %v2206_v55 = vmul.f32 1.442695, %v2167_v33  ;;  %v2165_v1 = vmul.f32 0.5, %v6413_v45 }
 0x3e4   : > { %v6416_v13 = vadd.f32 %v4241_v34, %v6375_v25  ;;  %v4791_v63 = vpop.eup %4790  ;;  %v2288_v62 = vsel %vm6426_vm3, %v2256_v61, 0.0  ;;  %v2322_v21 = vadd.f32 %v2290_v30, %v2130_v26  ;;  %v2132_v10 = vsel %vm209_vm2, %v6394_v0, 0.0 }
 0x3e5   : > { %v2033_v48 = vpop.f32.mrf.mxu1  ;;  %3446 = vrot.lane.b32.xlu1 %v6413_v45, %s5080_s11  ;;  %v2291_v14 = vsel %vm6426_vm3, %v2259_v49, 0.0  ;;  %4796 = vpow2.f32 %v2206_v55  ;;  %v2202_v20 = vmul.f32 1.442695, %v2165_v1  ;;  %v2257_v53 = vmul.f32 %v5043_v15, %v4791_v63 }
 0x3e6   : > { %v2170_v32 = vmul.f32 0.5, %v6416_v13  ;;  %v6436_v5 = vadd.f32 %v6375_v25, %v2033_v48  ;;  %3456 = vrot.lane.b32.xlu0 %v6416_v13, %s5080_s11  ;;  %v2323_v58 = vadd.f32 %v2291_v14, %v2131_v29  ;;  %v2320_v60 = vadd.f32 %v2288_v62, %v2128_v38  ;;  %v5046_v29 = vld [vmem:[%s5126_s24 + $0x38] sm:$0xff] }
 0x3e7   : > { %v4242_v44 = vpop.f32.mrf.mxu1  ;;  %4798 = vpow2.f32 %v2202_v20  ;;  %v2289_v23 = vsel %vm6426_vm3, %v2257_v53, 0.0  ;;  %v2135_v0 = vsel %vm209_vm2, %v6402_v46, 0.0  ;;  %v2133_v1 = vsel %vm209_vm2, %v6413_v45, 0.0  ;;  %v5047_v45 = vld [vmem:[%s5126_s24 + $0x28] sm:$0xff] }
 0x3e8   : > { %v2212_v3 = vmul.f32 1.442695, %v2170_v32  ;;  %v2168_v37 = vmul.f32 0.5, %v6436_v5  ;;  %v6453_v43 = vadd.f32 %v4242_v44, %v6375_v25  ;;  %v2321_v28 = vadd.f32 %v2289_v23, %v2129_v50 }
 0x3e9   : > { %v2036_v51 = vpop.f32.mrf.mxu1  ;;  %v2353_v40 = vpack.c.bf16 %v2323_v58, %v2322_v21  ;;  %v6514_v20 = vsel %vm209_vm2, %v6416_v13, 0.0  ;;  %v2136_v58 = vsel %vm209_vm2, %v6436_v5, 0.0 }
 0x3ea   : > { %v2208_v57 = vmul.f32 1.442695, %v2168_v37  ;;  %v6458_v6 = vadd.f32 %v6375_v25, %v2036_v51  ;;  %3452 = vrot.lane.b32.xlu0 %v6436_v5, %s5080_s11  ;;  %4800 = vpow2.f32 %v2212_v3  ;;  %v2171_v2 = vmul.f32 0.5, %v6453_v43  ;;  %3458 = vrot.lane.b32.xlu1 %v6453_v43, %s5080_s11 }
 0x3eb   : > { %v4245_v16 = vpop.f32.mrf.mxu1  ;;  %v2352_v9 = vpack.c.bf16 %v2321_v28, %v2320_v60 }
 0x3ec   : > { %4802 = vpow2.f32 %v2208_v57  ;;  %v2169_v39 = vmul.f32 0.5, %v6458_v6  ;;  %v6470_v42 = vadd.f32 %v4245_v16, %v6375_v25  ;;  %v2214_v27 = vmul.f32 1.442695, %v2171_v2 }
 0x3ed   : > { %v2049_v24 = vpop.f32.mrf.mxu1  ;;  %4279 = vmatprep.mubr.bf16.mxu0 %v2352_v9  ;;  %v5048_v9 = vld [vmem:[%s5126_s24 + $0x50] sm:$0xff] }
 0x3ee   : > { %v2210_v59 = vmul.f32 1.442695, %v2169_v39  ;;  %v6473_v4 = vadd.f32 %v6375_v25, %v2049_v24  ;;  %3464 = vrot.lane.b32.xlu0 %v6470_v42, %s5080_s11  ;;  %4804 = vpow2.f32 %v2214_v27  ;;  %v2174_v8 = vmul.f32 0.5, %v6470_v42  ;;  %3454 = vrot.lane.b32.xlu1 %v6458_v6, %s5080_s11  ;;  %v4793_v47 = vpop.eup %4792 }
 0x3ef   : > { %v4246_v18 = vpop.f32.mrf.mxu1  ;;  %4280 = vmatmul.mubr.bf16.vlgmr.msra.gmra.mxu0 %v2353_v40  ;;  %v2262_v17 = vmul.f32 %v5044_v41, %v4793_v47  ;;  %v5049_v47 = vld [vmem:[%s5126_s24 + $0x40] sm:$0xff] }
 0x3f0   : > { %4806 = vpow2.f32 %v2210_v59  ;;  %v2172_v52 = vmul.f32 0.5, %v6473_v4  ;;  %v4795_v19 = vpop.eup %4794  ;;  %v6482_v22 = vadd.f32 %v4246_v18, %v6375_v25  ;;  %v2220_v49 = vmul.f32 1.442695, %v2174_v8 }
 0x3f1   : > { %v2052_v56 = vpop.f32.mrf.mxu1  ;;  %v2260_v55 = vmul.f32 %v5045_v12, %v4795_v19  ;;  %v2294_v13 = vsel %vm6426_vm3, %v2262_v17, 0.0 }
 0x3f2   : > { %v2216_v36 = vmul.f32 1.442695, %v2172_v52  ;;  %v6488_v7 = vadd.f32 %v6375_v25, %v2052_v56  ;;  %3460 = vrot.lane.b32.xlu0 %v6473_v4, %s5080_s11  ;;  %v2175_v33 = vmul.f32 0.5, %v6482_v22  ;;  %3466 = vrot.lane.b32.xlu1 %v6482_v22, %s5080_s11  ;;  %v4797_v61 = vpop.eup %4796  ;;  %v2326_v24 = vadd.f32 %v2294_v13, %v2134_v11 }
 0x3f3   : > { %v4249_v34 = vpop.f32.mrf.mxu1  ;;  %v2263_v32 = vmul.f32 %v5046_v29, %v4797_v61  ;;  %v2292_v51 = vsel %vm6426_vm3, %v2260_v55, 0.0  ;;  %v2139_v61 = vsel %vm209_vm2, %v6453_v43, 0.0  ;;  %v5051_v55 = vld [vmem:[%s5126_s24 + $0x48] sm:$0xff] }
 0x3f4   : > { %4808 = vpow2.f32 %v2216_v36  ;;  %v2173_v63 = vmul.f32 0.5, %v6488_v7  ;;  %v6501_v54 = vadd.f32 %v4249_v34, %v6375_v25  ;;  %v2222_v48 = vmul.f32 1.442695, %v2175_v33  ;;  %v4799_v14 = vpop.eup %4798  ;;  %v5050_v33 = vld [vmem:[%s5126_s24 + $0x58] sm:$0xff] }
 0x3f5   : > { %v2065_v38 = vpop.f32.mrf.mxu1  ;;  %4810 = vpow2.f32 %v2220_v49  ;;  %v2261_v50 = vmul.f32 %v5047_v45, %v4799_v14  ;;  %v2295_v3 = vsel %vm6426_vm3, %v2263_v32, 0.0  ;;  %v2324_v27 = vadd.f32 %v2292_v51, %v2132_v10 }
 0x3f6   : > { %v2218_v44 = vmul.f32 1.442695, %v2173_v63  ;;  %v2178_v15 = vmul.f32 0.5, %v6501_v54  ;;  %v6518_v53 = vadd.f32 %v6375_v25, %v2065_v38  ;;  %3472 = vrot.lane.b32.xlu0 %v6501_v54, %s5080_s11  ;;  %3462 = vrot.lane.b32.xlu1 %v6488_v7, %s5080_s11  ;;  %v2327_v21 = vadd.f32 %v2295_v3, %v2135_v0 }
 0x3f7   : > { %v4250_v46 = vpop.f32.mrf.mxu1  ;;  %v4801_v37 = vpop.eup %4800  ;;  %v2293_v26 = vsel %vm6426_vm3, %v2261_v50, 0.0  ;;  %v2137_v63 = vsel %vm209_vm2, %v6458_v6, 0.0 }
 0x3f8   : > { %4812 = vpow2.f32 %v2218_v44  ;;  %v2228_v62 = vmul.f32 1.442695, %v2178_v15  ;;  %v2176_v30 = vmul.f32 0.5, %v6518_v53  ;;  %v6536_v57 = vadd.f32 %v4250_v46, %v6375_v25 }
 0x3f9   : > { %v4803_v23 = vpop.eup %4802  ;;  %4814 = vpow2.f32 %v2222_v48  ;;  %v2068_v28 = vpop.f32.mrf.mxu1  ;;  %v2325_v60 = vadd.f32 %v2293_v26, %v2133_v1  ;;  %v2266_v40 = vmul.f32 %v5048_v9, %v4801_v37  ;;  %v2355_v17 = vpack.c.bf16 %v2327_v21, %v2326_v24 }
 0x3fa   : > { %v2224_v2 = vmul.f32 1.442695, %v2176_v30  ;;  %v6541_v16 = vadd.f32 %v6375_v25, %v2068_v28  ;;  %3468 = vrot.lane.b32.xlu0 %v6518_v53, %s5080_s11  ;;  %v2179_v5 = vmul.f32 0.5, %v6536_v57  ;;  %3474 = vrot.lane.b32.xlu1 %v6536_v57, %s5080_s11  ;;  %4816 = vpow2.f32 %v2228_v62  ;;  %v5052_v30 = vld [vmem:[%s5126_s24 + $0x60] sm:$0xff] }
 0x3fb   : > { %v4253_v39 = vpop.f32.mrf.mxu1  ;;  %v4805_v59 = vpop.eup %4804  ;;  %v2264_v52 = vmul.f32 %v5049_v47, %v4803_v23  ;;  %v2354_v49 = vpack.c.bf16 %v2325_v60, %v2324_v27  ;;  %v2298_v43 = vsel %vm6426_vm3, %v2266_v40, 0.0  ;;  %v6585_v15 = vsel %vm209_vm2, %v6470_v42, 0.0  ;;  %v5054_v47 = vld [vmem:[%s5126_s24 + $0x70] sm:$0xff] }
 0x3fc   : > { %v2177_v8 = vmul.f32 0.5, %v6541_v16  ;;  %v6551_v18 = vadd.f32 %v4253_v39, %v6375_v25  ;;  %4818 = vpow2.f32 %v2224_v2  ;;  %v2230_v56 = vmul.f32 1.442695, %v2179_v5 }
 0x3fd   : > { %v4807_v19 = vpop.eup %4806  ;;  %v2081_v36 = vpop.f32.mrf.mxu1  ;;  %v2267_v10 = vmul.f32 %v5050_v33, %v4805_v59  ;;  %4283 = vmatprep.mubr.bf16.mxu0 %v2354_v49  ;;  %v2296_v48 = vsel %vm6426_vm3, %v2264_v52, 0.0  ;;  %v2330_v26 = vadd.f32 %v2298_v43, %v6514_v20  ;;  %v2140_v60 = vsel %vm209_vm2, %v6473_v4, 0.0  ;;  %v5053_v20 = vld [vmem:[%s5126_s24 + $0x68] sm:$0xff] }
 0x3fe   : > { %v2226_v11 = vmul.f32 1.442695, %v2177_v8  ;;  %v2182_v34 = vmul.f32 0.5, %v6551_v18  ;;  %v6557_v41 = vadd.f32 %v6375_v25, %v2081_v36  ;;  %3480 = vrot.lane.b32.xlu0 %v6551_v18, %s5080_s11  ;;  %4820 = vpow2.f32 %v2230_v56  ;;  %3470 = vrot.lane.b32.xlu1 %v6541_v16, %s5080_s11 }
 0x3ff   : > { %v4254_v12 = vpop.f32.mrf.mxu1  ;;  %v2265_v0 = vmul.f32 %v5051_v55, %v4807_v19  ;;  %4284 = vmatmul.mubr.bf16.gmra.mxu0 %v2355_v17  ;;  %v2299_v44 = vsel %vm6426_vm3, %v2267_v10, 0.0  ;;  %v2328_v37 = vadd.f32 %v2296_v48, %v2136_v58  ;;  %v2141_v19 = vsel %vm209_vm2, %v6488_v7, 0.0 }
 0x400   : > { %4822 = vpow2.f32 %v2226_v11  ;;  %v2180_v1 = vmul.f32 0.5, %v6557_v41  ;;  %v2236_v6 = vmul.f32 1.442695, %v2182_v34  ;;  %v6576_v29 = vadd.f32 %v4254_v12, %v6375_v25  ;;  %v5055_v34 = vld [vmem:[%s5126_s24 + $0x78] sm:$0xff] }
 0x401   : > { %v4809_v38 = vpop.eup %4808  ;;  %v2084_v32 = vpop.f32.mrf.mxu1  ;;  %v2297_v14 = vsel %vm6426_vm3, %v2265_v0, 0.0  ;;  %v2331_v62 = vadd.f32 %v2299_v44, %v2139_v61 }
 0x402   : > { %v2232_v46 = vmul.f32 1.442695, %v2180_v1  ;;  %v6588_v45 = vadd.f32 %v6375_v25, %v2084_v32  ;;  %3476 = vrot.lane.b32.xlu0 %v6557_v41, %s5080_s11  ;;  %v2329_v50 = vadd.f32 %v2297_v14, %v2137_v63  ;;  %v2183_v13 = vmul.f32 0.5, %v6576_v29  ;;  %3482 = vrot.lane.b32.xlu1 %v6576_v29, %s5080_s11  ;;  %v4811_v42 = vpop.eup %4810 }
 0x403   : > { %v4257_v3 = vpop.f32.mrf.mxu1  ;;  %v2268_v51 = vmul.f32 %v5052_v30, %v4809_v38  ;;  %v2357_v40 = vpack.c.bf16 %v2331_v62, %v2330_v26  ;;  %v2270_v52 = vmul.f32 %v5054_v47, %v4811_v42  ;;  %v2143_v1 = vsel %vm209_vm2, %v6482_v22, 0.0  ;;  %v4504_v30 = vld [vmem:[%s7028_s1 + $0x178] sm:$0xff]   ;;  %v4506_v47 = vld [vmem:[%s7028_s1 + $0x168] sm:$0xff]  }
 0x404   : > { %4824 = vpow2.f32 %v2232_v46  ;;  %v2181_v23 = vmul.f32 0.5, %v6588_v45  ;;  %v6598_v28 = vadd.f32 %v4257_v3, %v6375_v25  ;;  %v2238_v58 = vmul.f32 1.442695, %v2183_v13  ;;  %v5056_v13 = vld [vmem:[%s5126_s24 + $0x80] sm:$0xff]  ;;  %4311 = vmatprep.subr.bf16.mxu1 %v4504_v30 }
 0x405   : > { %v4813_v2 = vpop.eup %4812  ;;  %4826 = vpow2.f32 %v2236_v6  ;;  %v2097_v21 = vpop.f32.mrf.mxu1  ;;  %v2356_v5 = vpack.c.bf16 %v2329_v50, %v2328_v37  ;;  %v2300_v8 = vsel %vm6426_vm3, %v2268_v51, 0.0  ;;  %v2302_v61 = vsel %vm6426_vm3, %v2270_v52, 0.0  ;;  %v5057_v37 = vld [vmem:[%s5126_s24 + $0x90] sm:$0xff]  ;;  %4312 = vmatpush3.bf16.msra.mxu1 %v4504_v30 }
 0x406   : > { %v4815_v39 = vpop.eup %4814  ;;  %v2234_v27 = vmul.f32 1.442695, %v2181_v23  ;;  %v2186_v24 = vmul.f32 0.5, %v6598_v28  ;;  %v6606_v9 = vadd.f32 %v6375_v25, %v2097_v21  ;;  %3488 = vrot.lane.b32.xlu0 %v6598_v28, %s5080_s11  ;;  %4828 = vpow2.f32 %v2238_v58  ;;  %3478 = vrot.lane.b32.xlu1 %v6588_v45, %s5080_s11  ;;  %v4505_v51 = vld [vmem:[%s7028_s1 + $0x170] sm:$0xff]   ;;  %v5058_v23 = vld [vmem:[%s5126_s24 + $0x88] sm:$0xff] }
 0x407   : > { %4287 = vmatprep.mubr.bf16.mxu0 %v2356_v5  ;;  %v4258_v4 = vpop.f32.mrf.mxu1  ;;  %v2269_v59 = vmul.f32 %v5053_v20, %v4813_v2  ;;  %v4817_v49 = vpop.eup %4816  ;;  %v2271_v17 = vmul.f32 %v5055_v34, %v4815_v39  ;;  %v2332_v55 = vadd.f32 %v2300_v8, %v2140_v60  ;;  %v2334_v14 = vadd.f32 %v2302_v61, %v6585_v15  ;;  %v5059_v2 = vld [vmem:[%s5126_s24 + $0x98] sm:$0xff] }
 0x408   : > { %4830 = vpow2.f32 %v2234_v27  ;;  %v2244_v56 = vmul.f32 1.442695, %v2186_v24  ;;  %v2184_v36 = vmul.f32 0.5, %v6606_v9  ;;  %4288 = vmatmul.mubr.bf16.gmra.mxu0 %v2357_v40  ;;  %v6621_v33 = vadd.f32 %v4258_v4, %v6375_v25  ;;  %4313 = vmatprep.subr.bf16.mxu1 %v4505_v51 }
 0x409   : > { %v2100_v10 = vpop.f32.mrf.mxu1  ;;  %v2301_v11 = vsel %vm6426_vm3, %v2269_v59, 0.0  ;;  %v4819_v63 = vpop.eup %4818  ;;  %v2303_v43 = vsel %vm6426_vm3, %v2271_v17, 0.0  ;;  %v2274_v62 = vmul.f32 %v5057_v37, %v4817_v49  ;;  %v2146_v58 = vsel %vm209_vm2, %v6501_v54, 0.0  ;;  %v5060_v17 = vld [vmem:[%s5126_s24 + $0xa0] sm:$0xff]  ;;  %4314 = vmatpush3.bf16.msra.mxu1 %v4505_v51 }
 0x40a   : > { %v2240_v7 = vmul.f32 1.442695, %v2184_v36  ;;  %v6629_v12 = vadd.f32 %v6375_v25, %v2100_v10  ;;  %3484 = vrot.lane.b32.xlu0 %v6606_v9, %s5080_s11  ;;  %v2333_v0 = vadd.f32 %v2301_v11, %v2141_v19  ;;  %4832 = vpow2.f32 %v2244_v56  ;;  %3490 = vrot.lane.b32.xlu1 %v6621_v33, %s5080_s11 }
 0x40b   : > { %v2187_v48 = vmul.f32 0.5, %v6621_v33  ;;  %v4821_v38 = vpop.eup %4820  ;;  %v2335_v50 = vadd.f32 %v2303_v43, %v2143_v1  ;;  %v2272_v3 = vmul.f32 %v5056_v13, %v4819_v63  ;;  %v2144_v21 = vsel %vm209_vm2, %v6518_v53, 0.0  ;;  %v5061_v43 = vld [vmem:[%s5126_s24 + $0xb0] sm:$0xff]  ;;  %4315 = vmatprep.subr.bf16.mxu1 %v4506_v47 }
 0x40c   : > { %4834 = vpow2.f32 %v2240_v7  ;;  %v2185_v6 = vmul.f32 0.5, %v6629_v12  ;;  %v2358_v32 = vpack.c.bf16 %v2333_v0, %v2332_v55  ;;  %v2275_v60 = vmul.f32 %v5059_v2, %v4821_v38 }
 0x40d   : > { %v4823_v22 = vpop.eup %4822  ;;  %v2246_v44 = vmul.f32 1.442695, %v2187_v48  ;;  %v4261_v46 = vpop.f32.mrf.mxu1  ;;  %v2359_v39 = vpack.c.bf16 %v2335_v50, %v2334_v14  ;;  %v2304_v54 = vsel %vm6426_vm3, %v2272_v3, 0.0  ;;  %v2147_v53 = vsel %vm209_vm2, %v6536_v57, 0.0  ;;  %v5062_v14 = vld [vmem:[%s5126_s24 + $0xa8] sm:$0xff]  ;;  %v5063_v50 = vld [vmem:[%s5126_s24 + $0xb8] sm:$0xff]  ;;  %4316 = vmatpush3.bf16.msra.mxu1 %v4506_v47 }
 0x40e   : > { %v2242_v42 = vmul.f32 1.442695, %v2185_v6  ;;  %v6652_v15 = vadd.f32 %v4261_v46, %v6375_v25  ;;  %4291 = vmatprep.mubr.bf16.mxu0 %v2358_v32  ;;  %v2273_v26 = vmul.f32 %v5058_v23, %v4823_v22  ;;  %3486 = vrot.lane.b32.xlu1 %v6629_v12, %s5080_s11  ;;  %v2306_v59 = vsel %vm6426_vm3, %v2274_v62, 0.0  ;;  %v4507_v6 = vld [vmem:[%s7028_s1 + $0x160] sm:$0xff]   ;;  %v5067_v47 = vld [vmem:[%s5126_s24 + $0xd0] sm:$0xff] }
 0x40f   : > { %4836 = vpow2.f32 %v2246_v44  ;;  %v2113_v5 = vpop.f32.mrf.mxu1  ;;  %v2307_v8 = vsel %vm6426_vm3, %v2275_v60, 0.0  ;;  %v2145_v57 = vsel %vm209_vm2, %v6541_v16, 0.0  ;;  %v2336_v10 = vadd.f32 %v2304_v54, %v2144_v21  ;;  %4317 = vmatprep.subr.bf16.mxu1 %v4507_v6 }
 0x410   : > { %4838 = vpow2.f32 %v2242_v42  ;;  %v2190_v27 = vmul.f32 0.5, %v6652_v15  ;;  %v6666_v24 = vadd.f32 %v6375_v25, %v2113_v5  ;;  %4292 = vmatmul.mubr.bf16.gmra.mxu0 %v2359_v39  ;;  %v2305_v20 = vsel %vm6426_vm3, %v2273_v26, 0.0 }
 0x411   : > { %v4825_v40 = vpop.eup %4824  ;;  %v4262_v4 = vpop.f32.mrf.mxu1  ;;  %v2337_v11 = vadd.f32 %v2305_v20, %v2145_v57  ;;  %v2339_v34 = vadd.f32 %v2307_v8, %v2147_v53  ;;  %v2338_v55 = vadd.f32 %v2306_v59, %v2146_v58  ;;  %v2148_v37 = vsel %vm209_vm2, %v6557_v41, 0.0  ;;  %v4508_v41 = vld [vmem:[%s7028_s1 + $0x158] sm:$0xff]   ;;  %v5064_v58 = vld [vmem:[%s5126_s24 + $0xc0] sm:$0xff]  ;;  %4318 = vmatpush3.bf16.msra.mxu1 %v4507_v6  ;;  %v5066_v20 = vld [vmem:[%s5126_s24 + $0xc8] sm:$0xff] }
 0x412   : > { %v4827_v52 = vpop.eup %4826  ;;  %v2252_v19 = vmul.f32 1.442695, %v2190_v27  ;;  %v2188_v56 = vmul.f32 0.5, %v6666_v24  ;;  %v6687_v36 = vadd.f32 %v4262_v4, %v6375_v25  ;;  %3492 = vrot.lane.b32.xlu0 %v6666_v24, %s5080_s11  ;;  %v2276_v61 = vmul.f32 %v5060_v17, %v4825_v40  ;;  %v5065_v53 = vld [vmem:[%s5126_s24 + $0xd8] sm:$0xff]  ;;  %4319 = vmatprep.subr.bf16.mxu1 %v4508_v41 }
 0x413   : > { %v2116_v49 = vpop.f32.mrf.mxu1  ;;  %v4829_v63 = vpop.eup %4828  ;;  %v2360_v48 = vpack.c.bf16 %v2337_v11, %v2336_v10  ;;  %v2278_v38 = vmul.f32 %v5061_v43, %v4827_v52  ;;  %v2361_v46 = vpack.c.bf16 %v2339_v34, %v2338_v55  ;;  %v2149_v62 = vsel %vm209_vm2, %v6588_v45, 0.0  ;;  %v5069_v43 = vld [vmem:[%s5126_s24 + $0xf0] sm:$0xff]  ;;  %v5070_v6 = vld [vmem:[%s5126_s24 + $0xf8] sm:$0xff] }
 0x414   : > { %v2248_v7 = vmul.f32 1.442695, %v2188_v56  ;;  %v2191_v16 = vmul.f32 0.5, %v6687_v36  ;;  %4840 = vpow2.f32 %v2252_v19  ;;  %v6694_v1 = vadd.f32 %v6375_v25, %v2116_v49 }
 0x415   : > { %v4831_v0 = vpop.eup %4830  ;;  %v2308_v25 = vsel %vm6426_vm3, %v2276_v61, 0.0  ;;  %4295 = vmatprep.mubr.bf16.mxu0 %v2360_v48  ;;  %v2279_v13 = vmul.f32 %v5063_v50, %v4829_v63  ;;  %v2151_v45 = vsel %vm209_vm2, %v6576_v29, 0.0  ;;  %v2310_v60 = vsel %vm6426_vm3, %v2278_v38, 0.0  ;;  %4320 = vmatpush3.bf16.msra.mxu1 %v4508_v41  ;;  %v4515_v41 = vld [vmem:[%s7028_s1 + $0x1a0] sm:$0xff]  }
 0x416   : > { %4842 = vpow2.f32 %v2248_v7  ;;  %v2254_v32 = vmul.f32 1.442695, %v2191_v16  ;;  %3496 = vrot.lane.b32.xlu0 %v6652_v15, %s5080_s11  ;;  %v2277_v22 = vmul.f32 %v5062_v14, %v4831_v0  ;;  %v2189_v44 = vmul.f32 0.5, %v6694_v1  ;;  %3494 = vrot.lane.b32.xlu1 %v6694_v1, %s5080_s11  ;;  %v5068_v0 = vld [vmem:[%s5126_s24 + $0xe0] sm:$0xff] }
 0x417   : > { %v4833_v3 = vpop.eup %4832  ;;  %v2340_v23 = vadd.f32 %v2308_v25, %v2148_v37  ;;  %v2311_v2 = vsel %vm6426_vm3, %v2279_v13, 0.0  ;;  %v2150_v54 = vsel %vm209_vm2, %v6551_v18, 0.0  ;;  %v2152_v19 = vsel %vm209_vm2, %v6606_v9, 0.0  ;;  %v5071_v25 = vld [vmem:[%s5126_s24 + $0xe8] sm:$0xff]  ;;  %s6959_s24 = scalar_lea.vmem %s7030_s3, %s3626_s21 }
 0x418   : > { %4844 = vpow2.f32 %v2254_v32  ;;  %v2309_v30 = vsel %vm6426_vm3, %v2277_v22, 0.0  ;;  %v2250_v42 = vmul.f32 1.442695, %v2189_v44  ;;  %4296 = vmatmul.mubr.bf16.gmra.mxu0 %v2361_v46  ;;  %v2343_v39 = vadd.f32 %v2311_v2, %v2151_v45  ;;  %v4514_v2 = vld [vmem:[%s7028_s1 + $0x1a8] sm:$0xff]   ;;  %v4516_v45 = vld [vmem:[%s7028_s1 + $0x198] sm:$0xff]  }
 0x419   : > { %v4835_v51 = vpop.eup %4834  ;;  %v2341_v26 = vadd.f32 %v2309_v30, %v2149_v62  ;;  %v2342_v40 = vadd.f32 %v2310_v60, %v2150_v54  ;;  %v2282_v52 = vmul.f32 %v5067_v47, %v4833_v3  ;;  %v2153_v18 = vsel %vm209_vm2, %v6629_v12, 0.0 }
 0x41a   : > { %v2280_v21 = vmul.f32 %v5064_v58, %v4835_v51  ;;  %4846 = vpow2.f32 %v2250_v42  ;;  %3498 = vrot.lane.b32.xlu1 %v6687_v36, %s5080_s11  ;;  %v2155_v9 = vsel %vm209_vm2, %v6621_v33, 0.0  ;;  %v2154_v7 = vsel %vm209_vm2, %v6598_v28, 0.0  ;;  %v6807_v58 = vld [vmem:[%s7029_s2 + $0x4] ss:$0 sm:$0xff] }
 0x41b   : > { %v2362_v5 = vpack.c.bf16 %v2341_v26, %v2340_v23  ;;  %v2363_v57 = vpack.c.bf16 %v2343_v39, %v2342_v40  ;;  %v2314_v12 = vsel %vm6426_vm3, %v2282_v52, 0.0  ;;  %v2159_v46 = vsel %vm209_vm2, %v6687_v36, 0.0 }
 0x41c   : > { %v4837_v27 = vpop.eup %4836  ;;  %v2312_v8 = vsel %vm6426_vm3, %v2280_v21, 0.0  ;;  %v2346_v55 = vadd.f32 %v2314_v12, %v2154_v7  ;;  %v2156_v13 = vsel %vm209_vm2, %v6666_v24, 0.0  ;;  %v2157_v3 = vsel %vm209_vm2, %v6694_v1, 0.0  ;;  %v4509_v24 = vld [vmem:[%s7028_s1 + $0x150] sm:$0xff]  }
 0x41d   : > { %v4839_v29 = vpop.eup %4838  ;;  %4299 = vmatprep.mubr.bf16.mxu0 %v2362_v5  ;;  %v2283_v4 = vmul.f32 %v5065_v53, %v4837_v27  ;;  %v2344_v10 = vadd.f32 %v2312_v8, %v2152_v19  ;;  %v2158_v30 = vsel %vm209_vm2, %v6652_v15, 0.0  ;;  %4321 = vmatprep.subr.bf16.mxu1 %v4509_v24  ;;  %v4512_v15 = vld [vmem:[%s7028_s1 + $0x1b8] sm:$0xff]   ;;  %v4513_v1 = vld [vmem:[%s7028_s1 + $0x1b0] sm:$0xff]  }
 0x41e   : > { %v2281_v59 = vmul.f32 %v5066_v20, %v4839_v29  ;;  %4322 = vmatpush3.bf16.msra.mxu1 %v4509_v24  ;;  %4359 = vmatprep.subr.bf16.mxu0 %v4512_v15 }
 0x41f   : > { %v2315_v49 = vsel %vm6426_vm3, %v2283_v4, 0.0  ;;  %4323 = vmatprep.subr.bf16.mxu1 %v4510_v31  ;;  %4360 = vmatpush3.bf16.msra.mxu0 %v4512_v15 }
 0x420   : > { %v2313_v56 = vsel %vm6426_vm3, %v2281_v59, 0.0  ;;  %4300 = vmatmul.mubr.bf16.gmra.mxu0 %v2363_v57  ;;  %v2347_v63 = vadd.f32 %v2315_v49, %v2155_v9  ;;  %4361 = vmatprep.subr.bf16.mxu0 %v4513_v1 }
 0x421   : > { %v2345_v11 = vadd.f32 %v2313_v56, %v2153_v18  ;;  %v4841_v34 = vpop.eup %4840 }
 0x422   : > { %v2286_v38 = vmul.f32 %v5069_v43, %v4841_v34  ;;  %v2365_v32 = vpack.c.bf16 %v2347_v63, %v2346_v55  ;;  %4324 = vmatpush3.bf16.msra.mxu1 %v4510_v31 }
 0x423   : > { %v4843_v17 = vpop.eup %4842  ;;  %v2364_v61 = vpack.c.bf16 %v2345_v11, %v2344_v10  ;;  %4325 = vmatprep.subr.bf16.mxu1 %v4511_v35  ;;  %4362 = vmatpush3.bf16.msra.mxu0 %v4513_v1 }
 0x424   : > { %v2284_v48 = vmul.f32 %v5068_v0, %v4843_v17  ;;  %v2318_v50 = vsel %vm6426_vm3, %v2286_v38, 0.0  ;;  %4363 = vmatprep.subr.bf16.mxu0 %v4514_v2 }
 0x425   : > { %v4845_v16 = vpop.eup %4844  ;;  %4303 = vmatprep.mubr.bf16.mxu0 %v2364_v61  ;;  %v2350_v42 = vadd.f32 %v2318_v50, %v2158_v30 }
 0x426   : > { %v2287_v33 = vmul.f32 %v5070_v6, %v4845_v16  ;;  %v2316_v28 = vsel %vm6426_vm3, %v2284_v48, 0.0  ;;  %4326 = vmatpush3.bf16.msra.mxu1 %v4511_v35 }
 0x427   : > { %v4847_v14 = vpop.eup %4846  ;;  %v2348_v36 = vadd.f32 %v2316_v28, %v2156_v13  ;;  %4364 = vmatpush3.bf16.msra.mxu0 %v4514_v2 }
 0x428   : > { %v2319_v22 = vsel %vm6426_vm3, %v2287_v33, 0.0  ;;  %4304 = vmatmul.mubr.bf16.gmra.mxu0 %v2365_v32  ;;  %v2285_v44 = vmul.f32 %v5071_v25, %v4847_v14  ;;  %4365 = vmatprep.subr.bf16.mxu0 %v4515_v41 }
 0x429   : > { %v2351_v62 = vadd.f32 %v2319_v22, %v2159_v46 }
 0x42a   : > { %v2317_v37 = vsel %vm6426_vm3, %v2285_v44, 0.0 }
 0x42b   : > { %v2349_v51 = vadd.f32 %v2317_v37, %v2157_v3  ;;  %v2367_v26 = vpack.c.bf16 %v2351_v62, %v2350_v42  ;;  %4366 = vmatpush3.bf16.msra.mxu0 %v4515_v41 }
 0x42c   : > { %4367 = vmatprep.subr.bf16.mxu0 %v4516_v45 }
 0x42d   : > { %v2366_v23 = vpack.c.bf16 %v2349_v51, %v2348_v36 }
 0x42f   : > { %4307 = vmatprep.mubr.bf16.mxu0 %v2366_v23  ;;  %4368 = vmatpush3.bf16.msra.mxu0 %v4516_v45 }
 0x430   : > { %4308 = vmatmul.mubr.bf16.gmra.mxu0 %v2367_v26 }
 0x4af   : > { %v4281_v60 = vpop.f32.mrf.mxu0 }
 0x4b0   : > { %v2481_v54 = vadd.f32 %v4281_v60, %v6807_v58 }
 0x4b1   : > { %v2472_v21 = vpop.f32.mrf.mxu0 }
 0x4b2   : > { %v2473_v5 = vadd.f32 %v6807_v58, %v2472_v21 }
 0x4b3   : > { %v4282_v39 = vpop.f32.mrf.mxu0 }
 0x4b4   : > { %v2484_v27 = vadd.f32 %v4282_v39, %v6807_v58  ;;  %4848 = vtanh.f32 %v2473_v5 }
 0x4b5   : > { %v2475_v29 = vpop.f32.mrf.mxu0 }
 0x4b6   : > { %v2476_v40 = vadd.f32 %v6807_v58, %v2475_v29  ;;  %4850 = vtanh.f32 %v2484_v27 }
 0x4b8   : > { %4852 = vtanh.f32 %v2476_v40 }
 0x4b9   : > { %4854 = vtanh.f32 %v2481_v54 }
 0x4bf   : > { %v4285_v53 = vpop.f32.mrf.mxu0 }
 0x4c0   : > { %v2497_v19 = vadd.f32 %v4285_v53, %v6807_v58 }
 0x4c1   : > { %v2488_v4 = vpop.f32.mrf.mxu0  ;;  %v4849_v59 = vpop.eup %4848 }
 0x4c2   : > { %v2489_v20 = vadd.f32 %v6807_v58, %v2488_v4 }
 0x4c3   : > { %v4286_v8 = vpop.f32.mrf.mxu0  ;;  %v4851_v47 = vpop.eup %4850 }
 0x4c4   : > { %v2500_v52 = vadd.f32 %v4286_v8, %v6807_v58  ;;  %4856 = vtanh.f32 %v2489_v20 }
 0x4c5   : > { %v4853_v57 = vpop.eup %4852  ;;  %v2491_v18 = vpop.f32.mrf.mxu0 }
 0x4c6   : > { %v4855_v56 = vpop.eup %4854  ;;  %v2492_v49 = vadd.f32 %v6807_v58, %v2491_v18  ;;  %v2631_v10 = vpack.c.bf16 %v4853_v57, %v4849_v59  ;;  %4858 = vtanh.f32 %v2500_v52 }
 0x4c7   : > { %v2632_v34 = vpack.c.bf16 %v4851_v47, %v4855_v56 }
 0x4c8   : > { %v4289_v11 = vpop.f32.mrf.mxu0  ;;  %4860 = vtanh.f32 %v2492_v49  ;;  %4327 = vmatprep.mubr.bf16.mxu1 %v2631_v10 }
 0x4c9   : > { %4862 = vtanh.f32 %v2497_v19  ;;  %4328 = vmatmul.mubr.bf16.vlgmr.msra.gmra.mxu1 %v2632_v34  ;;  %v2513_v63 = vadd.f32 %v4289_v11, %v6807_v58 }
 0x4ca   : > { %v2504_v9 = vpop.f32.mrf.mxu0 }
 0x4cb   : > { %v2505_v12 = vadd.f32 %v6807_v58, %v2504_v9 }
 0x4cc   : > { %v4290_v17 = vpop.f32.mrf.mxu0 }
 0x4cd   : > { %v2516_v61 = vadd.f32 %v4290_v17, %v6807_v58  ;;  %4864 = vtanh.f32 %v2505_v12 }
 0x4ce   : > { %v2507_v7 = vpop.f32.mrf.mxu0 }
 0x4cf   : > { %v2508_v16 = vadd.f32 %v6807_v58, %v2507_v7  ;;  %4866 = vtanh.f32 %v2516_v61 }
 0x4d0   : > { %v4293_v55 = vpop.f32.mrf.mxu0 }
 0x4d1   : > { %4868 = vtanh.f32 %v2508_v16  ;;  %v4857_v48 = vpop.eup %4856  ;;  %v2529_v22 = vadd.f32 %v4293_v55, %v6807_v58 }
 0x4d2   : > { %4870 = vtanh.f32 %v2513_v63  ;;  %v2520_v0 = vpop.f32.mrf.mxu0 }
 0x4d3   : > { %v2521_v43 = vadd.f32 %v6807_v58, %v2520_v0  ;;  %v4859_v38 = vpop.eup %4858 }
 0x4d4   : > { %v4294_v6 = vpop.f32.mrf.mxu0 }
 0x4d5   : > { %v4861_v33 = vpop.eup %4860  ;;  %v2532_v32 = vadd.f32 %v4294_v6, %v6807_v58  ;;  %4872 = vtanh.f32 %v2521_v43 }
 0x4d6   : > { %v4863_v14 = vpop.eup %4862  ;;  %v2523_v25 = vpop.f32.mrf.mxu0  ;;  %v2633_v44 = vpack.c.bf16 %v4861_v33, %v4857_v48 }
 0x4d7   : > { %v2524_v28 = vadd.f32 %v6807_v58, %v2523_v25  ;;  %v2634_v46 = vpack.c.bf16 %v4859_v38, %v4863_v14  ;;  %4874 = vtanh.f32 %v2532_v32 }
 0x4d8   : > { %v4297_v50 = vpop.f32.mrf.mxu0  ;;  %4331 = vmatprep.mubr.bf16.mxu1 %v2633_v44 }
 0x4d9   : > { %4876 = vtanh.f32 %v2524_v28  ;;  %4332 = vmatmul.mubr.bf16.gmra.mxu1 %v2634_v46  ;;  %v2545_v23 = vadd.f32 %v4297_v50, %v6807_v58 }
 0x4da   : > { %4878 = vtanh.f32 %v2529_v22  ;;  %v2536_v13 = vpop.f32.mrf.mxu0  ;;  %v4865_v3 = vpop.eup %4864 }
 0x4db   : > { %v2537_v37 = vadd.f32 %v6807_v58, %v2536_v13 }
 0x4dc   : > { %v4867_v62 = vpop.eup %4866  ;;  %v4298_v30 = vpop.f32.mrf.mxu0 }
 0x4dd   : > { %v2548_v51 = vadd.f32 %v4298_v30, %v6807_v58  ;;  %4880 = vtanh.f32 %v2537_v37  ;;  %v4518_v30 = vld [vmem:[%s7028_s1 + $0x188] sm:$0xff]  }
 0x4de   : > { %v4869_v36 = vpop.eup %4868  ;;  %v2539_v26 = vpop.f32.mrf.mxu0 }
 0x4df   : > { %v4871_v42 = vpop.eup %4870  ;;  %v2635_v24 = vpack.c.bf16 %v4869_v36, %v4865_v3  ;;  %v2540_v31 = vadd.f32 %v6807_v58, %v2539_v26  ;;  %4882 = vtanh.f32 %v2548_v51  ;;  %v4519_v36 = vld [vmem:[%s7028_s1 + $0x180] sm:$0xff]   ;;  %v4520_v51 = vld [vmem:[%s7028_s1 + $0x1f8] sm:$0xff]  }
 0x4e0   : > { %v2636_v35 = vpack.c.bf16 %v4867_v62, %v4871_v42  ;;  %v4301_v15 = vpop.f32.mrf.mxu0  ;;  %v4517_v62 = vld [vmem:[%s7028_s1 + $0x190] sm:$0xff]   ;;  %4407 = vmatprep.subr.bf16.mxu1 %v4520_v51  ;;  %v4523_v26 = vld [vmem:[%s7028_s1 + $0x1e0] sm:$0xff]  }
 0x4e1   : > { %4335 = vmatprep.mubr.bf16.mxu1 %v2635_v24  ;;  %4884 = vtanh.f32 %v2540_v31  ;;  %v2561_v39 = vadd.f32 %v4301_v15, %v6807_v58  ;;  %4369 = vmatprep.subr.bf16.mxu0 %v4517_v62  ;;  %v4521_v42 = vld [vmem:[%s7028_s1 + $0x1f0] sm:$0xff]   ;;  %v4524_v24 = vld [vmem:[%s7028_s1 + $0x1d8] sm:$0xff]  }
 0x4e2   : > { %4336 = vmatmul.mubr.bf16.gmra.mxu1 %v2636_v35  ;;  %4886 = vtanh.f32 %v2545_v23  ;;  %v2552_v1 = vpop.f32.mrf.mxu0  ;;  %v4873_v41 = vpop.eup %4872  ;;  %4370 = vmatpush3.bf16.msra.mxu0 %v4517_v62  ;;  %v4522_v23 = vld [vmem:[%s7028_s1 + $0x1e8] sm:$0xff]   ;;  %v6868_v35 = vld [vmem:[%s7029_s2 + $0x5] ss:$0 sm:$0xff] }
 0x4e3   : > { %v2553_v2 = vadd.f32 %v6807_v58, %v2552_v1  ;;  %4371 = vmatprep.subr.bf16.mxu0 %v4518_v30  ;;  %4408 = vmatpush3.bf16.msra.mxu1 %v4520_v51 }
 0x4e4   : > { %v4302_v45 = vpop.f32.mrf.mxu0  ;;  %v4875_v60 = vpop.eup %4874  ;;  %4409 = vmatprep.subr.bf16.mxu1 %v4521_v42 }
 0x4e5   : > { %v2564_v21 = vadd.f32 %v4302_v45, %v6807_v58  ;;  %4888 = vtanh.f32 %v2553_v2 }
 0x4e6   : > { %v4877_v5 = vpop.eup %4876  ;;  %v2555_v27 = vpop.f32.mrf.mxu0  ;;  %4372 = vmatpush3.bf16.msra.mxu0 %v4518_v30 }
 0x4e7   : > { %v4879_v54 = vpop.eup %4878  ;;  %v2556_v29 = vadd.f32 %v6807_v58, %v2555_v27  ;;  %v2637_v40 = vpack.c.bf16 %v4877_v5, %v4873_v41  ;;  %4890 = vtanh.f32 %v2564_v21  ;;  %4373 = vmatprep.subr.bf16.mxu0 %v4519_v36  ;;  %4410 = vmatpush3.bf16.msra.mxu1 %v4521_v42 }
 0x4e8   : > { %v4305_v53 = vpop.f32.mrf.mxu0  ;;  %v2638_v4 = vpack.c.bf16 %v4875_v60, %v4879_v54  ;;  %4411 = vmatprep.subr.bf16.mxu1 %v4522_v23 }
 0x4e9   : > { %4892 = vtanh.f32 %v2556_v29  ;;  %4339 = vmatprep.mubr.bf16.mxu1 %v2637_v40  ;;  %v2577_v18 = vadd.f32 %v4305_v53, %v6807_v58 }
 0x4ea   : > { %4894 = vtanh.f32 %v2561_v39  ;;  %v2568_v20 = vpop.f32.mrf.mxu0  ;;  %4340 = vmatmul.mubr.bf16.gmra.mxu1 %v2638_v4  ;;  %v4881_v8 = vpop.eup %4880  ;;  %4374 = vmatpush3.bf16.msra.mxu0 %v4519_v36 }
 0x4eb   : > { %v2569_v59 = vadd.f32 %v6807_v58, %v2568_v20  ;;  %4412 = vmatpush3.bf16.msra.mxu1 %v4522_v23 }
 0x4ec   : > { %v4306_v47 = vpop.f32.mrf.mxu0  ;;  %v4883_v52 = vpop.eup %4882  ;;  %4413 = vmatprep.subr.bf16.mxu1 %v4523_v26 }
 0x4ed   : > { %v2580_v57 = vadd.f32 %v4306_v47, %v6807_v58  ;;  %4896 = vtanh.f32 %v2569_v59 }
 0x4ee   : > { %v4885_v19 = vpop.eup %4884  ;;  %v2571_v56 = vpop.f32.mrf.mxu0 }
 0x4ef   : > { %v4887_v49 = vpop.eup %4886  ;;  %v2572_v10 = vadd.f32 %v6807_v58, %v2571_v56  ;;  %v2639_v11 = vpack.c.bf16 %v4885_v19, %v4881_v8  ;;  %4898 = vtanh.f32 %v2580_v57  ;;  %4414 = vmatpush3.bf16.msra.mxu1 %v4523_v26 }
 0x4f0   : > { %v4309_v34 = vpop.f32.mrf.mxu0  ;;  %v2640_v9 = vpack.c.bf16 %v4883_v52, %v4887_v49  ;;  %4415 = vmatprep.subr.bf16.mxu1 %v4524_v24 }
 0x4f1   : > { %4900 = vtanh.f32 %v2572_v10  ;;  %4343 = vmatprep.mubr.bf16.mxu1 %v2639_v11  ;;  %v2593_v0 = vadd.f32 %v4309_v34, %v6807_v58 }
 0x4f2   : > { %4902 = vtanh.f32 %v2577_v18  ;;  %v2584_v12 = vpop.f32.mrf.mxu0  ;;  %4344 = vmatmul.mubr.bf16.gmra.mxu1 %v2640_v9  ;;  %v4889_v61 = vpop.eup %4888 }
 0x4f3   : > { %v2585_v17 = vadd.f32 %v6807_v58, %v2584_v12  ;;  %4416 = vmatpush3.bf16.msra.mxu1 %v4524_v24 }
 0x4f4   : > { %v4310_v63 = vpop.f32.mrf.mxu0  ;;  %v4891_v7 = vpop.eup %4890 }
 0x4f5   : > { %v2596_v16 = vadd.f32 %v4310_v63, %v6807_v58  ;;  %4904 = vtanh.f32 %v2585_v17 }
 0x4f6   : > { %v4893_v55 = vpop.eup %4892  ;;  %v2587_v48 = vpop.f32.mrf.mxu0 }
 0x4f7   : > { %v4895_v43 = vpop.eup %4894  ;;  %v2588_v38 = vadd.f32 %v6807_v58, %v2587_v48  ;;  %v2641_v6 = vpack.c.bf16 %v4893_v55, %v4889_v61  ;;  %4906 = vtanh.f32 %v2596_v16 }
 0x4f8   : > { %v2642_v33 = vpack.c.bf16 %v4891_v7, %v4895_v43 }
 0x4f9   : > { %4908 = vtanh.f32 %v2588_v38  ;;  %4347 = vmatprep.mubr.bf16.mxu1 %v2641_v6 }
 0x4fa   : > { %4910 = vtanh.f32 %v2593_v0  ;;  %4348 = vmatmul.mubr.bf16.gmra.mxu1 %v2642_v33  ;;  %v4897_v32 = vpop.eup %4896 }
 0x4fc   : > { %v4899_v14 = vpop.eup %4898 }
 0x4fe   : > { %v4901_v22 = vpop.eup %4900 }
 0x4ff   : > { %v4903_v25 = vpop.eup %4902  ;;  %v2643_v44 = vpack.c.bf16 %v4901_v22, %v4897_v32 }
 0x500   : > { %v2644_v28 = vpack.c.bf16 %v4899_v14, %v4903_v25 }
 0x501   : > { %4351 = vmatprep.mubr.bf16.mxu1 %v2643_v44 }
 0x502   : > { %4352 = vmatmul.mubr.bf16.gmra.mxu1 %v2644_v28  ;;  %v4905_v46 = vpop.eup %4904 }
 0x504   : > { %v4907_v50 = vpop.eup %4906 }
 0x506   : > { %v4909_v13 = vpop.eup %4908 }
 0x507   : > { %v4911_v3 = vpop.eup %4910  ;;  %v2645_v58 = vpack.c.bf16 %v4909_v13, %v4905_v46 }
 0x508   : > { %v2646_v37 = vpack.c.bf16 %v4907_v50, %v4911_v3 }
 0x509   : > { %4355 = vmatprep.mubr.bf16.mxu1 %v2645_v58 }
 0x50a   : > { %4356 = vmatmul.mubr.bf16.gmra.mxu1 %v2646_v37 }
 0x589   : > { %v4329_v31 = vpop.f32.mrf.mxu1 }
 0x58a   : > { %v2760_v45 = vadd.f32 %v4329_v31, %v6868_v35 }
 0x58b   : > { %v2751_v15 = vpop.f32.mrf.mxu1 }
 0x58c   : > { %v2752_v1 = vadd.f32 %v6868_v35, %v2751_v15 }
 0x58d   : > { %v4330_v2 = vpop.f32.mrf.mxu1 }
 0x58e   : > { %v2763_v41 = vadd.f32 %v4330_v2, %v6868_v35  ;;  %4912 = vtanh.f32 %v2752_v1 }
 0x58f   : > { %v2754_v60 = vpop.f32.mrf.mxu1 }
 0x590   : > { %v2755_v21 = vadd.f32 %v6868_v35, %v2754_v60  ;;  %4914 = vtanh.f32 %v2763_v41 }
 0x592   : > { %4916 = vtanh.f32 %v2755_v21 }
 0x593   : > { %4918 = vtanh.f32 %v2760_v45 }
 0x599   : > { %v4333_v5 = vpop.f32.mrf.mxu1 }
 0x59a   : > { %v2776_v20 = vadd.f32 %v4333_v5, %v6868_v35 }
 0x59b   : > { %v2767_v39 = vpop.f32.mrf.mxu1  ;;  %v4913_v54 = vpop.eup %4912 }
 0x59c   : > { %v2768_v27 = vadd.f32 %v6868_v35, %v2767_v39 }
 0x59d   : > { %v4334_v29 = vpop.f32.mrf.mxu1  ;;  %v4915_v40 = vpop.eup %4914 }
 0x59e   : > { %v2779_v53 = vadd.f32 %v4334_v29, %v6868_v35  ;;  %4920 = vtanh.f32 %v2768_v27 }
 0x59f   : > { %v4917_v4 = vpop.eup %4916  ;;  %v2770_v59 = vpop.f32.mrf.mxu1 }
 0x5a0   : > { %v4919_v8 = vpop.eup %4918  ;;  %v2771_v47 = vadd.f32 %v6868_v35, %v2770_v59  ;;  %v2910_v52 = vpack.c.bf16 %v4917_v4, %v4913_v54  ;;  %4922 = vtanh.f32 %v2779_v53 }
 0x5a1   : > { %v2911_v19 = vpack.c.bf16 %v4915_v40, %v4919_v8 }
 0x5a2   : > { %v4337_v57 = vpop.f32.mrf.mxu1  ;;  %4924 = vtanh.f32 %v2771_v47  ;;  %4375 = vmatprep.mubr.bf16.mxu0 %v2910_v52 }
 0x5a3   : > { %4926 = vtanh.f32 %v2776_v20  ;;  %4376 = vmatmul.mubr.bf16.vlgmr.msra.gmra.mxu0 %v2911_v19  ;;  %v2792_v11 = vadd.f32 %v4337_v57, %v6868_v35 }
 0x5a4   : > { %v2783_v18 = vpop.f32.mrf.mxu1 }
 0x5a5   : > { %v2784_v56 = vadd.f32 %v6868_v35, %v2783_v18 }
 0x5a6   : > { %v4338_v49 = vpop.f32.mrf.mxu1 }
 0x5a7   : > { %v2795_v10 = vadd.f32 %v4338_v49, %v6868_v35  ;;  %4928 = vtanh.f32 %v2784_v56 }
 0x5a8   : > { %v2786_v34 = vpop.f32.mrf.mxu1 }
 0x5a9   : > { %v2787_v9 = vadd.f32 %v6868_v35, %v2786_v34  ;;  %4930 = vtanh.f32 %v2795_v10 }
 0x5aa   : > { %v4341_v12 = vpop.f32.mrf.mxu1 }
 0x5ab   : > { %4932 = vtanh.f32 %v2787_v9  ;;  %v4921_v61 = vpop.eup %4920  ;;  %v2808_v43 = vadd.f32 %v4341_v12, %v6868_v35 }
 0x5ac   : > { %4934 = vtanh.f32 %v2792_v11  ;;  %v2799_v17 = vpop.f32.mrf.mxu1 }
 0x5ad   : > { %v2800_v63 = vadd.f32 %v6868_v35, %v2799_v17  ;;  %v4923_v7 = vpop.eup %4922 }
 0x5ae   : > { %v4342_v16 = vpop.f32.mrf.mxu1 }
 0x5af   : > { %v4925_v55 = vpop.eup %4924  ;;  %v2811_v0 = vadd.f32 %v4342_v16, %v6868_v35  ;;  %4936 = vtanh.f32 %v2800_v63 }
 0x5b0   : > { %v4927_v48 = vpop.eup %4926  ;;  %v2802_v38 = vpop.f32.mrf.mxu1  ;;  %v2912_v6 = vpack.c.bf16 %v4925_v55, %v4921_v61 }
 0x5b1   : > { %v2803_v33 = vadd.f32 %v6868_v35, %v2802_v38  ;;  %v2913_v32 = vpack.c.bf16 %v4923_v7, %v4927_v48  ;;  %4938 = vtanh.f32 %v2811_v0 }
 0x5b2   : > { %v4345_v14 = vpop.f32.mrf.mxu1  ;;  %4379 = vmatprep.mubr.bf16.mxu0 %v2912_v6 }
 0x5b3   : > { %4940 = vtanh.f32 %v2803_v33  ;;  %4380 = vmatmul.mubr.bf16.gmra.mxu0 %v2913_v32  ;;  %v2824_v58 = vadd.f32 %v4345_v14, %v6868_v35 }
 0x5b4   : > { %4942 = vtanh.f32 %v2808_v43  ;;  %v2815_v22 = vpop.f32.mrf.mxu1  ;;  %v4929_v25 = vpop.eup %4928 }
 0x5b5   : > { %v2816_v44 = vadd.f32 %v6868_v35, %v2815_v22 }
 0x5b6   : > { %v4931_v28 = vpop.eup %4930  ;;  %v4346_v46 = vpop.f32.mrf.mxu1 }
 0x5b7   : > { %v2827_v13 = vadd.f32 %v4346_v46, %v6868_v35  ;;  %4944 = vtanh.f32 %v2816_v44  ;;  %v4526_v46 = vld [vmem:[%s7028_s1 + $0x1c8] sm:$0xff]  }
 0x5b8   : > { %v4933_v50 = vpop.eup %4932  ;;  %v2818_v37 = vpop.f32.mrf.mxu1 }
 0x5b9   : > { %v4935_v3 = vpop.eup %4934  ;;  %v2914_v62 = vpack.c.bf16 %v4933_v50, %v4929_v25  ;;  %v2819_v30 = vadd.f32 %v6868_v35, %v2818_v37  ;;  %4946 = vtanh.f32 %v2827_v13  ;;  %v4527_v50 = vld [vmem:[%s7028_s1 + $0x1c0] sm:$0xff]  }
 0x5ba   : > { %v2915_v36 = vpack.c.bf16 %v4931_v28, %v4935_v3  ;;  %v4349_v51 = vpop.f32.mrf.mxu1  ;;  %v4525_v28 = vld [vmem:[%s7028_s1 + $0x1d0] sm:$0xff]   ;;  %v6914_v3 = vld [vmem:[%s7029_s2 + $0x6] ss:$0 sm:$0xff] }
 0x5bb   : > { %4383 = vmatprep.mubr.bf16.mxu0 %v2914_v62  ;;  %4948 = vtanh.f32 %v2819_v30  ;;  %v2840_v2 = vadd.f32 %v4349_v51, %v6868_v35  ;;  %4417 = vmatprep.subr.bf16.mxu1 %v4525_v28 }
 0x5bc   : > { %4384 = vmatmul.mubr.bf16.gmra.mxu0 %v2915_v36  ;;  %4950 = vtanh.f32 %v2824_v58  ;;  %v2831_v42 = vpop.f32.mrf.mxu1  ;;  %v4937_v26 = vpop.eup %4936  ;;  %4418 = vmatpush3.bf16.msra.mxu1 %v4525_v28 }
 0x5bd   : > { %v2832_v23 = vadd.f32 %v6868_v35, %v2831_v42  ;;  %4419 = vmatprep.subr.bf16.mxu1 %v4526_v46 }
 0x5be   : > { %v4350_v24 = vpop.f32.mrf.mxu1  ;;  %v4939_v31 = vpop.eup %4938 }
 0x5bf   : > { %v2843_v15 = vadd.f32 %v4350_v24, %v6868_v35  ;;  %4952 = vtanh.f32 %v2832_v23 }
 0x5c0   : > { %v4941_v1 = vpop.eup %4940  ;;  %v2834_v41 = vpop.f32.mrf.mxu1  ;;  %4420 = vmatpush3.bf16.msra.mxu1 %v4526_v46 }
 0x5c1   : > { %v4943_v45 = vpop.eup %4942  ;;  %v2835_v60 = vadd.f32 %v6868_v35, %v2834_v41  ;;  %v2916_v21 = vpack.c.bf16 %v4941_v1, %v4937_v26  ;;  %4954 = vtanh.f32 %v2843_v15  ;;  %4421 = vmatprep.subr.bf16.mxu1 %v4527_v50 }
 0x5c2   : > { %v4353_v5 = vpop.f32.mrf.mxu1  ;;  %v2917_v39 = vpack.c.bf16 %v4939_v31, %v4943_v45 }
 0x5c3   : > { %4956 = vtanh.f32 %v2835_v60  ;;  %4387 = vmatprep.mubr.bf16.mxu0 %v2916_v21  ;;  %v2856_v59 = vadd.f32 %v4353_v5, %v6868_v35 }
 0x5c4   : > { %4958 = vtanh.f32 %v2840_v2  ;;  %v2847_v27 = vpop.f32.mrf.mxu1  ;;  %4388 = vmatmul.mubr.bf16.gmra.mxu0 %v2917_v39  ;;  %v4945_v29 = vpop.eup %4944  ;;  %4422 = vmatpush3.bf16.msra.mxu1 %v4527_v50 }
 0x5c5   : > { %v2848_v54 = vadd.f32 %v6868_v35, %v2847_v27 }
 0x5c6   : > { %v4354_v40 = vpop.f32.mrf.mxu1  ;;  %v4947_v53 = vpop.eup %4946 }
 0x5c7   : > { %v2859_v4 = vadd.f32 %v4354_v40, %v6868_v35  ;;  %4960 = vtanh.f32 %v2848_v54 }
 0x5c8   : > { %v4949_v20 = vpop.eup %4948  ;;  %v2850_v8 = vpop.f32.mrf.mxu1 }
 0x5c9   : > { %v4951_v47 = vpop.eup %4950  ;;  %v2851_v52 = vadd.f32 %v6868_v35, %v2850_v8  ;;  %v2918_v57 = vpack.c.bf16 %v4949_v20, %v4945_v29  ;;  %4962 = vtanh.f32 %v2859_v4 }
 0x5ca   : > { %v4357_v19 = vpop.f32.mrf.mxu1  ;;  %v2919_v18 = vpack.c.bf16 %v4947_v53, %v4951_v47 }
 0x5cb   : > { %4964 = vtanh.f32 %v2851_v52  ;;  %4391 = vmatprep.mubr.bf16.mxu0 %v2918_v57  ;;  %v2872_v17 = vadd.f32 %v4357_v19, %v6868_v35 }
 0x5cc   : > { %4966 = vtanh.f32 %v2856_v59  ;;  %v2863_v56 = vpop.f32.mrf.mxu1  ;;  %4392 = vmatmul.mubr.bf16.gmra.mxu0 %v2919_v18  ;;  %v4953_v10 = vpop.eup %4952 }
 0x5cd   : > { %v2864_v49 = vadd.f32 %v6868_v35, %v2863_v56 }
 0x5ce   : > { %v4358_v11 = vpop.f32.mrf.mxu1  ;;  %v4955_v34 = vpop.eup %4954 }
 0x5cf   : > { %v2875_v9 = vadd.f32 %v4358_v11, %v6868_v35  ;;  %4968 = vtanh.f32 %v2864_v49 }
 0x5d0   : > { %v4957_v12 = vpop.eup %4956  ;;  %v2866_v61 = vpop.f32.mrf.mxu1 }
 0x5d1   : > { %v4959_v63 = vpop.eup %4958  ;;  %v2867_v7 = vadd.f32 %v6868_v35, %v2866_v61  ;;  %v2920_v16 = vpack.c.bf16 %v4957_v12, %v4953_v10  ;;  %4970 = vtanh.f32 %v2875_v9 }
 0x5d2   : > { %v2921_v55 = vpack.c.bf16 %v4955_v34, %v4959_v63 }
 0x5d3   : > { %4972 = vtanh.f32 %v2867_v7  ;;  %4395 = vmatprep.mubr.bf16.mxu0 %v2920_v16 }
 0x5d4   : > { %4974 = vtanh.f32 %v2872_v17  ;;  %4396 = vmatmul.mubr.bf16.gmra.mxu0 %v2921_v55  ;;  %v4961_v0 = vpop.eup %4960 }
 0x5d6   : > { %v4963_v48 = vpop.eup %4962 }
 0x5d8   : > { %v4965_v43 = vpop.eup %4964 }
 0x5d9   : > { %v4967_v38 = vpop.eup %4966  ;;  %v2922_v6 = vpack.c.bf16 %v4965_v43, %v4961_v0 }
 0x5da   : > { %v2923_v33 = vpack.c.bf16 %v4963_v48, %v4967_v38 }
 0x5db   : > { %4399 = vmatprep.mubr.bf16.mxu0 %v2922_v6 }
 0x5dc   : > { %4400 = vmatmul.mubr.bf16.gmra.mxu0 %v2923_v33  ;;  %v4969_v32 = vpop.eup %4968 }
 0x5de   : > { %v4971_v14 = vpop.eup %4970 }
 0x5e0   : > { %v4973_v22 = vpop.eup %4972 }
 0x5e1   : > { %v4975_v25 = vpop.eup %4974  ;;  %v2924_v35 = vpack.c.bf16 %v4973_v22, %v4969_v32 }
 0x5e2   : > { %v2925_v44 = vpack.c.bf16 %v4971_v14, %v4975_v25 }
 0x5e3   : > { %4403 = vmatprep.mubr.bf16.mxu0 %v2924_v35 }
 0x5e4   : > { %4404 = vmatmul.mubr.bf16.gmra.mxu0 %v2925_v44 }
 0x663   : > { %v4377_v13 = vpop.f32.mrf.mxu0 }
 0x664   : > { %v3039_v36 = vadd.f32 %v4377_v13, %v6914_v3 }
 0x665   : > { %v3030_v58 = vpop.f32.mrf.mxu0 }
 0x666   : > { %v3031_v37 = vadd.f32 %v6914_v3, %v3030_v58 }
 0x667   : > { %v4378_v62 = vpop.f32.mrf.mxu0 }
 0x668   : > { %v3042_v30 = vadd.f32 %v4378_v62, %v6914_v3  ;;  %4976 = vtanh.f32 %v3031_v37 }
 0x669   : > { %v3033_v51 = vpop.f32.mrf.mxu0 }
 0x66a   : > { %v3034_v42 = vadd.f32 %v6914_v3, %v3033_v51  ;;  %4978 = vtanh.f32 %v3042_v30 }
 0x66c   : > { %4980 = vtanh.f32 %v3034_v42 }
 0x66d   : > { %4982 = vtanh.f32 %v3039_v36 }
 0x673   : > { %v4381_v23 = vpop.f32.mrf.mxu0 }
 0x674   : > { %v3055_v45 = vadd.f32 %v4381_v23, %v6914_v3 }
 0x675   : > { %v3046_v26 = vpop.f32.mrf.mxu0  ;;  %v4977_v31 = vpop.eup %4976 }
 0x676   : > { %v3047_v24 = vadd.f32 %v6914_v3, %v3046_v26 }
 0x677   : > { %v4382_v15 = vpop.f32.mrf.mxu0  ;;  %v4979_v1 = vpop.eup %4978 }
 0x678   : > { %v3058_v2 = vadd.f32 %v4382_v15, %v6914_v3  ;;  %4984 = vtanh.f32 %v3047_v24 }
 0x679   : > { %v4981_v41 = vpop.eup %4980  ;;  %v3049_v60 = vpop.f32.mrf.mxu0 }
 0x67a   : > { %v4983_v21 = vpop.eup %4982  ;;  %v3050_v5 = vadd.f32 %v6914_v3, %v3049_v60  ;;  %v3189_v39 = vpack.c.bf16 %v4981_v41, %v4977_v31  ;;  %4986 = vtanh.f32 %v3058_v2 }
 0x67b   : > { %v3190_v54 = vpack.c.bf16 %v4979_v1, %v4983_v21 }
 0x67c   : > { %v4385_v27 = vpop.f32.mrf.mxu0  ;;  %4988 = vtanh.f32 %v3050_v5  ;;  %4423 = vmatprep.mubr.bf16.mxu1 %v3189_v39 }
 0x67d   : > { %4990 = vtanh.f32 %v3055_v45  ;;  %4424 = vmatmul.mubr.bf16.vlgmr.msra.gmra.mxu1 %v3190_v54  ;;  %v3071_v20 = vadd.f32 %v4385_v27, %v6914_v3 }
 0x67e   : > { %v3062_v29 = vpop.f32.mrf.mxu0 }
 0x67f   : > { %v3063_v40 = vadd.f32 %v6914_v3, %v3062_v29 }
 0x680   : > { %v4386_v53 = vpop.f32.mrf.mxu0 }
 0x681   : > { %v3074_v4 = vadd.f32 %v4386_v53, %v6914_v3  ;;  %4992 = vtanh.f32 %v3063_v40 }
 0x682   : > { %v3065_v59 = vpop.f32.mrf.mxu0 }
 0x683   : > { %v3066_v8 = vadd.f32 %v6914_v3, %v3065_v59  ;;  %4994 = vtanh.f32 %v3074_v4 }
 0x684   : > { %v4389_v47 = vpop.f32.mrf.mxu0 }
 0x685   : > { %4996 = vtanh.f32 %v3066_v8  ;;  %v4985_v57 = vpop.eup %4984  ;;  %v3087_v34 = vadd.f32 %v4389_v47, %v6914_v3 }
 0x686   : > { %4998 = vtanh.f32 %v3071_v20  ;;  %v3078_v52 = vpop.f32.mrf.mxu0 }
 0x687   : > { %v3079_v19 = vadd.f32 %v6914_v3, %v3078_v52  ;;  %v4987_v18 = vpop.eup %4986 }
 0x688   : > { %v4390_v56 = vpop.f32.mrf.mxu0 }
 0x689   : > { %v4989_v49 = vpop.eup %4988  ;;  %v3090_v10 = vadd.f32 %v4390_v56, %v6914_v3  ;;  %5000 = vtanh.f32 %v3079_v19 }
 0x68a   : > { %v4991_v11 = vpop.eup %4990  ;;  %v3081_v9 = vpop.f32.mrf.mxu0  ;;  %v3191_v12 = vpack.c.bf16 %v4989_v49, %v4985_v57 }
 0x68b   : > { %v3082_v17 = vadd.f32 %v6914_v3, %v3081_v9  ;;  %v3192_v61 = vpack.c.bf16 %v4987_v18, %v4991_v11  ;;  %5002 = vtanh.f32 %v3090_v10 }
 0x68c   : > { %v4393_v63 = vpop.f32.mrf.mxu0  ;;  %4427 = vmatprep.mubr.bf16.mxu1 %v3191_v12 }
 0x68d   : > { %5004 = vtanh.f32 %v3082_v17  ;;  %4428 = vmatmul.mubr.bf16.gmra.mxu1 %v3192_v61  ;;  %v3103_v33 = vadd.f32 %v4393_v63, %v6914_v3 }
 0x68e   : > { %5006 = vtanh.f32 %v3087_v34  ;;  %v3094_v7 = vpop.f32.mrf.mxu0  ;;  %v4993_v16 = vpop.eup %4992 }
 0x68f   : > { %v3095_v55 = vadd.f32 %v6914_v3, %v3094_v7 }
 0x690   : > { %v4995_v0 = vpop.eup %4994  ;;  %v4394_v48 = vpop.f32.mrf.mxu0 }
 0x691   : > { %v3106_v38 = vadd.f32 %v4394_v48, %v6914_v3  ;;  %5008 = vtanh.f32 %v3095_v55 }
 0x692   : > { %v4997_v43 = vpop.eup %4996  ;;  %v3097_v32 = vpop.f32.mrf.mxu0 }
 0x693   : > { %v4999_v6 = vpop.eup %4998  ;;  %v3193_v14 = vpack.c.bf16 %v4997_v43, %v4993_v16  ;;  %v3098_v22 = vadd.f32 %v6914_v3, %v3097_v32  ;;  %5010 = vtanh.f32 %v3106_v38  ;;  %v3441_v43 = vpop.permute.xlu1 %3440 }
 0x694   : > { %v3194_v25 = vpack.c.bf16 %v4995_v0, %v4999_v6  ;;  %v4397_v35 = vpop.f32.mrf.mxu0  ;;  %v3437_v0 = vpop.permute.xlu0 %3436 }
 0x695   : > { %4431 = vmatprep.mubr.bf16.mxu1 %v3193_v14  ;;  %5012 = vtanh.f32 %v3098_v22  ;;  %v3119_v62 = vadd.f32 %v4397_v35, %v6914_v3  ;;  %v6951_v14 = vld [vmem:[%s7029_s2 + $0x7] ss:$0 sm:$0xff] }
 0x696   : > { %4432 = vmatmul.mubr.bf16.gmra.mxu1 %v3194_v25  ;;  %5014 = vtanh.f32 %v3103_v33  ;;  %v3110_v44 = vpop.f32.mrf.mxu0  ;;  %v5001_v46 = vpop.eup %5000 }
 0x697   : > { %v3111_v28 = vadd.f32 %v6914_v3, %v3110_v44  ;;  %v3443_v6 = vpop.permute.xlu1 %3442 }
 0x698   : > { %v4398_v50 = vpop.f32.mrf.mxu0  ;;  %v5003_v13 = vpop.eup %5002 }
 0x699   : > { %v3122_v58 = vadd.f32 %v4398_v50, %v6914_v3  ;;  %5016 = vtanh.f32 %v3111_v28  ;;  %v3439_v48 = vpop.permute.xlu0 %3438 }
 0x69a   : > { %v5005_v37 = vpop.eup %5004  ;;  %v3113_v30 = vpop.f32.mrf.mxu0 }
 0x69b   : > { %v5007_v36 = vpop.eup %5006  ;;  %v3114_v51 = vadd.f32 %v6914_v3, %v3113_v30  ;;  %v3195_v42 = vpack.c.bf16 %v5005_v37, %v5001_v46  ;;  %5018 = vtanh.f32 %v3122_v58  ;;  %v3451_v33 = vpop.permute.xlu1 %3450 }
 0x69c   : > { %v4401_v23 = vpop.f32.mrf.mxu0  ;;  %v3196_v26 = vpack.c.bf16 %v5003_v13, %v5007_v36 }
 0x69d   : > { %5020 = vtanh.f32 %v3114_v51  ;;  %4435 = vmatprep.mubr.bf16.mxu1 %v3195_v42  ;;  %v3135_v60 = vadd.f32 %v4401_v23, %v6914_v3  ;;  %v3449_v38 = vpop.permute.xlu0 %3448 }
 0x69e   : > { %5022 = vtanh.f32 %v3119_v62  ;;  %v3126_v24 = vpop.f32.mrf.mxu0  ;;  %4436 = vmatmul.mubr.bf16.gmra.mxu1 %v3196_v26  ;;  %v5009_v15 = vpop.eup %5008 }
 0x69f   : > { %v3127_v31 = vadd.f32 %v6914_v3, %v3126_v24  ;;  %v3447_v22 = vpop.permute.xlu1 %3446 }
 0x6a0   : > { %v4402_v1 = vpop.f32.mrf.mxu0  ;;  %v5011_v2 = vpop.eup %5010 }
 0x6a1   : > { %v3138_v41 = vadd.f32 %v4402_v1, %v6914_v3  ;;  %5024 = vtanh.f32 %v3127_v31  ;;  %v3445_v32 = vpop.permute.xlu0 %3444 }
 0x6a2   : > { %v5013_v45 = vpop.eup %5012  ;;  %v3129_v21 = vpop.f32.mrf.mxu0 }
 0x6a3   : > { %v5015_v5 = vpop.eup %5014  ;;  %v3130_v39 = vadd.f32 %v6914_v3, %v3129_v21  ;;  %v3197_v27 = vpack.c.bf16 %v5013_v45, %v5009_v15  ;;  %5026 = vtanh.f32 %v3138_v41  ;;  %v3459_v62 = vpop.permute.xlu1 %3458 }
 0x6a4   : > { %v4405_v54 = vpop.f32.mrf.mxu0  ;;  %v3198_v29 = vpack.c.bf16 %v5011_v2, %v5015_v5 }
 0x6a5   : > { %5028 = vtanh.f32 %v3130_v39  ;;  %4439 = vmatprep.mubr.bf16.mxu1 %v3197_v27  ;;  %v3151_v52 = vadd.f32 %v4405_v54, %v6914_v3  ;;  %v3457_v35 = vpop.permute.xlu0 %3456 }
 0x6a6   : > { %5030 = vtanh.f32 %v3135_v60  ;;  %v3142_v40 = vpop.f32.mrf.mxu0  ;;  %4440 = vmatmul.mubr.bf16.gmra.mxu1 %v3198_v29  ;;  %v5017_v4 = vpop.eup %5016 }
 0x6a7   : > { %v3143_v53 = vadd.f32 %v6914_v3, %v3142_v40  ;;  %v3455_v26 = vpop.permute.xlu1 %3454 }
 0x6a8   : > { %v4406_v20 = vpop.f32.mrf.mxu0  ;;  %v5019_v59 = vpop.eup %5018 }
 0x6a9   : > { %v3154_v8 = vadd.f32 %v4406_v20, %v6914_v3  ;;  %5032 = vtanh.f32 %v3143_v53  ;;  %v3453_v36 = vpop.permute.xlu0 %3452 }
 0x6aa   : > { %v5021_v47 = vpop.eup %5020  ;;  %v3145_v57 = vpop.f32.mrf.mxu0 }
 0x6ab   : > { %v5023_v19 = vpop.eup %5022  ;;  %v3146_v18 = vadd.f32 %v6914_v3, %v3145_v57  ;;  %v3199_v56 = vpack.c.bf16 %v5021_v47, %v5017_v4  ;;  %5034 = vtanh.f32 %v3154_v8  ;;  %v3467_v1 = vpop.permute.xlu1 %3466 }
 0x6ac   : > { %v3200_v49 = vpack.c.bf16 %v5019_v59, %v5023_v19 }
 0x6ad   : > { %5036 = vtanh.f32 %v3146_v18  ;;  %4443 = vmatprep.mubr.bf16.mxu1 %v3199_v56  ;;  %v3465_v24 = vpop.permute.xlu0 %3464 }
 0x6ae   : > { %5038 = vtanh.f32 %v3151_v52  ;;  %4444 = vmatmul.mubr.bf16.gmra.mxu1 %v3200_v49  ;;  %v5025_v10 = vpop.eup %5024 }
 0x6af   : > { %v3463_v40 = vpop.permute.xlu1 %3462 }
 0x6b0   : > { %v5027_v11 = vpop.eup %5026 }
 0x6b1   : > { %v3461_v41 = vpop.permute.xlu0 %3460 }
 0x6b2   : > { %v5029_v34 = vpop.eup %5028 }
 0x6b3   : > { %v5031_v9 = vpop.eup %5030  ;;  %v3201_v12 = vpack.c.bf16 %v5029_v34, %v5025_v10  ;;  %v3475_v56 = vpop.permute.xlu1 %3474 }
 0x6b4   : > { %v3202_v17 = vpack.c.bf16 %v5027_v11, %v5031_v9 }
 0x6b5   : > { %4447 = vmatprep.mubr.bf16.mxu1 %v3201_v12  ;;  %v3473_v4 = vpop.permute.xlu0 %3472 }
 0x6b6   : > { %4448 = vmatmul.mubr.bf16.gmra.mxu1 %v3202_v17  ;;  %v5033_v61 = vpop.eup %5032 }
 0x6b8   : > { %v5035_v63 = vpop.eup %5034 }
 0x6b9   : > { %v3469_v10 = vpop.permute.xlu0 %3468 }
 0x6ba   : > { %v5037_v7 = vpop.eup %5036 }
 0x6bb   : > { %v5039_v16 = vpop.eup %5038  ;;  %v3203_v3 = vpack.c.bf16 %v5037_v7, %v5033_v61 }
 0x6bc   : > { %v3204_v55 = vpack.c.bf16 %v5035_v63, %v5039_v16  ;;  %v3471_v63 = vpop.permute.xlu1 %3470 }
 0x6bd   : > { %4451 = vmatprep.mubr.bf16.mxu1 %v3203_v3  ;;  %v3481_v3 = vpop.permute.xlu0 %3480 }
 0x6be   : > { %4452 = vmatmul.mubr.bf16.gmra.mxu1 %v3204_v55 }
 0x73d   : > { %v4425_v25 = vpop.f32.mrf.mxu1 }
 0x73e   : > { %v3318_v44 = vadd.f32 %v4425_v25, %v6951_v14 }
 0x73f   : > { %v3309_v28 = vpop.f32.mrf.mxu1 }
 0x740   : > { %v3502_v46 = vadd.f32 %v3441_v43, %v3318_v44  ;;  %v3310_v50 = vadd.f32 %v6951_v14, %v3309_v28 }
 0x741   : > { %v4426_v13 = vpop.f32.mrf.mxu1 }
 0x742   : > { %3534 = vst [vmem:[%s6959_s24 + $0x10] sm:$0xff] %v3502_v46  ;;  %v3500_v58 = vadd.f32 %v3437_v0, %v3310_v50  ;;  %v3321_v37 = vadd.f32 %v4426_v13, %v6951_v14 }
 0x743   : > { %v3312_v30 = vpop.f32.mrf.mxu1 }
 0x744   : > { %3532 = vst [vmem:[%s6959_s24] sm:$0xff] %v3500_v58  ;;  %v3503_v51 = vadd.f32 %v3443_v6, %v3321_v37  ;;  %v3313_v42 = vadd.f32 %v6951_v14, %v3312_v30 }
 0x746   : > { %3535 = vst [vmem:[%s6959_s24 + $0x18] sm:$0xff] %v3503_v51  ;;  %v3501_v23 = vadd.f32 %v3439_v48, %v3313_v42 }
 0x748   : > { %3533 = vst [vmem:[%s6959_s24 + $0x8] sm:$0xff] %v3501_v23 }
 0x74d   : > { %v4429_v31 = vpop.f32.mrf.mxu1 }
 0x74e   : > { %v3334_v15 = vadd.f32 %v4429_v31, %v6951_v14 }
 0x74f   : > { %v3325_v2 = vpop.f32.mrf.mxu1 }
 0x750   : > { %v3506_v45 = vadd.f32 %v3449_v38, %v3334_v15  ;;  %v3326_v60 = vadd.f32 %v6951_v14, %v3325_v2 }
 0x751   : > { %v4430_v21 = vpop.f32.mrf.mxu1 }
 0x752   : > { %3538 = vst [vmem:[%s6959_s24 + $0x30] sm:$0xff] %v3506_v45  ;;  %v3504_v5 = vadd.f32 %v3445_v32, %v3326_v60  ;;  %v3337_v39 = vadd.f32 %v4430_v21, %v6951_v14  ;;  %v3483_v32 = vpop.permute.xlu1 %3482 }
 0x753   : > { %v3328_v27 = vpop.f32.mrf.mxu1 }
 0x754   : > { %3536 = vst [vmem:[%s6959_s24 + $0x20] sm:$0xff] %v3504_v5  ;;  %v3507_v54 = vadd.f32 %v3451_v33, %v3337_v39  ;;  %v3329_v29 = vadd.f32 %v6951_v14, %v3328_v27 }
 0x756   : > { %v4433_v53 = vpop.f32.mrf.mxu1  ;;  %3539 = vst [vmem:[%s6959_s24 + $0x38] sm:$0xff] %v3507_v54  ;;  %v3505_v20 = vadd.f32 %v3447_v22, %v3329_v29 }
 0x757   : > { %v3350_v59 = vadd.f32 %v4433_v53, %v6951_v14 }
 0x758   : > { %v3341_v8 = vpop.f32.mrf.mxu1  ;;  %3537 = vst [vmem:[%s6959_s24 + $0x28] sm:$0xff] %v3505_v20 }
 0x759   : > { %v3510_v47 = vadd.f32 %v3457_v35, %v3350_v59  ;;  %v3342_v52 = vadd.f32 %v6951_v14, %v3341_v8  ;;  %v3477_v35 = vpop.permute.xlu0 %3476 }
 0x75a   : > { %v4434_v57 = vpop.f32.mrf.mxu1 }
 0x75b   : > { %3542 = vst [vmem:[%s6959_s24 + $0x50] sm:$0xff] %v3510_v47  ;;  %v3508_v19 = vadd.f32 %v3453_v36, %v3342_v52  ;;  %v3353_v18 = vadd.f32 %v4434_v57, %v6951_v14 }
 0x75c   : > { %v3344_v49 = vpop.f32.mrf.mxu1 }
 0x75d   : > { %3540 = vst [vmem:[%s6959_s24 + $0x40] sm:$0xff] %v3508_v19  ;;  %v3511_v11 = vadd.f32 %v3459_v62, %v3353_v18  ;;  %v3345_v34 = vadd.f32 %v6951_v14, %v3344_v49  ;;  %v3479_v62 = vpop.permute.xlu1 %3478  ;;  %v3489_v51 = vpop.permute.xlu0 %3488 }
 0x75e   : > { %v4437_v12 = vpop.f32.mrf.mxu1 }
 0x75f   : > { %3543 = vst [vmem:[%s6959_s24 + $0x58] sm:$0xff] %v3511_v11  ;;  %v3509_v9 = vadd.f32 %v3455_v26, %v3345_v34  ;;  %v3366_v17 = vadd.f32 %v4437_v12, %v6951_v14 }
 0x760   : > { %v3357_v61 = vpop.f32.mrf.mxu1 }
 0x761   : > { %3541 = vst [vmem:[%s6959_s24 + $0x48] sm:$0xff] %v3509_v9  ;;  %v3514_v7 = vadd.f32 %v3465_v24, %v3366_v17  ;;  %v3358_v16 = vadd.f32 %v6951_v14, %v3357_v61  ;;  %v3491_v2 = vpop.permute.xlu1 %3490  ;;  %v3485_v60 = vpop.permute.xlu0 %3484 }
 0x762   : > { %v4438_v55 = vpop.f32.mrf.mxu1 }
 0x763   : > { %3546 = vst [vmem:[%s6959_s24 + $0x70] sm:$0xff] %v3514_v7  ;;  %v3512_v0 = vadd.f32 %v3461_v41, %v3358_v16  ;;  %v3369_v48 = vadd.f32 %v4438_v55, %v6951_v14 }
 0x764   : > { %v3360_v43 = vpop.f32.mrf.mxu1 }
 0x765   : > { %3544 = vst [vmem:[%s6959_s24 + $0x60] sm:$0xff] %v3512_v0  ;;  %v3515_v38 = vadd.f32 %v3467_v1, %v3369_v48  ;;  %v3361_v6 = vadd.f32 %v6951_v14, %v3360_v43  ;;  %v3487_v53 = vpop.permute.xlu1 %3486  ;;  %v3493_v59 = vpop.permute.xlu0 %3492 }
 0x766   : > { %v4441_v33 = vpop.f32.mrf.mxu1 }
 0x767   : > { %3547 = vst [vmem:[%s6959_s24 + $0x78] sm:$0xff] %v3515_v38  ;;  %v3513_v22 = vadd.f32 %v3463_v40, %v3361_v6  ;;  %v3382_v25 = vadd.f32 %v4441_v33, %v6951_v14 }
 0x768   : > { %v3373_v44 = vpop.f32.mrf.mxu1 }
 0x769   : > { %3545 = vst [vmem:[%s6959_s24 + $0x68] sm:$0xff] %v3513_v22  ;;  %v3518_v28 = vadd.f32 %v3473_v4, %v3382_v25  ;;  %v3374_v46 = vadd.f32 %v6951_v14, %v3373_v44  ;;  %v3497_v34 = vpop.permute.xlu0 %3496 }
 0x76a   : > { %v4442_v50 = vpop.f32.mrf.mxu1 }
 0x76b   : > { %3550 = vst [vmem:[%s6959_s24 + $0x90] sm:$0xff] %v3518_v28  ;;  %v3516_v13 = vadd.f32 %v3469_v10, %v3374_v46  ;;  %v3385_v58 = vadd.f32 %v4442_v50, %v6951_v14 }
 0x76c   : > { %v3376_v37 = vpop.f32.mrf.mxu1 }
 0x76d   : > { %3548 = vst [vmem:[%s6959_s24 + $0x80] sm:$0xff] %v3516_v13  ;;  %v3519_v30 = vadd.f32 %v3475_v56, %v3385_v58  ;;  %v3377_v36 = vadd.f32 %v6951_v14, %v3376_v37  ;;  %v3495_v56 = vpop.permute.xlu1 %3494 }
 0x76e   : > { %v4445_v42 = vpop.f32.mrf.mxu1 }
 0x76f   : > { %3551 = vst [vmem:[%s6959_s24 + $0x98] sm:$0xff] %v3519_v30  ;;  %v3517_v23 = vadd.f32 %v3471_v63, %v3377_v36  ;;  %v3398_v26 = vadd.f32 %v4445_v42, %v6951_v14 }
 0x770   : > { %v3389_v24 = vpop.f32.mrf.mxu1 }
 0x771   : > { %3549 = vst [vmem:[%s6959_s24 + $0x88] sm:$0xff] %v3517_v23  ;;  %v3522_v31 = vadd.f32 %v3481_v3, %v3398_v26  ;;  %v3390_v15 = vadd.f32 %v6951_v14, %v3389_v24  ;;  %v3499_v16 = vpop.permute.xlu1 %3498 }
 0x772   : > { %v4446_v1 = vpop.f32.mrf.mxu1 }
 0x773   : > { %3554 = vst [vmem:[%s6959_s24 + $0xb0] sm:$0xff] %v3522_v31  ;;  %v3520_v41 = vadd.f32 %v3477_v35, %v3390_v15  ;;  %v3401_v45 = vadd.f32 %v4446_v1, %v6951_v14 }
 0x774   : > { %v3392_v21 = vpop.f32.mrf.mxu1 }
 0x775   : > { %3552 = vst [vmem:[%s6959_s24 + $0xa0] sm:$0xff] %v3520_v41  ;;  %v3523_v5 = vadd.f32 %v3483_v32, %v3401_v45  ;;  %v3393_v39 = vadd.f32 %v6951_v14, %v3392_v21 }
 0x776   : > { %v4449_v27 = vpop.f32.mrf.mxu1 }
 0x777   : > { %3555 = vst [vmem:[%s6959_s24 + $0xb8] sm:$0xff] %v3523_v5  ;;  %v3521_v54 = vadd.f32 %v3479_v62, %v3393_v39  ;;  %v3414_v29 = vadd.f32 %v4449_v27, %v6951_v14 }
 0x778   : > { %v3405_v40 = vpop.f32.mrf.mxu1 }
 0x779   : > { %3553 = vst [vmem:[%s6959_s24 + $0xa8] sm:$0xff] %v3521_v54  ;;  %v3526_v4 = vadd.f32 %v3489_v51, %v3414_v29  ;;  %v3406_v20 = vadd.f32 %v6951_v14, %v3405_v40 }
 0x77a   : > { %v4450_v8 = vpop.f32.mrf.mxu1 }
 0x77b   : > { %3558 = vst [vmem:[%s6959_s24 + $0xd0] sm:$0xff] %v3526_v4  ;;  %v3524_v47 = vadd.f32 %v3485_v60, %v3406_v20  ;;  %v3417_v52 = vadd.f32 %v4450_v8, %v6951_v14 }
 0x77c   : > { %v3408_v57 = vpop.f32.mrf.mxu1 }
 0x77d   : > { %3556 = vst [vmem:[%s6959_s24 + $0xc0] sm:$0xff] %v3524_v47  ;;  %v3527_v19 = vadd.f32 %v3491_v2, %v3417_v52  ;;  %v3409_v18 = vadd.f32 %v6951_v14, %v3408_v57 }
 0x77e   : > { %v4453_v49 = vpop.f32.mrf.mxu1 }
 0x77f   : > { %3559 = vst [vmem:[%s6959_s24 + $0xd8] sm:$0xff] %v3527_v19  ;;  %v3525_v10 = vadd.f32 %v3487_v53, %v3409_v18  ;;  %v3430_v11 = vadd.f32 %v4453_v49, %v6951_v14 }
 0x780   : > { %v3421_v9 = vpop.f32.mrf.mxu1 }
 0x781   : > { %3557 = vst [vmem:[%s6959_s24 + $0xc8] sm:$0xff] %v3525_v10  ;;  %v3530_v12 = vadd.f32 %v3497_v34, %v3430_v11  ;;  %v3422_v17 = vadd.f32 %v6951_v14, %v3421_v9 }
 0x782   : > { %v4454_v61 = vpop.f32.mrf.mxu1 }
 0x783   : > { %3562 = vst [vmem:[%s6959_s24 + $0xf0] sm:$0xff] %v3530_v12  ;;  %v3528_v63 = vadd.f32 %v3493_v59, %v3422_v17  ;;  %v3433_v7 = vadd.f32 %v4454_v61, %v6951_v14 }
 0x784   : > { %v3424_v3 = vpop.f32.mrf.mxu1 }
 0x785   : > { %3560 = vst [vmem:[%s6959_s24 + $0xe0] sm:$0xff] %v3528_v63  ;;  %v3531_v55 = vadd.f32 %v3499_v16, %v3433_v7  ;;  %v3425_v0 = vadd.f32 %v6951_v14, %v3424_v3 }
 0x787   : > { %3563 = vst [vmem:[%s6959_s24 + $0xf8] sm:$0xff] %v3531_v55  ;;  %v3529_v48 = vadd.f32 %v3495_v56, %v3425_v0 }
 0x789   : > { %3561 = vst [vmem:[%s6959_s24 + $0xe8] sm:$0xff] %v3529_v48 }
 0x78a PF: > { %s13_s12 = sadd.s32 1, %s5078_s12  }
 0x78b   : > { %p10_p4 = scmp.ge.s32.totalorder %s13_s12, 4  }
 0x78d   :  { %12 = sbr.rel (!%p10_p4) target bundleno = 1 (0x1), region = 69 }

</bundles_post_ra>
